<compile_context>
chip_gen: v6e
topology: v6e:2x2x1
jax: 0.10.0
libtpu: 0.0.40
codegen_flags: <defaults>
</compile_context>

<pallas_src>
import math

import jax
import jax.numpy as jnp
from jax.experimental import pallas as pl
from jax.experimental.pallas import tpu as pltpu

# ----------------------------- small config -----------------------------
B = 2
IMG = (8, 8, 8)                       # (T, H, W)
PATCH = (4, 4, 4)
GRID3 = tuple(IMG[i] // PATCH[i] for i in range(3))  # (2, 2, 2)
NPATCH = GRID3[0] * GRID3[1] * GRID3[2]              # 8
PDIM = PATCH[0] * PATCH[1] * PATCH[2]                # 64
PDIM_PAD = 128                                       # lane-dense decoder output
E = 96                                               # hidden_size (div by 3 and heads)
HEADS = 4
HD = E // HEADS                                      # 24
INTER = 128                                          # intermediate_size
NL = 2                                               # num_hidden_layers
L = NPATCH + 2                                       # real sequence length (10)
LP = 16                                              # per-batch rows padded to 8-multiple
NORM_PIXEL_LOSS = True
LN_EPS = 1e-5
NEG_BIG = -1e30


def _layernorm(x, w, b, eps=LN_EPS):
    mu = jnp.mean(x, axis=-1, keepdims=True)
    var = jnp.mean((x - mu) ** 2, axis=-1, keepdims=True)
    return (x - mu) * jax.lax.rsqrt(var + eps) * w[None, :] + b[None, :]


def recon_kernel(patches_ref, add_ref, conv_w_ref,
                 ln1_w_ref, ln1_b_ref,
                 a_ref, wv_ref, wo_ref, bo_ref,
                 ln2_w_ref, ln2_b_ref,
                 w1_ref, b1_ref, w2_ref, b2_ref,
                 lnf_w_ref, lnf_b_ref,
                 dec_w_ref, dec_b_ref,
                 bias_ref, labels_ref, mask_ref,
                 sq_ref, logits_ref):
    bias = bias_ref[...]                                     # [HEADS*LP, LP] (tiled per head)

    # PatchEmbed (+ start/end token embeds + conv bias + pos-embed folded into `add`)
    x = jnp.dot(patches_ref[...], conv_w_ref[...],
                preferred_element_type=jnp.float32) + add_ref[...]          # [LP, E]

    for l in range(NL):
        # ----------------------- self-attention block -----------------------
        h = _layernorm(x, ln1_w_ref[l], ln1_b_ref[l])                       # [LP, E]
        # Fused V projection for all heads (one push).
        v_all = jnp.dot(h, wv_ref[l], preferred_element_type=jnp.float32)   # [LP, E]

        # Scores per head via precomputed A_h = (Wq_h / sqrt(hd)) @ Wk_h^T:
        # s_h = (h @ A_h) @ h^T  (scale pre-folded, no q/k extraction, no lane slices).
        s_blocks = []
        for hh in range(HEADS):
            idx = l * HEADS + hh
            tmp = jnp.dot(h, a_ref[idx], preferred_element_type=jnp.float32)        # [LP, E]
            s_blocks.append(jax.lax.dot_general(
                tmp, h, (((1,), (1,)), ((), ())),
                preferred_element_type=jnp.float32))                                 # [LP, LP]
        s = jnp.concatenate(s_blocks, axis=0) + bias                                 # [H*LP, LP]

        # One batched softmax for all heads (2 lane-reductions + 1 reciprocal).
        s = s - jnp.max(s, axis=-1, keepdims=True)
        p = jnp.exp(s)
        p = p * pl.reciprocal(jnp.sum(p, axis=-1, keepdims=True), approx=True)

        # One batched P @ V over all heads; cross-head lanes are discarded by the
        # row-masked Wo matrices (precomputed), so no lane slicing of ctx.
        ctx = jnp.dot(p, v_all, preferred_element_type=jnp.float32)          # [H*LP, E]
        attn = jnp.zeros((LP, E), jnp.float32)
        for hh in range(HEADS):
            idx = l * HEADS + hh
            attn = attn + jnp.dot(ctx[hh * LP:(hh + 1) * LP, :], wo_ref[idx],
                                  preferred_element_type=jnp.float32)        # [LP, E]
        x = x + attn + bo_ref[l][None, :]

        # -------------------------------- MLP --------------------------------
        h2 = _layernorm(x, ln2_w_ref[l], ln2_b_ref[l])
        m = jnp.dot(h2, w1_ref[l],
                    preferred_element_type=jnp.float32) + b1_ref[l][None, :]
        # TODO(synk): torchvision-style MLPBlock uses exact (erf) GELU;
        # tanh-approx GELU used here (EUP-supported transcendental).
        m = jax.nn.gelu(m, approximate=True)
        m = jnp.dot(m, w2_ref[l],
                    preferred_element_type=jnp.float32) + b2_ref[l][None, :]
        x = x + m

    # --------------------- final norm + decoder_pred ------------------------
    x = _layernorm(x, lnf_w_ref[0], lnf_b_ref[0])
    logits = jnp.dot(x, dec_w_ref[...],
                     preferred_element_type=jnp.float32) + dec_b_ref[...]    # [LP, 128]
    logits_ref[...] = logits

    # ----------------------- masked reconstruction loss ---------------------
    # labels are pre-normalized and zero-padded; pad rows/lanes contribute 0.
    diff = (logits - labels_ref[...]) * mask_ref[...]
    sq_ref[...] = jnp.zeros((1, 1), jnp.float32) + jnp.sum(diff * diff)


# ------------------------------ JAX glue --------------------------------
def patchify(x):
    """x: [B, 1, T, H, W] -> [B, NPATCH, PDIM] (matches PatchEmbed.patchify)."""
    pt, ph, pw = PATCH
    t, h, w = GRID3
    x = x.reshape(B, 1, t, pt, h, ph, w, pw)
    x = jnp.einsum('nctphqwr->nthwpqrc', x)
    return x.reshape(B, t * h * w, pt * ph * pw)


def sincos_pos_embed(t, h, w, embed_dim):
    def emb1d(dim, pos):
        omega = jnp.arange(dim // 2, dtype=jnp.float32) / (dim / 2.0)
        omega = 1.0 / (10000.0 ** omega)
        pos = pos.reshape(-1)
        out = jnp.einsum('m,d->md', pos, omega)
        return jnp.concatenate([jnp.sin(out), jnp.cos(out)], axis=1)

    gt = jnp.arange(t, dtype=jnp.float32)
    gh = jnp.arange(h, dtype=jnp.float32)
    gw = jnp.arange(w, dtype=jnp.float32)
    grid = jnp.stack(jnp.meshgrid(gt, gh, gw, indexing='ij'), axis=0)
    grid = grid.reshape(3, 1, t, h, w)
    e = embed_dim // 3
    return jnp.concatenate([emb1d(e, grid[0]), emb1d(e, grid[1]), emb1d(e, grid[2])],
                           axis=1)


def make_params(key):
    ks = jax.random.split(key, 16)
    nrm = lambda k, shape: jax.random.normal(k, shape, jnp.float32) * 0.02
    p = {}
    p['embed_tokens'] = nrm(ks[0], (4, E))
    p['conv_w'] = nrm(ks[1], (PDIM, E))            # Conv3d weight reshaped+transposed
    p['conv_b'] = jnp.zeros((1, E), jnp.float32)
    p['ln1_w'] = jnp.ones((NL, E), jnp.float32)
    p['ln1_b'] = jnp.zeros((NL, E), jnp.float32)
    p['wq'] = nrm(ks[2], (NL, E, E))               # x @ Wq  (Wq = q_proj.weight.T)
    p['wk'] = nrm(ks[3], (NL, E, E))
    p['wv'] = nrm(ks[4], (NL, E, E))
    p['wo'] = nrm(ks[5], (NL, E, E))               # concat(ctx) @ Wo
    p['bo'] = jnp.zeros((NL, E), jnp.float32)
    p['ln2_w'] = jnp.ones((NL, E), jnp.float32)
    p['ln2_b'] = jnp.zeros((NL, E), jnp.float32)
    p['w1'] = nrm(ks[6], (NL, E, INTER))
    p['b1'] = jnp.zeros((NL, INTER), jnp.float32)
    p['w2'] = nrm(ks[7], (NL, INTER, E))
    p['b2'] = jnp.zeros((NL, E), jnp.float32)
    p['lnf_w'] = jnp.ones((1, E), jnp.float32)
    p['lnf_b'] = jnp.zeros((1, E), jnp.float32)
    p['dec_w'] = nrm(ks[8], (E, PDIM))
    p['dec_b'] = jnp.zeros((1, PDIM), jnp.float32)
    return p


def prepare_params(p):
    """One-time (outside the per-call jit) transformation of raw params into the
    kernel-ready layout: hoists all parameter-only glue off the hot path."""
    scale = 1.0 / math.sqrt(HD)

    # A[l,h] = (Wq_h * scale) @ Wk_h^T  : scores = (h @ A) @ h^T, scale folded in.
    wq = p['wq'].reshape(NL, E, HEADS, HD)
    wk = p['wk'].reshape(NL, E, HEADS, HD)
    A = jnp.einsum('lehd,lfhd->lhef', wq * scale, wk).reshape(NL * HEADS, E, E)

    # Row-masked output projections: ctx_block_h @ Wo_masked_h == ctx_h @ Wo_h.
    wo_m = jnp.zeros((NL, HEADS, E, E), jnp.float32)
    for hh in range(HEADS):
        wo_m = wo_m.at[:, hh, hh * HD:(hh + 1) * HD, :].set(
            p['wo'][:, hh * HD:(hh + 1) * HD, :])
    wo_m = wo_m.reshape(NL * HEADS, E, E)

    # conv bias + sincos pos-embed folded into one additive [LP, E] body
    # (start/end rows and pad rows are zero; token embeds are added per call).
    pos = sincos_pos_embed(*GRID3, E)                               # [NPATCH, E]
    add_body = jnp.zeros((LP, E), jnp.float32).at[1:1 + NPATCH, :].set(
        p['conv_b'][0] + pos)

    # Additive attention bias per batch block: real rows see real rows only;
    # pad rows see themselves (so softmax stays finite).  Tiled across heads.
    valid = jnp.arange(LP) < L
    ok = valid[:, None] & valid[None, :]
    eye = jnp.eye(LP, dtype=bool)
    bias = jnp.where(ok | eye, 0.0, NEG_BIG).astype(jnp.float32)    # [LP, LP]
    bias_heads = jnp.tile(bias, (HEADS, 1))                         # [HEADS*LP, LP]

    # Lane-dense decoder output: zero-pad dec_w / dec_b to 128 columns.
    dec_w = jnp.zeros((E, PDIM_PAD), jnp.float32).at[:, :PDIM].set(p['dec_w'])
    dec_b = jnp.zeros((1, PDIM_PAD), jnp.float32).at[:, :PDIM].set(p['dec_b'])

    prep = dict(
        embed_tokens=p['embed_tokens'], conv_w=p['conv_w'], add_body=add_body,
        bias=bias_heads, A=A, wv=p['wv'], wo_m=wo_m, bo=p['bo'],
        ln1_w=p['ln1_w'], ln1_b=p['ln1_b'], ln2_w=p['ln2_w'], ln2_b=p['ln2_b'],
        w1=p['w1'], b1=p['b1'], w2=p['w2'], b2=p['b2'],
        lnf_w=p['lnf_w'], lnf_b=p['lnf_b'], dec_w=dec_w, dec_b=dec_b)
    return jax.tree_util.tree_map(jnp.asarray, prep)


def recon_forward(prep, input_ids, input_image, prefix_mask):
    img = input_image.reshape(B, 1, *IMG).astype(jnp.float32)
    patches = patchify(img)                                          # [B, NPATCH, PDIM]
    # Patches occupy rows 1..NPATCH; row 0 = start, row L-1 = end, rows >= L pad.
    patches_pad = jnp.pad(patches, ((0, 0), (1, LP - 1 - NPATCH), (0, 0)))  # [B,LP,PDIM]

    emb = prep['embed_tokens']
    start_emb = emb[input_ids[:, 0]]                                 # [B, E]
    end_emb = emb[input_ids[:, -1]]                                  # [B, E]
    add = jnp.broadcast_to(prep['add_body'][None], (B, LP, E))
    add = add.at[:, 0, :].set(start_emb).at[:, L - 1, :].set(end_emb)

    # Labels aligned with logits[..., :-2, :] (rows 0..NPATCH-1), normalized with
    # unbiased variance (torch.var default), zero-padded rows/lanes.
    labels = patches
    if NORM_PIXEL_LOSS:
        mean = jnp.mean(labels, axis=-1, keepdims=True)
        var = jnp.sum((labels - mean) ** 2, axis=-1, keepdims=True) / (PDIM - 1)
        labels = (labels - mean) / jnp.sqrt(var + 1e-6)
    labels_pad = jnp.pad(labels, ((0, 0), (0, LP - NPATCH), (0, PDIM_PAD - PDIM)))

    mask = (prefix_mask[:, 1:NPATCH + 1] > 0).astype(jnp.float32)    # [B, NPATCH]
    mask_pad = jnp.pad(mask[..., None], ((0, 0), (0, LP - NPATCH), (0, 0)))  # [B,LP,1]
    cnt = jnp.sum(mask) * float(PDIM)                                # denominator (glue)

    args = (patches_pad, add, prep['conv_w'],
            prep['ln1_w'], prep['ln1_b'],
            prep['A'], prep['wv'], prep['wo_m'], prep['bo'],
            prep['ln2_w'], prep['ln2_b'],
            prep['w1'], prep['b1'], prep['w2'], prep['b2'],
            prep['lnf_w'], prep['lnf_b'],
            prep['dec_w'], prep['dec_b'],
            prep['bias'], labels_pad, mask_pad)

    def full(shape):
        return pl.BlockSpec(shape, lambda b: (0,) * len(shape))

    in_specs = [
        pl.BlockSpec((None, LP, PDIM), lambda b: (b, 0, 0)),      # patches
        pl.BlockSpec((None, LP, E), lambda b: (b, 0, 0)),         # add
        full((PDIM, E)),                                          # conv_w
        full((NL, E)), full((NL, E)),                             # ln1 w/b
        full((NL * HEADS, E, E)),                                 # A
        full((NL, E, E)),                                         # wv
        full((NL * HEADS, E, E)),                                 # wo masked
        full((NL, E)),                                            # bo
        full((NL, E)), full((NL, E)),                             # ln2 w/b
        full((NL, E, INTER)), full((NL, INTER)),                  # w1/b1
        full((NL, INTER, E)), full((NL, E)),                      # w2/b2
        full((1, E)), full((1, E)),                               # lnf w/b
        full((E, PDIM_PAD)), full((1, PDIM_PAD)),                 # dec w/b
        full((HEADS * LP, LP)),                                   # attn bias (tiled)
        pl.BlockSpec((None, LP, PDIM_PAD), lambda b: (b, 0, 0)),  # labels
        pl.BlockSpec((None, LP, 1), lambda b: (b, 0, 0)),         # row mask
    ]
    out_specs = (
        pl.BlockSpec((None, 1, 1), lambda b: (b, 0, 0)),          # per-batch sq sum
        pl.BlockSpec((None, LP, PDIM_PAD), lambda b: (b, 0, 0)),  # logits (lane-dense)
    )
    out_shape = (jax.ShapeDtypeStruct((B, 1, 1), jnp.float32),
                 jax.ShapeDtypeStruct((B, LP, PDIM_PAD), jnp.float32))

    sq, logits_pad = pl.pallas_call(
        recon_kernel,
        grid=(B,),
        in_specs=in_specs,
        out_specs=out_specs,
        out_shape=out_shape,
        compiler_params=pltpu.CompilerParams(dimension_semantics=("parallel",)),
        cost_estimate=pl.CostEstimate(flops=20_000_000, transcendentals=20_000,
                                      bytes_accessed=2_500_000),
    )(*args)

    loss = jnp.sum(sq) / cnt
    logits = logits_pad[:, :L, :PDIM]
    return loss, logits


if __name__ == "__main__":
    key = jax.random.PRNGKey(0)
    k_param, k_ids, k_img = jax.random.split(key, 3)

    params = make_params(k_param)
    prep = prepare_params(params)          # one-time param prep, off the hot path

    input_ids = jax.random.randint(k_ids, (B, L), 0, 4)              # [2, 10]
    input_image = jax.random.normal(k_img, (B,) + IMG, jnp.float32)  # [2, 8, 8, 8]
    prefix_mask = jnp.zeros((B, L), jnp.float32).at[:, 1:7].set(1.0)  # [2, 10]

    loss, logits = jax.jit(recon_forward)(prep, input_ids, input_image, prefix_mask)
    jax.block_until_ready((loss, logits))
    assert logits.shape == (B, L, PDIM) and logits.dtype == jnp.float32
    assert jnp.isfinite(loss)
    print("KERNEL_OK")
</pallas_src>

<mosaic_0001>
module attributes {stable_mosaic.version = 11 : i64} {
  func.func @recon_kernel(%arg0: i32, %arg1: memref<1x16x64xf32, #tpu.memory_space<vmem>>, %arg2: memref<1x16x96xf32, #tpu.memory_space<vmem>>, %arg3: memref<64x96xf32, #tpu.memory_space<vmem>>, %arg4: memref<2x96xf32, #tpu.memory_space<vmem>>, %arg5: memref<2x96xf32, #tpu.memory_space<vmem>>, %arg6: memref<8x96x96xf32, #tpu.memory_space<vmem>>, %arg7: memref<2x96x96xf32, #tpu.memory_space<vmem>>, %arg8: memref<8x96x96xf32, #tpu.memory_space<vmem>>, %arg9: memref<2x96xf32, #tpu.memory_space<vmem>>, %arg10: memref<2x96xf32, #tpu.memory_space<vmem>>, %arg11: memref<2x96xf32, #tpu.memory_space<vmem>>, %arg12: memref<2x96x128xf32, #tpu.memory_space<vmem>>, %arg13: memref<2x128xf32, #tpu.memory_space<vmem>>, %arg14: memref<2x128x96xf32, #tpu.memory_space<vmem>>, %arg15: memref<2x96xf32, #tpu.memory_space<vmem>>, %arg16: memref<1x96xf32, #tpu.memory_space<vmem>>, %arg17: memref<1x96xf32, #tpu.memory_space<vmem>>, %arg18: memref<96x128xf32, #tpu.memory_space<vmem>>, %arg19: memref<1x128xf32, #tpu.memory_space<vmem>>, %arg20: memref<64x16xf32, #tpu.memory_space<vmem>>, %arg21: memref<1x16x128xf32, #tpu.memory_space<vmem>>, %arg22: memref<1x16x1xf32, #tpu.memory_space<vmem>>, %arg23: memref<1x1x1xf32, #tpu.memory_space<vmem>>, %arg24: memref<1x16x128xf32, #tpu.memory_space<vmem>>) attributes {dimension_semantics = [#tpu.dimension_semantics<parallel>], iteration_bounds = array<i64: 2>, scalar_prefetch = 0 : i64, scratch_operands = 0 : i64, tpu.core_type = #tpu.core_type<tc>, window_params = [{transform_indices = @transform_0, window_bounds = array<i64: 1, 16, 64>}, {transform_indices = @transform_1, window_bounds = array<i64: 1, 16, 96>}, {pipeline_mode = #tpu.pipeline_mode<synchronous>, transform_indices = @transform_2, window_bounds = array<i64: 64, 96>}, {pipeline_mode = #tpu.pipeline_mode<synchronous>, transform_indices = @transform_3, window_bounds = array<i64: 2, 96>}, {pipeline_mode = #tpu.pipeline_mode<synchronous>, transform_indices = @transform_4, window_bounds = array<i64: 2, 96>}, {pipeline_mode = #tpu.pipeline_mode<synchronous>, transform_indices = @transform_5, window_bounds = array<i64: 8, 96, 96>}, {pipeline_mode = #tpu.pipeline_mode<synchronous>, transform_indices = @transform_6, window_bounds = array<i64: 2, 96, 96>}, {pipeline_mode = #tpu.pipeline_mode<synchronous>, transform_indices = @transform_7, window_bounds = array<i64: 8, 96, 96>}, {pipeline_mode = #tpu.pipeline_mode<synchronous>, transform_indices = @transform_8, window_bounds = array<i64: 2, 96>}, {pipeline_mode = #tpu.pipeline_mode<synchronous>, transform_indices = @transform_9, window_bounds = array<i64: 2, 96>}, {pipeline_mode = #tpu.pipeline_mode<synchronous>, transform_indices = @transform_10, window_bounds = array<i64: 2, 96>}, {pipeline_mode = #tpu.pipeline_mode<synchronous>, transform_indices = @transform_11, window_bounds = array<i64: 2, 96, 128>}, {pipeline_mode = #tpu.pipeline_mode<synchronous>, transform_indices = @transform_12, window_bounds = array<i64: 2, 128>}, {pipeline_mode = #tpu.pipeline_mode<synchronous>, transform_indices = @transform_13, window_bounds = array<i64: 2, 128, 96>}, {pipeline_mode = #tpu.pipeline_mode<synchronous>, transform_indices = @transform_14, window_bounds = array<i64: 2, 96>}, {pipeline_mode = #tpu.pipeline_mode<synchronous>, transform_indices = @transform_15, window_bounds = array<i64: 1, 96>}, {pipeline_mode = #tpu.pipeline_mode<synchronous>, transform_indices = @transform_16, window_bounds = array<i64: 1, 96>}, {pipeline_mode = #tpu.pipeline_mode<synchronous>, transform_indices = @transform_17, window_bounds = array<i64: 96, 128>}, {pipeline_mode = #tpu.pipeline_mode<synchronous>, transform_indices = @transform_18, window_bounds = array<i64: 1, 128>}, {pipeline_mode = #tpu.pipeline_mode<synchronous>, transform_indices = @transform_19, window_bounds = array<i64: 64, 16>}, {transform_indices = @transform_20, window_bounds = array<i64: 1, 16, 128>}, {transform_indices = @transform_21, window_bounds = array<i64: 1, 16, 1>}, {transform_indices = @transform_22, window_bounds = array<i64: 1, 1, 1>}, {transform_indices = @transform_23, window_bounds = array<i64: 1, 16, 128>}]} {
    %c0 = arith.constant 0 : index
    %c0_0 = arith.constant 0 : index
    %0 = vector.load %arg20[%c0, %c0_0] : memref<64x16xf32, #tpu.memory_space<vmem>>, vector<64x16xf32>
    %c0_1 = arith.constant 0 : index
    %c0_2 = arith.constant 0 : index
    %c0_3 = arith.constant 0 : index
    %1 = vector.load %arg1[%c0_1, %c0_2, %c0_3] : memref<1x16x64xf32, #tpu.memory_space<vmem>>, vector<1x16x64xf32>
    %2 = vector.shape_cast %1 : vector<1x16x64xf32> to vector<16x64xf32>
    %c0_4 = arith.constant 0 : index
    %c0_5 = arith.constant 0 : index
    %3 = vector.load %arg3[%c0_4, %c0_5] : memref<64x96xf32, #tpu.memory_space<vmem>>, vector<64x96xf32>
    %cst = arith.constant dense<0.000000e+00> : vector<16x96xf32>
    %4 = tpu.matmul %2, %3, %cst {dimension_numbers = #tpu.dot_dimension_numbers<[1], [0], [0], [1], [0, 0, 1, 1], [], []>} : vector<16x64xf32>, vector<64x96xf32>, vector<16x96xf32> -> vector<16x96xf32>
    %c0_6 = arith.constant 0 : index
    %c0_7 = arith.constant 0 : index
    %c0_8 = arith.constant 0 : index
    %5 = vector.load %arg2[%c0_6, %c0_7, %c0_8] : memref<1x16x96xf32, #tpu.memory_space<vmem>>, vector<1x16x96xf32>
    %6 = vector.shape_cast %5 : vector<1x16x96xf32> to vector<16x96xf32>
    %7 = arith.addf %4, %6 : vector<16x96xf32>
    %c0_9 = arith.constant 0 : index
    %c0_10 = arith.constant 0 : index
    %8 = vector.load %arg4[%c0_9, %c0_10] : memref<2x96xf32, #tpu.memory_space<vmem>>, vector<1x96xf32>
    %9 = vector.shape_cast %8 : vector<1x96xf32> to vector<96xf32>
    %c0_11 = arith.constant 0 : index
    %c0_12 = arith.constant 0 : index
    %10 = vector.load %arg5[%c0_11, %c0_12] : memref<2x96xf32, #tpu.memory_space<vmem>>, vector<1x96xf32>
    %11 = vector.shape_cast %10 : vector<1x96xf32> to vector<96xf32>
    %cst_13 = arith.constant dense<0.000000e+00> : vector<16xf32>
    %12 = vector.multi_reduction <add>, %7, %cst_13 [1] : vector<16x96xf32> to vector<16xf32>
    %13 = vector.shape_cast %12 : vector<16xf32> to vector<16x1xf32>
    %cst_14 = arith.constant 9.600000e+01 : f32
    %14 = vector.broadcast %cst_14 : f32 to vector<16x1xf32>
    %15 = arith.divf %13, %14 : vector<16x1xf32>
    %16 = vector.broadcast %15 : vector<16x1xf32> to vector<16x96xf32>
    %17 = arith.subf %7, %16 : vector<16x96xf32>
    %18 = arith.mulf %17, %17 : vector<16x96xf32>
    %cst_15 = arith.constant dense<0.000000e+00> : vector<16xf32>
    %19 = vector.multi_reduction <add>, %18, %cst_15 [1] : vector<16x96xf32> to vector<16xf32>
    %20 = vector.shape_cast %19 : vector<16xf32> to vector<16x1xf32>
    %cst_16 = arith.constant 9.600000e+01 : f32
    %21 = vector.broadcast %cst_16 : f32 to vector<16x1xf32>
    %22 = arith.divf %20, %21 : vector<16x1xf32>
    %23 = vector.broadcast %15 : vector<16x1xf32> to vector<16x96xf32>
    %24 = arith.subf %7, %23 : vector<16x96xf32>
    %cst_17 = arith.constant 9.99999974E-6 : f32
    %25 = vector.broadcast %cst_17 : f32 to vector<16x1xf32>
    %26 = arith.addf %22, %25 : vector<16x1xf32>
    %27 = math.rsqrt %26 : vector<16x1xf32>
    %28 = vector.broadcast %27 : vector<16x1xf32> to vector<16x96xf32>
    %29 = arith.mulf %24, %28 : vector<16x96xf32>
    %30 = vector.shape_cast %9 : vector<96xf32> to vector<1x96xf32>
    %31 = vector.broadcast %30 : vector<1x96xf32> to vector<16x96xf32>
    %32 = arith.mulf %29, %31 : vector<16x96xf32>
    %33 = vector.shape_cast %11 : vector<96xf32> to vector<1x96xf32>
    %34 = vector.broadcast %33 : vector<1x96xf32> to vector<16x96xf32>
    %35 = arith.addf %32, %34 : vector<16x96xf32>
    %c0_18 = arith.constant 0 : index
    %c0_19 = arith.constant 0 : index
    %c0_20 = arith.constant 0 : index
    %36 = vector.load %arg7[%c0_18, %c0_19, %c0_20] : memref<2x96x96xf32, #tpu.memory_space<vmem>>, vector<1x96x96xf32>
    %37 = vector.shape_cast %36 : vector<1x96x96xf32> to vector<96x96xf32>
    %cst_21 = arith.constant dense<0.000000e+00> : vector<16x96xf32>
    %38 = tpu.matmul %35, %37, %cst_21 {dimension_numbers = #tpu.dot_dimension_numbers<[1], [0], [0], [1], [0, 0, 1, 1], [], []>} : vector<16x96xf32>, vector<96x96xf32>, vector<16x96xf32> -> vector<16x96xf32>
    %c0_22 = arith.constant 0 : index
    %c0_23 = arith.constant 0 : index
    %c0_24 = arith.constant 0 : index
    %39 = vector.load %arg6[%c0_22, %c0_23, %c0_24] : memref<8x96x96xf32, #tpu.memory_space<vmem>>, vector<1x96x96xf32>
    %40 = vector.shape_cast %39 : vector<1x96x96xf32> to vector<96x96xf32>
    %cst_25 = arith.constant dense<0.000000e+00> : vector<16x96xf32>
    %41 = tpu.matmul %35, %40, %cst_25 {dimension_numbers = #tpu.dot_dimension_numbers<[1], [0], [0], [1], [0, 0, 1, 1], [], []>} : vector<16x96xf32>, vector<96x96xf32>, vector<16x96xf32> -> vector<16x96xf32>
    %cst_26 = arith.constant dense<0.000000e+00> : vector<16x16xf32>
    %42 = tpu.matmul %41, %35, %cst_26 {dimension_numbers = #tpu.dot_dimension_numbers<[1], [1], [0], [0], [0, 0, 1, 0], [], []>} : vector<16x96xf32>, vector<16x96xf32>, vector<16x16xf32> -> vector<16x16xf32>
    %c1 = arith.constant 1 : index
    %c0_27 = arith.constant 0 : index
    %c0_28 = arith.constant 0 : index
    %43 = vector.load %arg6[%c1, %c0_27, %c0_28] : memref<8x96x96xf32, #tpu.memory_space<vmem>>, vector<1x96x96xf32>
    %44 = vector.shape_cast %43 : vector<1x96x96xf32> to vector<96x96xf32>
    %cst_29 = arith.constant dense<0.000000e+00> : vector<16x96xf32>
    %45 = tpu.matmul %35, %44, %cst_29 {dimension_numbers = #tpu.dot_dimension_numbers<[1], [0], [0], [1], [0, 0, 1, 1], [], []>} : vector<16x96xf32>, vector<96x96xf32>, vector<16x96xf32> -> vector<16x96xf32>
    %cst_30 = arith.constant dense<0.000000e+00> : vector<16x16xf32>
    %46 = tpu.matmul %45, %35, %cst_30 {dimension_numbers = #tpu.dot_dimension_numbers<[1], [1], [0], [0], [0, 0, 1, 0], [], []>} : vector<16x96xf32>, vector<16x96xf32>, vector<16x16xf32> -> vector<16x16xf32>
    %c2 = arith.constant 2 : index
    %c0_31 = arith.constant 0 : index
    %c0_32 = arith.constant 0 : index
    %47 = vector.load %arg6[%c2, %c0_31, %c0_32] : memref<8x96x96xf32, #tpu.memory_space<vmem>>, vector<1x96x96xf32>
    %48 = vector.shape_cast %47 : vector<1x96x96xf32> to vector<96x96xf32>
    %cst_33 = arith.constant dense<0.000000e+00> : vector<16x96xf32>
    %49 = tpu.matmul %35, %48, %cst_33 {dimension_numbers = #tpu.dot_dimension_numbers<[1], [0], [0], [1], [0, 0, 1, 1], [], []>} : vector<16x96xf32>, vector<96x96xf32>, vector<16x96xf32> -> vector<16x96xf32>
    %cst_34 = arith.constant dense<0.000000e+00> : vector<16x16xf32>
    %50 = tpu.matmul %49, %35, %cst_34 {dimension_numbers = #tpu.dot_dimension_numbers<[1], [1], [0], [0], [0, 0, 1, 0], [], []>} : vector<16x96xf32>, vector<16x96xf32>, vector<16x16xf32> -> vector<16x16xf32>
    %c3 = arith.constant 3 : index
    %c0_35 = arith.constant 0 : index
    %c0_36 = arith.constant 0 : index
    %51 = vector.load %arg6[%c3, %c0_35, %c0_36] : memref<8x96x96xf32, #tpu.memory_space<vmem>>, vector<1x96x96xf32>
    %52 = vector.shape_cast %51 : vector<1x96x96xf32> to vector<96x96xf32>
    %cst_37 = arith.constant dense<0.000000e+00> : vector<16x96xf32>
    %53 = tpu.matmul %35, %52, %cst_37 {dimension_numbers = #tpu.dot_dimension_numbers<[1], [0], [0], [1], [0, 0, 1, 1], [], []>} : vector<16x96xf32>, vector<96x96xf32>, vector<16x96xf32> -> vector<16x96xf32>
    %cst_38 = arith.constant dense<0.000000e+00> : vector<16x16xf32>
    %54 = tpu.matmul %53, %35, %cst_38 {dimension_numbers = #tpu.dot_dimension_numbers<[1], [1], [0], [0], [0, 0, 1, 0], [], []>} : vector<16x96xf32>, vector<16x96xf32>, vector<16x16xf32> -> vector<16x16xf32>
    %55 = tpu.concatenate %42, %46, %50, %54 in 0 : vector<16x16xf32>, vector<16x16xf32>, vector<16x16xf32>, vector<16x16xf32> -> vector<64x16xf32>
    %56 = arith.addf %55, %0 : vector<64x16xf32>
    %cst_39 = arith.constant dense<0xFF800000> : vector<64xf32>
    %57 = vector.multi_reduction <maximumf>, %56, %cst_39 [1] : vector<64x16xf32> to vector<64xf32>
    %58 = vector.shape_cast %57 : vector<64xf32> to vector<64x1xf32>
    %59 = vector.broadcast %58 : vector<64x1xf32> to vector<64x16xf32>
    %60 = arith.subf %56, %59 : vector<64x16xf32>
    %61 = math.exp %60 : vector<64x16xf32>
    %cst_40 = arith.constant dense<0.000000e+00> : vector<64xf32>
    %62 = vector.multi_reduction <add>, %61, %cst_40 [1] : vector<64x16xf32> to vector<64xf32>
    %63 = vector.shape_cast %62 : vector<64xf32> to vector<64x1xf32>
    %64 = tpu.reciprocal %63 {approx = true} : vector<64x1xf32> -> vector<64x1xf32>
    %65 = vector.broadcast %64 : vector<64x1xf32> to vector<64x16xf32>
    %66 = arith.mulf %61, %65 : vector<64x16xf32>
    %cst_41 = arith.constant dense<0.000000e+00> : vector<64x96xf32>
    %67 = tpu.matmul %66, %38, %cst_41 {dimension_numbers = #tpu.dot_dimension_numbers<[1], [0], [0], [1], [0, 0, 1, 1], [], []>} : vector<64x16xf32>, vector<16x96xf32>, vector<64x96xf32> -> vector<64x96xf32>
    %cst_42 = arith.constant 0.000000e+00 : f32
    %68 = vector.broadcast %cst_42 : f32 to vector<16x96xf32>
    %69 = vector.extract_strided_slice %67 {offsets = [0, 0], sizes = [16, 96], strides = [1, 1]} : vector<64x96xf32> to vector<16x96xf32>
    %c0_43 = arith.constant 0 : index
    %c0_44 = arith.constant 0 : index
    %c0_45 = arith.constant 0 : index
    %70 = vector.load %arg8[%c0_43, %c0_44, %c0_45] : memref<8x96x96xf32, #tpu.memory_space<vmem>>, vector<1x96x96xf32>
    %71 = vector.shape_cast %70 : vector<1x96x96xf32> to vector<96x96xf32>
    %cst_46 = arith.constant dense<0.000000e+00> : vector<16x96xf32>
    %72 = tpu.matmul %69, %71, %cst_46 {dimension_numbers = #tpu.dot_dimension_numbers<[1], [0], [0], [1], [0, 0, 1, 1], [], []>} : vector<16x96xf32>, vector<96x96xf32>, vector<16x96xf32> -> vector<16x96xf32>
    %73 = arith.addf %68, %72 : vector<16x96xf32>
    %74 = vector.extract_strided_slice %67 {offsets = [16, 0], sizes = [16, 96], strides = [1, 1]} : vector<64x96xf32> to vector<16x96xf32>
    %c1_47 = arith.constant 1 : index
    %c0_48 = arith.constant 0 : index
    %c0_49 = arith.constant 0 : index
    %75 = vector.load %arg8[%c1_47, %c0_48, %c0_49] : memref<8x96x96xf32, #tpu.memory_space<vmem>>, vector<1x96x96xf32>
    %76 = vector.shape_cast %75 : vector<1x96x96xf32> to vector<96x96xf32>
    %cst_50 = arith.constant dense<0.000000e+00> : vector<16x96xf32>
    %77 = tpu.matmul %74, %76, %cst_50 {dimension_numbers = #tpu.dot_dimension_numbers<[1], [0], [0], [1], [0, 0, 1, 1], [], []>} : vector<16x96xf32>, vector<96x96xf32>, vector<16x96xf32> -> vector<16x96xf32>
    %78 = arith.addf %73, %77 : vector<16x96xf32>
    %79 = vector.extract_strided_slice %67 {offsets = [32, 0], sizes = [16, 96], strides = [1, 1]} : vector<64x96xf32> to vector<16x96xf32>
    %c2_51 = arith.constant 2 : index
    %c0_52 = arith.constant 0 : index
    %c0_53 = arith.constant 0 : index
    %80 = vector.load %arg8[%c2_51, %c0_52, %c0_53] : memref<8x96x96xf32, #tpu.memory_space<vmem>>, vector<1x96x96xf32>
    %81 = vector.shape_cast %80 : vector<1x96x96xf32> to vector<96x96xf32>
    %cst_54 = arith.constant dense<0.000000e+00> : vector<16x96xf32>
    %82 = tpu.matmul %79, %81, %cst_54 {dimension_numbers = #tpu.dot_dimension_numbers<[1], [0], [0], [1], [0, 0, 1, 1], [], []>} : vector<16x96xf32>, vector<96x96xf32>, vector<16x96xf32> -> vector<16x96xf32>
    %83 = arith.addf %78, %82 : vector<16x96xf32>
    %84 = vector.extract_strided_slice %67 {offsets = [48, 0], sizes = [16, 96], strides = [1, 1]} : vector<64x96xf32> to vector<16x96xf32>
    %c3_55 = arith.constant 3 : index
    %c0_56 = arith.constant 0 : index
    %c0_57 = arith.constant 0 : index
    %85 = vector.load %arg8[%c3_55, %c0_56, %c0_57] : memref<8x96x96xf32, #tpu.memory_space<vmem>>, vector<1x96x96xf32>
    %86 = vector.shape_cast %85 : vector<1x96x96xf32> to vector<96x96xf32>
    %cst_58 = arith.constant dense<0.000000e+00> : vector<16x96xf32>
    %87 = tpu.matmul %84, %86, %cst_58 {dimension_numbers = #tpu.dot_dimension_numbers<[1], [0], [0], [1], [0, 0, 1, 1], [], []>} : vector<16x96xf32>, vector<96x96xf32>, vector<16x96xf32> -> vector<16x96xf32>
    %88 = arith.addf %83, %87 : vector<16x96xf32>
    %89 = arith.addf %7, %88 : vector<16x96xf32>
    %c0_59 = arith.constant 0 : index
    %c0_60 = arith.constant 0 : index
    %90 = vector.load %arg9[%c0_59, %c0_60] : memref<2x96xf32, #tpu.memory_space<vmem>>, vector<1x96xf32>
    %91 = vector.shape_cast %90 : vector<1x96xf32> to vector<96xf32>
    %92 = vector.shape_cast %91 : vector<96xf32> to vector<1x96xf32>
    %93 = vector.broadcast %92 : vector<1x96xf32> to vector<16x96xf32>
    %94 = arith.addf %89, %93 : vector<16x96xf32>
    %c0_61 = arith.constant 0 : index
    %c0_62 = arith.constant 0 : index
    %95 = vector.load %arg10[%c0_61, %c0_62] : memref<2x96xf32, #tpu.memory_space<vmem>>, vector<1x96xf32>
    %96 = vector.shape_cast %95 : vector<1x96xf32> to vector<96xf32>
    %c0_63 = arith.constant 0 : index
    %c0_64 = arith.constant 0 : index
    %97 = vector.load %arg11[%c0_63, %c0_64] : memref<2x96xf32, #tpu.memory_space<vmem>>, vector<1x96xf32>
    %98 = vector.shape_cast %97 : vector<1x96xf32> to vector<96xf32>
    %cst_65 = arith.constant dense<0.000000e+00> : vector<16xf32>
    %99 = vector.multi_reduction <add>, %94, %cst_65 [1] : vector<16x96xf32> to vector<16xf32>
    %100 = vector.shape_cast %99 : vector<16xf32> to vector<16x1xf32>
    %cst_66 = arith.constant 9.600000e+01 : f32
    %101 = vector.broadcast %cst_66 : f32 to vector<16x1xf32>
    %102 = arith.divf %100, %101 : vector<16x1xf32>
    %103 = vector.broadcast %102 : vector<16x1xf32> to vector<16x96xf32>
    %104 = arith.subf %94, %103 : vector<16x96xf32>
    %105 = arith.mulf %104, %104 : vector<16x96xf32>
    %cst_67 = arith.constant dense<0.000000e+00> : vector<16xf32>
    %106 = vector.multi_reduction <add>, %105, %cst_67 [1] : vector<16x96xf32> to vector<16xf32>
    %107 = vector.shape_cast %106 : vector<16xf32> to vector<16x1xf32>
    %cst_68 = arith.constant 9.600000e+01 : f32
    %108 = vector.broadcast %cst_68 : f32 to vector<16x1xf32>
    %109 = arith.divf %107, %108 : vector<16x1xf32>
    %110 = vector.broadcast %102 : vector<16x1xf32> to vector<16x96xf32>
    %111 = arith.subf %94, %110 : vector<16x96xf32>
    %cst_69 = arith.constant 9.99999974E-6 : f32
    %112 = vector.broadcast %cst_69 : f32 to vector<16x1xf32>
    %113 = arith.addf %109, %112 : vector<16x1xf32>
    %114 = math.rsqrt %113 : vector<16x1xf32>
    %115 = vector.broadcast %114 : vector<16x1xf32> to vector<16x96xf32>
    %116 = arith.mulf %111, %115 : vector<16x96xf32>
    %117 = vector.shape_cast %96 : vector<96xf32> to vector<1x96xf32>
    %118 = vector.broadcast %117 : vector<1x96xf32> to vector<16x96xf32>
    %119 = arith.mulf %116, %118 : vector<16x96xf32>
    %120 = vector.shape_cast %98 : vector<96xf32> to vector<1x96xf32>
    %121 = vector.broadcast %120 : vector<1x96xf32> to vector<16x96xf32>
    %122 = arith.addf %119, %121 : vector<16x96xf32>
    %c0_70 = arith.constant 0 : index
    %c0_71 = arith.constant 0 : index
    %c0_72 = arith.constant 0 : index
    %123 = vector.load %arg12[%c0_70, %c0_71, %c0_72] : memref<2x96x128xf32, #tpu.memory_space<vmem>>, vector<1x96x128xf32>
    %124 = vector.shape_cast %123 : vector<1x96x128xf32> to vector<96x128xf32>
    %cst_73 = arith.constant dense<0.000000e+00> : vector<16x128xf32>
    %125 = tpu.matmul %122, %124, %cst_73 {dimension_numbers = #tpu.dot_dimension_numbers<[1], [0], [0], [1], [0, 0, 1, 1], [], []>} : vector<16x96xf32>, vector<96x128xf32>, vector<16x128xf32> -> vector<16x128xf32>
    %c0_74 = arith.constant 0 : index
    %c0_75 = arith.constant 0 : index
    %126 = vector.load %arg13[%c0_74, %c0_75] : memref<2x128xf32, #tpu.memory_space<vmem>>, vector<1x128xf32>
    %127 = vector.shape_cast %126 : vector<1x128xf32> to vector<128xf32>
    %128 = vector.shape_cast %127 : vector<128xf32> to vector<1x128xf32>
    %129 = vector.broadcast %128 : vector<1x128xf32> to vector<16x128xf32>
    %130 = arith.addf %125, %129 : vector<16x128xf32>
    %131 = arith.mulf %130, %130 : vector<16x128xf32>
    %132 = arith.mulf %130, %131 : vector<16x128xf32>
    %cst_76 = arith.constant 4.471500e-02 : f32
    %133 = vector.broadcast %cst_76 : f32 to vector<16x128xf32>
    %134 = arith.mulf %133, %132 : vector<16x128xf32>
    %135 = arith.addf %130, %134 : vector<16x128xf32>
    %cst_77 = arith.constant 0.797884583 : f32
    %136 = vector.broadcast %cst_77 : f32 to vector<16x128xf32>
    %137 = arith.mulf %136, %135 : vector<16x128xf32>
    %138 = math.tanh %137 : vector<16x128xf32>
    %cst_78 = arith.constant 1.000000e+00 : f32
    %139 = vector.broadcast %cst_78 : f32 to vector<16x128xf32>
    %140 = arith.addf %139, %138 : vector<16x128xf32>
    %cst_79 = arith.constant 5.000000e-01 : f32
    %141 = vector.broadcast %cst_79 : f32 to vector<16x128xf32>
    %142 = arith.mulf %141, %140 : vector<16x128xf32>
    %143 = arith.mulf %130, %142 : vector<16x128xf32>
    %c0_80 = arith.constant 0 : index
    %c0_81 = arith.constant 0 : index
    %c0_82 = arith.constant 0 : index
    %144 = vector.load %arg14[%c0_80, %c0_81, %c0_82] : memref<2x128x96xf32, #tpu.memory_space<vmem>>, vector<1x128x96xf32>
    %145 = vector.shape_cast %144 : vector<1x128x96xf32> to vector<128x96xf32>
    %cst_83 = arith.constant dense<0.000000e+00> : vector<16x96xf32>
    %146 = tpu.matmul %143, %145, %cst_83 {dimension_numbers = #tpu.dot_dimension_numbers<[1], [0], [0], [1], [0, 0, 1, 1], [], []>} : vector<16x128xf32>, vector<128x96xf32>, vector<16x96xf32> -> vector<16x96xf32>
    %c0_84 = arith.constant 0 : index
    %c0_85 = arith.constant 0 : index
    %147 = vector.load %arg15[%c0_84, %c0_85] : memref<2x96xf32, #tpu.memory_space<vmem>>, vector<1x96xf32>
    %148 = vector.shape_cast %147 : vector<1x96xf32> to vector<96xf32>
    %149 = vector.shape_cast %148 : vector<96xf32> to vector<1x96xf32>
    %150 = vector.broadcast %149 : vector<1x96xf32> to vector<16x96xf32>
    %151 = arith.addf %146, %150 : vector<16x96xf32>
    %152 = arith.addf %94, %151 : vector<16x96xf32>
    %c1_86 = arith.constant 1 : index
    %c0_87 = arith.constant 0 : index
    %153 = vector.load %arg4[%c1_86, %c0_87] : memref<2x96xf32, #tpu.memory_space<vmem>>, vector<1x96xf32>
    %154 = vector.shape_cast %153 : vector<1x96xf32> to vector<96xf32>
    %c1_88 = arith.constant 1 : index
    %c0_89 = arith.constant 0 : index
    %155 = vector.load %arg5[%c1_88, %c0_89] : memref<2x96xf32, #tpu.memory_space<vmem>>, vector<1x96xf32>
    %156 = vector.shape_cast %155 : vector<1x96xf32> to vector<96xf32>
    %cst_90 = arith.constant dense<0.000000e+00> : vector<16xf32>
    %157 = vector.multi_reduction <add>, %152, %cst_90 [1] : vector<16x96xf32> to vector<16xf32>
    %158 = vector.shape_cast %157 : vector<16xf32> to vector<16x1xf32>
    %cst_91 = arith.constant 9.600000e+01 : f32
    %159 = vector.broadcast %cst_91 : f32 to vector<16x1xf32>
    %160 = arith.divf %158, %159 : vector<16x1xf32>
    %161 = vector.broadcast %160 : vector<16x1xf32> to vector<16x96xf32>
    %162 = arith.subf %152, %161 : vector<16x96xf32>
    %163 = arith.mulf %162, %162 : vector<16x96xf32>
    %cst_92 = arith.constant dense<0.000000e+00> : vector<16xf32>
    %164 = vector.multi_reduction <add>, %163, %cst_92 [1] : vector<16x96xf32> to vector<16xf32>
    %165 = vector.shape_cast %164 : vector<16xf32> to vector<16x1xf32>
    %cst_93 = arith.constant 9.600000e+01 : f32
    %166 = vector.broadcast %cst_93 : f32 to vector<16x1xf32>
    %167 = arith.divf %165, %166 : vector<16x1xf32>
    %168 = vector.broadcast %160 : vector<16x1xf32> to vector<16x96xf32>
    %169 = arith.subf %152, %168 : vector<16x96xf32>
    %cst_94 = arith.constant 9.99999974E-6 : f32
    %170 = vector.broadcast %cst_94 : f32 to vector<16x1xf32>
    %171 = arith.addf %167, %170 : vector<16x1xf32>
    %172 = math.rsqrt %171 : vector<16x1xf32>
    %173 = vector.broadcast %172 : vector<16x1xf32> to vector<16x96xf32>
    %174 = arith.mulf %169, %173 : vector<16x96xf32>
    %175 = vector.shape_cast %154 : vector<96xf32> to vector<1x96xf32>
    %176 = vector.broadcast %175 : vector<1x96xf32> to vector<16x96xf32>
    %177 = arith.mulf %174, %176 : vector<16x96xf32>
    %178 = vector.shape_cast %156 : vector<96xf32> to vector<1x96xf32>
    %179 = vector.broadcast %178 : vector<1x96xf32> to vector<16x96xf32>
    %180 = arith.addf %177, %179 : vector<16x96xf32>
    %c1_95 = arith.constant 1 : index
    %c0_96 = arith.constant 0 : index
    %c0_97 = arith.constant 0 : index
    %181 = vector.load %arg7[%c1_95, %c0_96, %c0_97] : memref<2x96x96xf32, #tpu.memory_space<vmem>>, vector<1x96x96xf32>
    %182 = vector.shape_cast %181 : vector<1x96x96xf32> to vector<96x96xf32>
    %cst_98 = arith.constant dense<0.000000e+00> : vector<16x96xf32>
    %183 = tpu.matmul %180, %182, %cst_98 {dimension_numbers = #tpu.dot_dimension_numbers<[1], [0], [0], [1], [0, 0, 1, 1], [], []>} : vector<16x96xf32>, vector<96x96xf32>, vector<16x96xf32> -> vector<16x96xf32>
    %c4 = arith.constant 4 : index
    %c0_99 = arith.constant 0 : index
    %c0_100 = arith.constant 0 : index
    %184 = vector.load %arg6[%c4, %c0_99, %c0_100] : memref<8x96x96xf32, #tpu.memory_space<vmem>>, vector<1x96x96xf32>
    %185 = vector.shape_cast %184 : vector<1x96x96xf32> to vector<96x96xf32>
    %cst_101 = arith.constant dense<0.000000e+00> : vector<16x96xf32>
    %186 = tpu.matmul %180, %185, %cst_101 {dimension_numbers = #tpu.dot_dimension_numbers<[1], [0], [0], [1], [0, 0, 1, 1], [], []>} : vector<16x96xf32>, vector<96x96xf32>, vector<16x96xf32> -> vector<16x96xf32>
    %cst_102 = arith.constant dense<0.000000e+00> : vector<16x16xf32>
    %187 = tpu.matmul %186, %180, %cst_102 {dimension_numbers = #tpu.dot_dimension_numbers<[1], [1], [0], [0], [0, 0, 1, 0], [], []>} : vector<16x96xf32>, vector<16x96xf32>, vector<16x16xf32> -> vector<16x16xf32>
    %c5 = arith.constant 5 : index
    %c0_103 = arith.constant 0 : index
    %c0_104 = arith.constant 0 : index
    %188 = vector.load %arg6[%c5, %c0_103, %c0_104] : memref<8x96x96xf32, #tpu.memory_space<vmem>>, vector<1x96x96xf32>
    %189 = vector.shape_cast %188 : vector<1x96x96xf32> to vector<96x96xf32>
    %cst_105 = arith.constant dense<0.000000e+00> : vector<16x96xf32>
    %190 = tpu.matmul %180, %189, %cst_105 {dimension_numbers = #tpu.dot_dimension_numbers<[1], [0], [0], [1], [0, 0, 1, 1], [], []>} : vector<16x96xf32>, vector<96x96xf32>, vector<16x96xf32> -> vector<16x96xf32>
    %cst_106 = arith.constant dense<0.000000e+00> : vector<16x16xf32>
    %191 = tpu.matmul %190, %180, %cst_106 {dimension_numbers = #tpu.dot_dimension_numbers<[1], [1], [0], [0], [0, 0, 1, 0], [], []>} : vector<16x96xf32>, vector<16x96xf32>, vector<16x16xf32> -> vector<16x16xf32>
    %c6 = arith.constant 6 : index
    %c0_107 = arith.constant 0 : index
    %c0_108 = arith.constant 0 : index
    %192 = vector.load %arg6[%c6, %c0_107, %c0_108] : memref<8x96x96xf32, #tpu.memory_space<vmem>>, vector<1x96x96xf32>
    %193 = vector.shape_cast %192 : vector<1x96x96xf32> to vector<96x96xf32>
    %cst_109 = arith.constant dense<0.000000e+00> : vector<16x96xf32>
    %194 = tpu.matmul %180, %193, %cst_109 {dimension_numbers = #tpu.dot_dimension_numbers<[1], [0], [0], [1], [0, 0, 1, 1], [], []>} : vector<16x96xf32>, vector<96x96xf32>, vector<16x96xf32> -> vector<16x96xf32>
    %cst_110 = arith.constant dense<0.000000e+00> : vector<16x16xf32>
    %195 = tpu.matmul %194, %180, %cst_110 {dimension_numbers = #tpu.dot_dimension_numbers<[1], [1], [0], [0], [0, 0, 1, 0], [], []>} : vector<16x96xf32>, vector<16x96xf32>, vector<16x16xf32> -> vector<16x16xf32>
    %c7 = arith.constant 7 : index
    %c0_111 = arith.constant 0 : index
    %c0_112 = arith.constant 0 : index
    %196 = vector.load %arg6[%c7, %c0_111, %c0_112] : memref<8x96x96xf32, #tpu.memory_space<vmem>>, vector<1x96x96xf32>
    %197 = vector.shape_cast %196 : vector<1x96x96xf32> to vector<96x96xf32>
    %cst_113 = arith.constant dense<0.000000e+00> : vector<16x96xf32>
    %198 = tpu.matmul %180, %197, %cst_113 {dimension_numbers = #tpu.dot_dimension_numbers<[1], [0], [0], [1], [0, 0, 1, 1], [], []>} : vector<16x96xf32>, vector<96x96xf32>, vector<16x96xf32> -> vector<16x96xf32>
    %cst_114 = arith.constant dense<0.000000e+00> : vector<16x16xf32>
    %199 = tpu.matmul %198, %180, %cst_114 {dimension_numbers = #tpu.dot_dimension_numbers<[1], [1], [0], [0], [0, 0, 1, 0], [], []>} : vector<16x96xf32>, vector<16x96xf32>, vector<16x16xf32> -> vector<16x16xf32>
    %200 = tpu.concatenate %187, %191, %195, %199 in 0 : vector<16x16xf32>, vector<16x16xf32>, vector<16x16xf32>, vector<16x16xf32> -> vector<64x16xf32>
    %201 = arith.addf %200, %0 : vector<64x16xf32>
    %cst_115 = arith.constant dense<0xFF800000> : vector<64xf32>
    %202 = vector.multi_reduction <maximumf>, %201, %cst_115 [1] : vector<64x16xf32> to vector<64xf32>
    %203 = vector.shape_cast %202 : vector<64xf32> to vector<64x1xf32>
    %204 = vector.broadcast %203 : vector<64x1xf32> to vector<64x16xf32>
    %205 = arith.subf %201, %204 : vector<64x16xf32>
    %206 = math.exp %205 : vector<64x16xf32>
    %cst_116 = arith.constant dense<0.000000e+00> : vector<64xf32>
    %207 = vector.multi_reduction <add>, %206, %cst_116 [1] : vector<64x16xf32> to vector<64xf32>
    %208 = vector.shape_cast %207 : vector<64xf32> to vector<64x1xf32>
    %209 = tpu.reciprocal %208 {approx = true} : vector<64x1xf32> -> vector<64x1xf32>
    %210 = vector.broadcast %209 : vector<64x1xf32> to vector<64x16xf32>
    %211 = arith.mulf %206, %210 : vector<64x16xf32>
    %cst_117 = arith.constant dense<0.000000e+00> : vector<64x96xf32>
    %212 = tpu.matmul %211, %183, %cst_117 {dimension_numbers = #tpu.dot_dimension_numbers<[1], [0], [0], [1], [0, 0, 1, 1], [], []>} : vector<64x16xf32>, vector<16x96xf32>, vector<64x96xf32> -> vector<64x96xf32>
    %cst_118 = arith.constant 0.000000e+00 : f32
    %213 = vector.broadcast %cst_118 : f32 to vector<16x96xf32>
    %214 = vector.extract_strided_slice %212 {offsets = [0, 0], sizes = [16, 96], strides = [1, 1]} : vector<64x96xf32> to vector<16x96xf32>
    %c4_119 = arith.constant 4 : index
    %c0_120 = arith.constant 0 : index
    %c0_121 = arith.constant 0 : index
    %215 = vector.load %arg8[%c4_119, %c0_120, %c0_121] : memref<8x96x96xf32, #tpu.memory_space<vmem>>, vector<1x96x96xf32>
    %216 = vector.shape_cast %215 : vector<1x96x96xf32> to vector<96x96xf32>
    %cst_122 = arith.constant dense<0.000000e+00> : vector<16x96xf32>
    %217 = tpu.matmul %214, %216, %cst_122 {dimension_numbers = #tpu.dot_dimension_numbers<[1], [0], [0], [1], [0, 0, 1, 1], [], []>} : vector<16x96xf32>, vector<96x96xf32>, vector<16x96xf32> -> vector<16x96xf32>
    %218 = arith.addf %213, %217 : vector<16x96xf32>
    %219 = vector.extract_strided_slice %212 {offsets = [16, 0], sizes = [16, 96], strides = [1, 1]} : vector<64x96xf32> to vector<16x96xf32>
    %c5_123 = arith.constant 5 : index
    %c0_124 = arith.constant 0 : index
    %c0_125 = arith.constant 0 : index
    %220 = vector.load %arg8[%c5_123, %c0_124, %c0_125] : memref<8x96x96xf32, #tpu.memory_space<vmem>>, vector<1x96x96xf32>
    %221 = vector.shape_cast %220 : vector<1x96x96xf32> to vector<96x96xf32>
    %cst_126 = arith.constant dense<0.000000e+00> : vector<16x96xf32>
    %222 = tpu.matmul %219, %221, %cst_126 {dimension_numbers = #tpu.dot_dimension_numbers<[1], [0], [0], [1], [0, 0, 1, 1], [], []>} : vector<16x96xf32>, vector<96x96xf32>, vector<16x96xf32> -> vector<16x96xf32>
    %223 = arith.addf %218, %222 : vector<16x96xf32>
    %224 = vector.extract_strided_slice %212 {offsets = [32, 0], sizes = [16, 96], strides = [1, 1]} : vector<64x96xf32> to vector<16x96xf32>
    %c6_127 = arith.constant 6 : index
    %c0_128 = arith.constant 0 : index
    %c0_129 = arith.constant 0 : index
    %225 = vector.load %arg8[%c6_127, %c0_128, %c0_129] : memref<8x96x96xf32, #tpu.memory_space<vmem>>, vector<1x96x96xf32>
    %226 = vector.shape_cast %225 : vector<1x96x96xf32> to vector<96x96xf32>
    %cst_130 = arith.constant dense<0.000000e+00> : vector<16x96xf32>
    %227 = tpu.matmul %224, %226, %cst_130 {dimension_numbers = #tpu.dot_dimension_numbers<[1], [0], [0], [1], [0, 0, 1, 1], [], []>} : vector<16x96xf32>, vector<96x96xf32>, vector<16x96xf32> -> vector<16x96xf32>
    %228 = arith.addf %223, %227 : vector<16x96xf32>
    %229 = vector.extract_strided_slice %212 {offsets = [48, 0], sizes = [16, 96], strides = [1, 1]} : vector<64x96xf32> to vector<16x96xf32>
    %c7_131 = arith.constant 7 : index
    %c0_132 = arith.constant 0 : index
    %c0_133 = arith.constant 0 : index
    %230 = vector.load %arg8[%c7_131, %c0_132, %c0_133] : memref<8x96x96xf32, #tpu.memory_space<vmem>>, vector<1x96x96xf32>
    %231 = vector.shape_cast %230 : vector<1x96x96xf32> to vector<96x96xf32>
    %cst_134 = arith.constant dense<0.000000e+00> : vector<16x96xf32>
    %232 = tpu.matmul %229, %231, %cst_134 {dimension_numbers = #tpu.dot_dimension_numbers<[1], [0], [0], [1], [0, 0, 1, 1], [], []>} : vector<16x96xf32>, vector<96x96xf32>, vector<16x96xf32> -> vector<16x96xf32>
    %233 = arith.addf %228, %232 : vector<16x96xf32>
    %234 = arith.addf %152, %233 : vector<16x96xf32>
    %c1_135 = arith.constant 1 : index
    %c0_136 = arith.constant 0 : index
    %235 = vector.load %arg9[%c1_135, %c0_136] : memref<2x96xf32, #tpu.memory_space<vmem>>, vector<1x96xf32>
    %236 = vector.shape_cast %235 : vector<1x96xf32> to vector<96xf32>
    %237 = vector.shape_cast %236 : vector<96xf32> to vector<1x96xf32>
    %238 = vector.broadcast %237 : vector<1x96xf32> to vector<16x96xf32>
    %239 = arith.addf %234, %238 : vector<16x96xf32>
    %c1_137 = arith.constant 1 : index
    %c0_138 = arith.constant 0 : index
    %240 = vector.load %arg10[%c1_137, %c0_138] : memref<2x96xf32, #tpu.memory_space<vmem>>, vector<1x96xf32>
    %241 = vector.shape_cast %240 : vector<1x96xf32> to vector<96xf32>
    %c1_139 = arith.constant 1 : index
    %c0_140 = arith.constant 0 : index
    %242 = vector.load %arg11[%c1_139, %c0_140] : memref<2x96xf32, #tpu.memory_space<vmem>>, vector<1x96xf32>
    %243 = vector.shape_cast %242 : vector<1x96xf32> to vector<96xf32>
    %cst_141 = arith.constant dense<0.000000e+00> : vector<16xf32>
    %244 = vector.multi_reduction <add>, %239, %cst_141 [1] : vector<16x96xf32> to vector<16xf32>
    %245 = vector.shape_cast %244 : vector<16xf32> to vector<16x1xf32>
    %cst_142 = arith.constant 9.600000e+01 : f32
    %246 = vector.broadcast %cst_142 : f32 to vector<16x1xf32>
    %247 = arith.divf %245, %246 : vector<16x1xf32>
    %248 = vector.broadcast %247 : vector<16x1xf32> to vector<16x96xf32>
    %249 = arith.subf %239, %248 : vector<16x96xf32>
    %250 = arith.mulf %249, %249 : vector<16x96xf32>
    %cst_143 = arith.constant dense<0.000000e+00> : vector<16xf32>
    %251 = vector.multi_reduction <add>, %250, %cst_143 [1] : vector<16x96xf32> to vector<16xf32>
    %252 = vector.shape_cast %251 : vector<16xf32> to vector<16x1xf32>
    %cst_144 = arith.constant 9.600000e+01 : f32
    %253 = vector.broadcast %cst_144 : f32 to vector<16x1xf32>
    %254 = arith.divf %252, %253 : vector<16x1xf32>
    %255 = vector.broadcast %247 : vector<16x1xf32> to vector<16x96xf32>
    %256 = arith.subf %239, %255 : vector<16x96xf32>
    %cst_145 = arith.constant 9.99999974E-6 : f32
    %257 = vector.broadcast %cst_145 : f32 to vector<16x1xf32>
    %258 = arith.addf %254, %257 : vector<16x1xf32>
    %259 = math.rsqrt %258 : vector<16x1xf32>
    %260 = vector.broadcast %259 : vector<16x1xf32> to vector<16x96xf32>
    %261 = arith.mulf %256, %260 : vector<16x96xf32>
    %262 = vector.shape_cast %241 : vector<96xf32> to vector<1x96xf32>
    %263 = vector.broadcast %262 : vector<1x96xf32> to vector<16x96xf32>
    %264 = arith.mulf %261, %263 : vector<16x96xf32>
    %265 = vector.shape_cast %243 : vector<96xf32> to vector<1x96xf32>
    %266 = vector.broadcast %265 : vector<1x96xf32> to vector<16x96xf32>
    %267 = arith.addf %264, %266 : vector<16x96xf32>
    %c1_146 = arith.constant 1 : index
    %c0_147 = arith.constant 0 : index
    %c0_148 = arith.constant 0 : index
    %268 = vector.load %arg12[%c1_146, %c0_147, %c0_148] : memref<2x96x128xf32, #tpu.memory_space<vmem>>, vector<1x96x128xf32>
    %269 = vector.shape_cast %268 : vector<1x96x128xf32> to vector<96x128xf32>
    %cst_149 = arith.constant dense<0.000000e+00> : vector<16x128xf32>
    %270 = tpu.matmul %267, %269, %cst_149 {dimension_numbers = #tpu.dot_dimension_numbers<[1], [0], [0], [1], [0, 0, 1, 1], [], []>} : vector<16x96xf32>, vector<96x128xf32>, vector<16x128xf32> -> vector<16x128xf32>
    %c1_150 = arith.constant 1 : index
    %c0_151 = arith.constant 0 : index
    %271 = vector.load %arg13[%c1_150, %c0_151] : memref<2x128xf32, #tpu.memory_space<vmem>>, vector<1x128xf32>
    %272 = vector.shape_cast %271 : vector<1x128xf32> to vector<128xf32>
    %273 = vector.shape_cast %272 : vector<128xf32> to vector<1x128xf32>
    %274 = vector.broadcast %273 : vector<1x128xf32> to vector<16x128xf32>
    %275 = arith.addf %270, %274 : vector<16x128xf32>
    %276 = arith.mulf %275, %275 : vector<16x128xf32>
    %277 = arith.mulf %275, %276 : vector<16x128xf32>
    %cst_152 = arith.constant 4.471500e-02 : f32
    %278 = vector.broadcast %cst_152 : f32 to vector<16x128xf32>
    %279 = arith.mulf %278, %277 : vector<16x128xf32>
    %280 = arith.addf %275, %279 : vector<16x128xf32>
    %cst_153 = arith.constant 0.797884583 : f32
    %281 = vector.broadcast %cst_153 : f32 to vector<16x128xf32>
    %282 = arith.mulf %281, %280 : vector<16x128xf32>
    %283 = math.tanh %282 : vector<16x128xf32>
    %cst_154 = arith.constant 1.000000e+00 : f32
    %284 = vector.broadcast %cst_154 : f32 to vector<16x128xf32>
    %285 = arith.addf %284, %283 : vector<16x128xf32>
    %cst_155 = arith.constant 5.000000e-01 : f32
    %286 = vector.broadcast %cst_155 : f32 to vector<16x128xf32>
    %287 = arith.mulf %286, %285 : vector<16x128xf32>
    %288 = arith.mulf %275, %287 : vector<16x128xf32>
    %c1_156 = arith.constant 1 : index
    %c0_157 = arith.constant 0 : index
    %c0_158 = arith.constant 0 : index
    %289 = vector.load %arg14[%c1_156, %c0_157, %c0_158] : memref<2x128x96xf32, #tpu.memory_space<vmem>>, vector<1x128x96xf32>
    %290 = vector.shape_cast %289 : vector<1x128x96xf32> to vector<128x96xf32>
    %cst_159 = arith.constant dense<0.000000e+00> : vector<16x96xf32>
    %291 = tpu.matmul %288, %290, %cst_159 {dimension_numbers = #tpu.dot_dimension_numbers<[1], [0], [0], [1], [0, 0, 1, 1], [], []>} : vector<16x128xf32>, vector<128x96xf32>, vector<16x96xf32> -> vector<16x96xf32>
    %c1_160 = arith.constant 1 : index
    %c0_161 = arith.constant 0 : index
    %292 = vector.load %arg15[%c1_160, %c0_161] : memref<2x96xf32, #tpu.memory_space<vmem>>, vector<1x96xf32>
    %293 = vector.shape_cast %292 : vector<1x96xf32> to vector<96xf32>
    %294 = vector.shape_cast %293 : vector<96xf32> to vector<1x96xf32>
    %295 = vector.broadcast %294 : vector<1x96xf32> to vector<16x96xf32>
    %296 = arith.addf %291, %295 : vector<16x96xf32>
    %297 = arith.addf %239, %296 : vector<16x96xf32>
    %c0_162 = arith.constant 0 : index
    %c0_163 = arith.constant 0 : index
    %298 = vector.load %arg16[%c0_162, %c0_163] : memref<1x96xf32, #tpu.memory_space<vmem>>, vector<1x96xf32>
    %299 = vector.shape_cast %298 : vector<1x96xf32> to vector<96xf32>
    %c0_164 = arith.constant 0 : index
    %c0_165 = arith.constant 0 : index
    %300 = vector.load %arg17[%c0_164, %c0_165] : memref<1x96xf32, #tpu.memory_space<vmem>>, vector<1x96xf32>
    %301 = vector.shape_cast %300 : vector<1x96xf32> to vector<96xf32>
    %cst_166 = arith.constant dense<0.000000e+00> : vector<16xf32>
    %302 = vector.multi_reduction <add>, %297, %cst_166 [1] : vector<16x96xf32> to vector<16xf32>
    %303 = vector.shape_cast %302 : vector<16xf32> to vector<16x1xf32>
    %cst_167 = arith.constant 9.600000e+01 : f32
    %304 = vector.broadcast %cst_167 : f32 to vector<16x1xf32>
    %305 = arith.divf %303, %304 : vector<16x1xf32>
    %306 = vector.broadcast %305 : vector<16x1xf32> to vector<16x96xf32>
    %307 = arith.subf %297, %306 : vector<16x96xf32>
    %308 = arith.mulf %307, %307 : vector<16x96xf32>
    %cst_168 = arith.constant dense<0.000000e+00> : vector<16xf32>
    %309 = vector.multi_reduction <add>, %308, %cst_168 [1] : vector<16x96xf32> to vector<16xf32>
    %310 = vector.shape_cast %309 : vector<16xf32> to vector<16x1xf32>
    %cst_169 = arith.constant 9.600000e+01 : f32
    %311 = vector.broadcast %cst_169 : f32 to vector<16x1xf32>
    %312 = arith.divf %310, %311 : vector<16x1xf32>
    %313 = vector.broadcast %305 : vector<16x1xf32> to vector<16x96xf32>
    %314 = arith.subf %297, %313 : vector<16x96xf32>
    %cst_170 = arith.constant 9.99999974E-6 : f32
    %315 = vector.broadcast %cst_170 : f32 to vector<16x1xf32>
    %316 = arith.addf %312, %315 : vector<16x1xf32>
    %317 = math.rsqrt %316 : vector<16x1xf32>
    %318 = vector.broadcast %317 : vector<16x1xf32> to vector<16x96xf32>
    %319 = arith.mulf %314, %318 : vector<16x96xf32>
    %320 = vector.shape_cast %299 : vector<96xf32> to vector<1x96xf32>
    %321 = vector.broadcast %320 : vector<1x96xf32> to vector<16x96xf32>
    %322 = arith.mulf %319, %321 : vector<16x96xf32>
    %323 = vector.shape_cast %301 : vector<96xf32> to vector<1x96xf32>
    %324 = vector.broadcast %323 : vector<1x96xf32> to vector<16x96xf32>
    %325 = arith.addf %322, %324 : vector<16x96xf32>
    %c0_171 = arith.constant 0 : index
    %c0_172 = arith.constant 0 : index
    %326 = vector.load %arg18[%c0_171, %c0_172] : memref<96x128xf32, #tpu.memory_space<vmem>>, vector<96x128xf32>
    %cst_173 = arith.constant dense<0.000000e+00> : vector<16x128xf32>
    %327 = tpu.matmul %325, %326, %cst_173 {dimension_numbers = #tpu.dot_dimension_numbers<[1], [0], [0], [1], [0, 0, 1, 1], [], []>} : vector<16x96xf32>, vector<96x128xf32>, vector<16x128xf32> -> vector<16x128xf32>
    %c0_174 = arith.constant 0 : index
    %c0_175 = arith.constant 0 : index
    %328 = vector.load %arg19[%c0_174, %c0_175] : memref<1x128xf32, #tpu.memory_space<vmem>>, vector<1x128xf32>
    %329 = vector.broadcast %328 : vector<1x128xf32> to vector<16x128xf32>
    %330 = arith.addf %327, %329 : vector<16x128xf32>
    %c0_176 = arith.constant 0 : index
    %c0_177 = arith.constant 0 : index
    %c0_178 = arith.constant 0 : index
    %331 = vector.load %arg24[%c0_176, %c0_177, %c0_178] : memref<1x16x128xf32, #tpu.memory_space<vmem>>, vector<1x16x128xf32>
    %332 = vector.shape_cast %331 : vector<1x16x128xf32> to vector<16x128xf32>
    %333 = vector.shape_cast %330 : vector<16x128xf32> to vector<1x16x128xf32>
    tpu.vector_store %arg24[%c0_176, %c0_177, %c0_178], %333 {strides = array<i32>} : memref<1x16x128xf32, #tpu.memory_space<vmem>>, vector<1x16x128xf32>,
    %c0_179 = arith.constant 0 : index
    %c0_180 = arith.constant 0 : index
    %c0_181 = arith.constant 0 : index
    %334 = vector.load %arg21[%c0_179, %c0_180, %c0_181] : memref<1x16x128xf32, #tpu.memory_space<vmem>>, vector<1x16x128xf32>
    %335 = vector.shape_cast %334 : vector<1x16x128xf32> to vector<16x128xf32>
    %336 = arith.subf %330, %335 : vector<16x128xf32>
    %c0_182 = arith.constant 0 : index
    %c0_183 = arith.constant 0 : index
    %c0_184 = arith.constant 0 : index
    %337 = vector.load %arg22[%c0_182, %c0_183, %c0_184] : memref<1x16x1xf32, #tpu.memory_space<vmem>>, vector<1x16x1xf32>
    %338 = vector.shape_cast %337 : vector<1x16x1xf32> to vector<16x1xf32>
    %339 = vector.broadcast %338 : vector<16x1xf32> to vector<16x128xf32>
    %340 = arith.mulf %336, %339 : vector<16x128xf32>
    %cst_185 = arith.constant 0.000000e+00 : f32
    %341 = vector.broadcast %cst_185 : f32 to vector<1x1xf32>
    %342 = arith.mulf %340, %340 : vector<16x128xf32>
    %343 = vector.shape_cast %342 : vector<16x128xf32> to vector<1x16x128xf32>
    %cst_186 = arith.constant dense<0.000000e+00> : vector<1xf32>
    %344 = vector.multi_reduction <add>, %343, %cst_186 [1, 2] : vector<1x16x128xf32> to vector<1xf32>
    %345 = vector.shape_cast %344 : vector<1xf32> to vector<1x1x1xf32>
    %346 = vector.extract %345[0, 0, 0] : f32 from vector<1x1x1xf32>
    %347 = vector.broadcast %346 : f32 to vector<1x1xf32>
    %348 = arith.addf %341, %347 : vector<1x1xf32>
    %c0_187 = arith.constant 0 : index
    %c0_188 = arith.constant 0 : index
    %c0_189 = arith.constant 0 : index
    %349 = vector.load %arg23[%c0_187, %c0_188, %c0_189] : memref<1x1x1xf32, #tpu.memory_space<vmem>>, vector<1x1x1xf32>
    %350 = vector.shape_cast %349 : vector<1x1x1xf32> to vector<1x1xf32>
    %351 = vector.shape_cast %348 : vector<1x1xf32> to vector<1x1x1xf32>
    tpu.vector_store %arg23[%c0_187, %c0_188, %c0_189], %351 {strides = array<i32>} : memref<1x1x1xf32, #tpu.memory_space<vmem>>, vector<1x1x1xf32>,
    return
  }
  func.func @transform_0(%arg0: i32) -> (i32, i32, i32) {
    %c0_i32 = arith.constant 0 : i32
    %c0_i32_0 = arith.constant 0 : i32
    %c0_i32_1 = arith.constant 0 : i32
    return %arg0, %c0_i32, %c0_i32_0 : i32, i32, i32
  }
  func.func @transform_1(%arg0: i32) -> (i32, i32, i32) {
    %c0_i32 = arith.constant 0 : i32
    %c0_i32_0 = arith.constant 0 : i32
    %c0_i32_1 = arith.constant 0 : i32
    return %arg0, %c0_i32, %c0_i32_0 : i32, i32, i32
  }
  func.func @transform_2(%arg0: i32) -> (i32, i32) {
    %c0_i32 = arith.constant 0 : i32
    %c0_i32_0 = arith.constant 0 : i32
    %c0_i32_1 = arith.constant 0 : i32
    return %c0_i32, %c0_i32_0 : i32, i32
  }
  func.func @transform_3(%arg0: i32) -> (i32, i32) {
    %c0_i32 = arith.constant 0 : i32
    %c0_i32_0 = arith.constant 0 : i32
    %c0_i32_1 = arith.constant 0 : i32
    return %c0_i32, %c0_i32_0 : i32, i32
  }
  func.func @transform_4(%arg0: i32) -> (i32, i32) {
    %c0_i32 = arith.constant 0 : i32
    %c0_i32_0 = arith.constant 0 : i32
    %c0_i32_1 = arith.constant 0 : i32
    return %c0_i32, %c0_i32_0 : i32, i32
  }
  func.func @transform_5(%arg0: i32) -> (i32, i32, i32) {
    %c0_i32 = arith.constant 0 : i32
    %c0_i32_0 = arith.constant 0 : i32
    %c0_i32_1 = arith.constant 0 : i32
    %c0_i32_2 = arith.constant 0 : i32
    return %c0_i32, %c0_i32_0, %c0_i32_1 : i32, i32, i32
  }
  func.func @transform_6(%arg0: i32) -> (i32, i32, i32) {
    %c0_i32 = arith.constant 0 : i32
    %c0_i32_0 = arith.constant 0 : i32
    %c0_i32_1 = arith.constant 0 : i32
    %c0_i32_2 = arith.constant 0 : i32
    return %c0_i32, %c0_i32_0, %c0_i32_1 : i32, i32, i32
  }
  func.func @transform_7(%arg0: i32) -> (i32, i32, i32) {
    %c0_i32 = arith.constant 0 : i32
    %c0_i32_0 = arith.constant 0 : i32
    %c0_i32_1 = arith.constant 0 : i32
    %c0_i32_2 = arith.constant 0 : i32
    return %c0_i32, %c0_i32_0, %c0_i32_1 : i32, i32, i32
  }
  func.func @transform_8(%arg0: i32) -> (i32, i32) {
    %c0_i32 = arith.constant 0 : i32
    %c0_i32_0 = arith.constant 0 : i32
    %c0_i32_1 = arith.constant 0 : i32
    return %c0_i32, %c0_i32_0 : i32, i32
  }
  func.func @transform_9(%arg0: i32) -> (i32, i32) {
    %c0_i32 = arith.constant 0 : i32
    %c0_i32_0 = arith.constant 0 : i32
    %c0_i32_1 = arith.constant 0 : i32
    return %c0_i32, %c0_i32_0 : i32, i32
  }
  func.func @transform_10(%arg0: i32) -> (i32, i32) {
    %c0_i32 = arith.constant 0 : i32
    %c0_i32_0 = arith.constant 0 : i32
    %c0_i32_1 = arith.constant 0 : i32
    return %c0_i32, %c0_i32_0 : i32, i32
  }
  func.func @transform_11(%arg0: i32) -> (i32, i32, i32) {
    %c0_i32 = arith.constant 0 : i32
    %c0_i32_0 = arith.constant 0 : i32
    %c0_i32_1 = arith.constant 0 : i32
    %c0_i32_2 = arith.constant 0 : i32
    return %c0_i32, %c0_i32_0, %c0_i32_1 : i32, i32, i32
  }
  func.func @transform_12(%arg0: i32) -> (i32, i32) {
    %c0_i32 = arith.constant 0 : i32
    %c0_i32_0 = arith.constant 0 : i32
    %c0_i32_1 = arith.constant 0 : i32
    return %c0_i32, %c0_i32_0 : i32, i32
  }
  func.func @transform_13(%arg0: i32) -> (i32, i32, i32) {
    %c0_i32 = arith.constant 0 : i32
    %c0_i32_0 = arith.constant 0 : i32
    %c0_i32_1 = arith.constant 0 : i32
    %c0_i32_2 = arith.constant 0 : i32
    return %c0_i32, %c0_i32_0, %c0_i32_1 : i32, i32, i32
  }
  func.func @transform_14(%arg0: i32) -> (i32, i32) {
    %c0_i32 = arith.constant 0 : i32
    %c0_i32_0 = arith.constant 0 : i32
    %c0_i32_1 = arith.constant 0 : i32
    return %c0_i32, %c0_i32_0 : i32, i32
  }
  func.func @transform_15(%arg0: i32) -> (i32, i32) {
    %c0_i32 = arith.constant 0 : i32
    %c0_i32_0 = arith.constant 0 : i32
    %c0_i32_1 = arith.constant 0 : i32
    return %c0_i32, %c0_i32_0 : i32, i32
  }
  func.func @transform_16(%arg0: i32) -> (i32, i32) {
    %c0_i32 = arith.constant 0 : i32
    %c0_i32_0 = arith.constant 0 : i32
    %c0_i32_1 = arith.constant 0 : i32
    return %c0_i32, %c0_i32_0 : i32, i32
  }
  func.func @transform_17(%arg0: i32) -> (i32, i32) {
    %c0_i32 = arith.constant 0 : i32
    %c0_i32_0 = arith.constant 0 : i32
    %c0_i32_1 = arith.constant 0 : i32
    return %c0_i32, %c0_i32_0 : i32, i32
  }
  func.func @transform_18(%arg0: i32) -> (i32, i32) {
    %c0_i32 = arith.constant 0 : i32
    %c0_i32_0 = arith.constant 0 : i32
    %c0_i32_1 = arith.constant 0 : i32
    return %c0_i32, %c0_i32_0 : i32, i32
  }
  func.func @transform_19(%arg0: i32) -> (i32, i32) {
    %c0_i32 = arith.constant 0 : i32
    %c0_i32_0 = arith.constant 0 : i32
    %c0_i32_1 = arith.constant 0 : i32
    return %c0_i32, %c0_i32_0 : i32, i32
  }
  func.func @transform_20(%arg0: i32) -> (i32, i32, i32) {
    %c0_i32 = arith.constant 0 : i32
    %c0_i32_0 = arith.constant 0 : i32
    %c0_i32_1 = arith.constant 0 : i32
    return %arg0, %c0_i32, %c0_i32_0 : i32, i32, i32
  }
  func.func @transform_21(%arg0: i32) -> (i32, i32, i32) {
    %c0_i32 = arith.constant 0 : i32
    %c0_i32_0 = arith.constant 0 : i32
    %c0_i32_1 = arith.constant 0 : i32
    return %arg0, %c0_i32, %c0_i32_0 : i32, i32, i32
  }
  func.func @transform_22(%arg0: i32) -> (i32, i32, i32) {
    %c0_i32 = arith.constant 0 : i32
    %c0_i32_0 = arith.constant 0 : i32
    %c0_i32_1 = arith.constant 0 : i32
    return %arg0, %c0_i32, %c0_i32_0 : i32, i32, i32
  }
  func.func @transform_23(%arg0: i32) -> (i32, i32, i32) {
    %c0_i32 = arith.constant 0 : i32
    %c0_i32_0 = arith.constant 0 : i32
    %c0_i32_1 = arith.constant 0 : i32
    return %arg0, %c0_i32, %c0_i32_0 : i32, i32, i32
  }
}

</mosaic_0001>

<bundles_post_ra>
// kernel: recon_forward.1
= control target key start
LH: loop header
LB: loop body
LE: loop exit
PB: predicated region body
PF: predicated region fallthrough
CT: control target
= control target key end

     0   :  { %s7628_s0 = inlined_call_operand.vmem [shape: f32[2,16,64], index: 0, kind: input, shape index: {}]   ;;  %s7629_s1 = inlined_call_operand.vmem [shape: f32[2,16,96], index: 1, kind: input, shape index: {}]   ;;  %s7630_s2 = inlined_call_operand.vmem [shape: f32[64,96], index: 2, kind: input, shape index: {}]   ;;  %s7631_s3 = inlined_call_operand.vmem [shape: f32[2,96], index: 3, kind: input, shape index: {}]   ;;  %s7632_s4 = inlined_call_operand.vmem [shape: f32[2,96], index: 4, kind: input, shape index: {}]   ;;  %s7633_s5 = inlined_call_operand.vmem [shape: f32[8,96,96], index: 5, kind: input, shape index: {}]   ;;  %s7634_s6 = inlined_call_operand.vmem [shape: f32[2,96,96], index: 6, kind: input, shape index: {}]   ;;  %s7635_s7 = inlined_call_operand.vmem [shape: f32[8,96,96], index: 7, kind: input, shape index: {}]   ;;  %s7636_s8 = inlined_call_operand.vmem [shape: f32[2,96], index: 8, kind: input, shape index: {}]   ;;  %s7637_s9 = inlined_call_operand.vmem [shape: f32[2,96], index: 9, kind: input, shape index: {}]   ;;  %s7638_s10 = inlined_call_operand.vmem [shape: f32[2,96], index: 10, kind: input, shape index: {}]   ;;  %s7639_s11 = inlined_call_operand.vmem [shape: f32[2,96,128], index: 11, kind: input, shape index: {}]   ;;  %s7640_s12 = inlined_call_operand.vmem [shape: f32[2,128], index: 12, kind: input, shape index: {}]   ;;  %s7641_s13 = inlined_call_operand.vmem [shape: f32[2,128,96], index: 13, kind: input, shape index: {}]   ;;  %s7642_s14 = inlined_call_operand.vmem [shape: f32[2,96], index: 14, kind: input, shape index: {}]   ;;  %s7643_s15 = inlined_call_operand.vmem [shape: f32[1,96], index: 15, kind: input, shape index: {}]   ;;  %s7644_s16 = inlined_call_operand.vmem [shape: f32[1,96], index: 16, kind: input, shape index: {}]   ;;  %s7645_s17 = inlined_call_operand.vmem [shape: f32[96,128], index: 17, kind: input, shape index: {}]   ;;  %s7646_s18 = inlined_call_operand.vmem [shape: f32[1,128], index: 18, kind: input, shape index: {}]   ;;  %s7647_s19 = inlined_call_operand.vmem [shape: f32[64,16], index: 19, kind: input, shape index: {}]   ;;  %s7648_s20 = inlined_call_operand.vmem [shape: f32[2,16,128], index: 20, kind: input, shape index: {}]   ;;  %s7649_s21 = inlined_call_operand.vmem [shape: f32[2,16,1], index: 21, kind: input, shape index: {}]   ;;  %s7650_s22 = inlined_call_operand.vmem [shape: f32[2,1,1], index: 22, kind: output, shape index: {0}]   ;;  %s7651_s23 = inlined_call_operand.vmem [shape: f32[2,16,128], index: 23, kind: output, shape index: {1}]  }
   0x1   :  { %7661 = sst [smem:[#allocation4_spill]] %s7628_s0 }
   0x2   :  { %7662 = sst [smem:[#allocation5_spill]] %s7629_s1 }
   0x3   :  { %7663 = sst [smem:[#allocation6_spill]] %s7630_s2 }
   0x4   :  { %7664 = sst [smem:[#allocation7_spill]] %s7631_s3 }
   0x5   :  { %7665 = sst [smem:[#allocation8_spill]] %s7632_s4  ;;  %s6253_s4 = smov 0  }
   0x6   :  { %7666 = sst [smem:[#allocation9_spill]] %s7633_s5 }
   0x7   :  { %7667 = sst [smem:[#allocation10_spill]] %s7634_s6 }
   0x8   :  { %7668 = sst [smem:[#allocation11_spill]] %s7635_s7 }
   0x9   :  { %7669 = sst [smem:[#allocation12_spill]] %s7650_s22 }
   0xa LB: > { %7670 = sst [smem:[#allocation2_spill]] %s6130_s4  ;;  %s4536_s30 = sadd.s32 4294967295, %s6130_s4   ;;  %s6130_s4 = sphi %s6253_s4, %s34_s4  }
   0xb   : > { %p4540_p0 = scmp.ge.s32.totalorder %s6130_s4, 1  ;;  %p670_p1 = scmp.lt.s32.totalorder %s6130_s4, 3 }
   0xd   : > { %p671_p2 = pnand %p4540_p0, %p670_p1 }
   0xf   : > { %674 = sbr.rel (%p671_p2) target bundleno = 6575 (0x19af), region = 108 }
  0x14   : > { %s7671_s5 = sld [smem:[#allocation6_spill]]  ;;  %p752_p3 = scmp.lt.s32.totalorder %s4536_s30, 1  ;;  %vm800_vm0 = vcmask 523264   ;;  %vm884_vm1 = vcmask 785408   ;;  %vm1700_vm2 = vcmask 130048   ;;  %vm4418_vm3 = vcmask 0  }
  0x15   : > { %s7673_s0 = sld [smem:[#allocation4_spill]] }
  0x16   : > { %s7684_s30 = smov (!%p752_p3, %s4536_s30), 1  ;;  %s7674_s25 = sld [smem:[#allocation5_spill]] }
  0x17   : > { %7672 = sst [smem:[#allocation3_spill]] %s7684_s30  ;;  %s6276_s28 = sshll.u32 %s7684_s30, 4 }
  0x18   : > { %s7675_s2 = sld [smem:[#allocation10_spill]]  ;;  %s771_s26 = scalar_lea.vmem %s7649_s21, %s6276_s28 }
  0x19   : > { %s7676_s7 = sld [smem:[#allocation9_spill]]  ;;  %s766_s30 = scalar_lea.vmem %s7648_s20, %s6276_s28 }
  0x1a   : > { %v797_v0 = vld [vmem:[%s7671_s5 + $0x38] sm:$0xff]  ;;  %v796_v1 = vld [vmem:[%s7671_s5 + $0x30] sm:$0xff]  ;;  %v795_v2 = vld [vmem:[%s7671_s5 + $0x28] sm:$0xff]  ;;  %s7677_s3 = sld [smem:[#allocation7_spill]]  ;;  %s779_s27 = scalar_lea.vmem %s7651_s23, %s6276_s28 }
  0x1b   : > { %5267 = vmatprep.subr.mxu0 %v797_v0  ;;  %v794_v3 = vld [vmem:[%s7671_s5 + $0x20] sm:$0xff]  ;;  %s756_s24 = scalar_lea.vmem %s7673_s0, %s6276_s28  ;;  %v793_v4 = vld [vmem:[%s7671_s5 + $0x18] sm:$0xff]  ;;  %v792_v6 = vld [vmem:[%s7671_s5 + $0x10] sm:$0xff]  ;;  %s7680_s29 = sld [smem:[#allocation3_spill]] }
  0x1c   : > { %5268 = vmatpush3.msra.mxu0 %v797_v0  ;;  %v788_v5 = vld [vmem:[%s756_s24] sm:$0xff]  ;;  %v791_v7 = vld [vmem:[%s7671_s5 + $0x8] sm:$0xff]  ;;  %s761_s1 = scalar_lea.vmem %s7674_s25, %s6276_s28  ;;  %s7681_s0 = sld [smem:[#allocation12_spill]] }
  0x1d   : > { %5269 = vmatprep.subr.mxu0 %v796_v1  ;;  %5283 = vmatprep.mubr.msk.f32.mxu0 %vm800_vm0, %v788_v5  ;;  %v790_v8 = vld [vmem:[%s7671_s5] sm:$0xff]  ;;  %v789_v9 = vld [vmem:[%s756_s24 + $0x8] sm:$0xff]  ;;  %s7679_s5 = sld [smem:[#allocation11_spill]] }
  0x1e   : > { %5270 = vmatpush3.msra.mxu0 %v796_v1  ;;  %v798_v11 = vld [vmem:[%s761_s1] sm:$0xff]  ;;  %v799_v12 = vld [vmem:[%s761_s1 + $0x8] sm:$0xff]  ;;  %v935_v28 = vld [vmem:[%s7675_s2 + $0x58] sm:$0xff]  ;;  %s7678_s1 = sld [smem:[#allocation8_spill]] }
  0x1f   : > { %5271 = vmatprep.subr.mxu0 %v795_v2  ;;  %v1028_v29 = vld [vmem:[%s7676_s7 + $0x58] sm:$0xff]  ;;  %5286 = vmatprep.subr.mxu1 %v935_v28  ;;  %v934_v30 = vld [vmem:[%s7675_s2 + $0x50] sm:$0xff]  ;;  %v933_v32 = vld [vmem:[%s7675_s2 + $0x48] sm:$0xff] }
  0x20   : > { %5272 = vmatpush3.msra.mxu0 %v795_v2  ;;  %5287 = vmatpush3.msra.mxu1 %v935_v28  ;;  %v1027_v31 = vld [vmem:[%s7676_s7 + $0x50] sm:$0xff]  ;;  %v1026_v33 = vld [vmem:[%s7676_s7 + $0x48] sm:$0xff]  ;;  %v932_v34 = vld [vmem:[%s7675_s2 + $0x40] sm:$0xff] }
  0x21   : > { %5273 = vmatprep.subr.mxu0 %v794_v3  ;;  %5288 = vmatprep.subr.mxu1 %v934_v30  ;;  %v1025_v35 = vld [vmem:[%s7676_s7 + $0x40] sm:$0xff]  ;;  %v931_v36 = vld [vmem:[%s7675_s2 + $0x38] sm:$0xff]  ;;  %v930_v38 = vld [vmem:[%s7675_s2 + $0x30] sm:$0xff] }
  0x22   : > { %5274 = vmatpush3.msra.mxu0 %v794_v3  ;;  %5289 = vmatpush3.msra.mxu1 %v934_v30  ;;  %v1024_v37 = vld [vmem:[%s7676_s7 + $0x38] sm:$0xff]  ;;  %v1023_v39 = vld [vmem:[%s7676_s7 + $0x30] sm:$0xff]  ;;  %v929_v40 = vld [vmem:[%s7675_s2 + $0x28] sm:$0xff]  ;;  %s774_s22 = scalar_lea.vmem %s7681_s0, %s7680_s29 }
  0x23   : > { %5275 = vmatprep.subr.mxu0 %v793_v4  ;;  %5290 = vmatprep.subr.mxu1 %v933_v32  ;;  %v1022_v41 = vld [vmem:[%s7676_s7 + $0x28] sm:$0xff]  ;;  %v928_v42 = vld [vmem:[%s7675_s2 + $0x20] sm:$0xff]  ;;  %v927_v44 = vld [vmem:[%s7675_s2 + $0x18] sm:$0xff] }
  0x24   : > { %5276 = vmatpush3.msra.mxu0 %v793_v4  ;;  %5291 = vmatpush3.msra.mxu1 %v933_v32  ;;  %v1021_v43 = vld [vmem:[%s7676_s7 + $0x20] sm:$0xff]  ;;  %v1020_v45 = vld [vmem:[%s7676_s7 + $0x18] sm:$0xff]  ;;  %v926_v46 = vld [vmem:[%s7675_s2 + $0x10] sm:$0xff] }
  0x25   : > { %5277 = vmatprep.subr.mxu0 %v792_v6  ;;  %5292 = vmatprep.subr.mxu1 %v932_v34  ;;  %v1019_v47 = vld [vmem:[%s7676_s7 + $0x10] sm:$0xff]  ;;  %v925_v48 = vld [vmem:[%s7675_s2 + $0x8] sm:$0xff]  ;;  %v924_v50 = vld [vmem:[%s7675_s2] sm:$0xff] }
  0x26   : > { %5278 = vmatpush3.msra.mxu0 %v792_v6  ;;  %5293 = vmatpush3.msra.mxu1 %v932_v34  ;;  %v1018_v49 = vld [vmem:[%s7676_s7 + $0x8] sm:$0xff]  ;;  %v1017_v51 = vld [vmem:[%s7676_s7] sm:$0xff]  ;;  %v4574_v4 = vld [vmem:[%s7676_s7 + $0xb8] sm:$0xff] }
  0x27   : > { %5279 = vmatprep.subr.mxu0 %v791_v7  ;;  %5294 = vmatprep.subr.mxu1 %v931_v36  ;;  %v4553_v59 = vld [vmem:[%s7677_s3] ss:$0 sm:$0xff]  ;;  %v4590_v34 = vld [vmem:[%s7676_s7 + $0x108] sm:$0xff] }
  0x28   : > { %5280 = vmatpush3.msra.mxu0 %v791_v7  ;;  %5295 = vmatpush3.msra.mxu1 %v931_v36  ;;  %v4554_v61 = vld [vmem:[%s7678_s1] ss:$0 sm:$0xff]  ;;  %v4573_v7 = vld [vmem:[%s7676_s7 + $0xb0] sm:$0xff]  ;;  %v4588_v36 = vld [vmem:[%s7676_s7 + $0xf8] sm:$0xff] }
  0x29   : > { %5281 = vmatprep.subr.mxu0 %v790_v8  ;;  %5296 = vmatprep.subr.mxu1 %v930_v38 }
  0x2a   : > { %5282 = vmatpush3.msra.mxu0 %v790_v8  ;;  %5297 = vmatpush3.msra.mxu1 %v930_v38  ;;  %v4572_v8 = vld [vmem:[%s7676_s7 + $0xa8] sm:$0xff] }
  0x2b   : > { %5284 = vmatmul.mubr.msk.f32.vlgmr.msra.gmra.mxu0 %vm800_vm0, %v789_v9  ;;  %5313 = vmatprep.subr.mxu0 %v1028_v29  ;;  %v4571_v9 = vld [vmem:[%s7676_s7 + $0xa0] sm:$0xff]  ;;  %v4586_v38 = vld [vmem:[%s7676_s7 + $0xe8] sm:$0xff] }
  0x2c   : > { %5314 = vmatpush3.msra.mxu0 %v1028_v29  ;;  %5298 = vmatprep.subr.mxu1 %v929_v40 }
  0x2d   : > { %5315 = vmatprep.subr.mxu0 %v1027_v31  ;;  %5299 = vmatpush3.msra.mxu1 %v929_v40  ;;  %v4584_v40 = vld [vmem:[%s7676_s7 + $0xd8] sm:$0xff] }
  0x2e   : > { %5316 = vmatpush3.msra.mxu0 %v1027_v31  ;;  %5300 = vmatprep.subr.mxu1 %v928_v42 }
  0x2f   : > { %5317 = vmatprep.subr.mxu0 %v1026_v33  ;;  %5301 = vmatpush3.msra.mxu1 %v928_v42  ;;  %v4582_v42 = vld [vmem:[%s7676_s7 + $0xc8] sm:$0xff] }
  0x30   : > { %5318 = vmatpush3.msra.mxu0 %v1026_v33  ;;  %5302 = vmatprep.subr.mxu1 %v927_v44  ;;  %v4591_v33 = vld [vmem:[%s7676_s7 + $0x110] sm:$0xff] }
  0x31   : > { %5319 = vmatprep.subr.mxu0 %v1025_v35  ;;  %5303 = vmatpush3.msra.mxu1 %v927_v44  ;;  %v4610_v44 = vld [vmem:[%s7676_s7 + $0x178] sm:$0xff] }
  0x32   : > { %5320 = vmatpush3.msra.mxu0 %v1025_v35  ;;  %5304 = vmatprep.subr.mxu1 %v926_v46  ;;  %v4589_v35 = vld [vmem:[%s7676_s7 + $0x100] sm:$0xff] }
  0x33   : > { %5321 = vmatprep.subr.mxu0 %v1024_v37  ;;  %5305 = vmatpush3.msra.mxu1 %v926_v46 }
  0x34   : > { %5322 = vmatpush3.msra.mxu0 %v1024_v37  ;;  %5306 = vmatprep.subr.mxu1 %v925_v48  ;;  %v4587_v37 = vld [vmem:[%s7676_s7 + $0xf0] sm:$0xff] }
  0x35   : > { %5323 = vmatprep.subr.mxu0 %v1023_v39  ;;  %5307 = vmatpush3.msra.mxu1 %v925_v48 }
  0x36   : > { %5324 = vmatpush3.msra.mxu0 %v1023_v39  ;;  %5308 = vmatprep.subr.mxu1 %v924_v50  ;;  %v4585_v39 = vld [vmem:[%s7676_s7 + $0xe0] sm:$0xff] }
  0x37   : > { %5325 = vmatprep.subr.mxu0 %v1022_v41  ;;  %5309 = vmatpush3.msra.mxu1 %v924_v50 }
  0x38   : > { %5326 = vmatpush3.msra.mxu0 %v1022_v41  ;;  %v4583_v41 = vld [vmem:[%s7676_s7 + $0xd0] sm:$0xff] }
  0x39   : > { %5327 = vmatprep.subr.mxu0 %v1021_v43 }
  0x3a   : > { %5328 = vmatpush3.msra.mxu0 %v1021_v43  ;;  %v4581_v43 = vld [vmem:[%s7676_s7 + $0xc0] sm:$0xff] }
  0x3b   : > { %5329 = vmatprep.subr.mxu0 %v1020_v45 }
  0x3c   : > { %5330 = vmatpush3.msra.mxu0 %v1020_v45  ;;  %v783_v45 = vld [vmem:[%s7647_s19 + $0x18] sm:$0xff] }
  0x3d   : > { %5331 = vmatprep.subr.mxu0 %v1019_v47 }
  0x3e   : > { %5332 = vmatpush3.msra.mxu0 %v1019_v47  ;;  %v782_v47 = vld [vmem:[%s7647_s19 + $0x10] sm:$0xff] }
  0x3f   : > { %5333 = vmatprep.subr.mxu0 %v1018_v49 }
  0x40   : > { %5334 = vmatpush3.msra.mxu0 %v1018_v49 }
  0x41   : > { %5335 = vmatprep.subr.mxu0 %v1017_v51 }
  0x42   : > { %5336 = vmatpush3.msra.mxu0 %v1017_v51 }
  0xeb   : > { %v5285_v10 = vpop.f32.mrf.mxu0 }
  0xec   : > { %v6302_v15 = vadd.f32 %v5285_v10, %v799_v12  ;;  %v4570_v10 = vld [vmem:[%s7676_s7 + $0x98] sm:$0xff]  ;;  %v4568_v12 = vld [vmem:[%s7676_s7 + $0x88] sm:$0xff] }
  0xed   : > { %v873_v13 = vpop.f32.mrf.mxu0 }
  0xee   : > { %v6300_v14 = vadd.f32 %v873_v13, %v798_v11  ;;  %v888_v17 = vsel %vm884_vm1, %v6302_v15, 0.0  ;;  %v4569_v11 = vld [vmem:[%s7676_s7 + $0x90] sm:$0xff]  ;;  %v4567_v13 = vld [vmem:[%s7676_s7 + $0x80] sm:$0xff] }
  0xf0   : > { %v885_v16 = vsel %vm884_vm1, %v6300_v14, 0.0 }
  0xf1   : > { %886 = vadd.xlane.f32.xlu0 %v885_v16  ;;  %v4566_v16 = vld [vmem:[%s7676_s7 + $0x78] sm:$0xff] }
  0xf5   : > { %889 = vadd.xlane.f32.xlu0 %v888_v17  ;;  %v4565_v17 = vld [vmem:[%s7676_s7 + $0x70] sm:$0xff] }
 0x17a   : > { %v887_v18 = vpop.xlane.xlu0 %886 }
 0x17b   : > { %v892_v19 = vmul.f32 0.010416667, %v887_v18  ;;  %v4564_v18 = vld [vmem:[%s7676_s7 + $0x68] sm:$0xff] }
 0x17d   : > { %v6309_v20 = vsub.f32 %v6300_v14, %v892_v19  ;;  %v4563_v19 = vld [vmem:[%s7676_s7 + $0x60] sm:$0xff] }
 0x17e   : > { %v890_v21 = vpop.xlane.xlu0 %889 }
 0x17f   : > { %v893_v22 = vmul.f32 0.010416667, %v890_v21  ;;  %v896_v23 = vmul.f32 %v6309_v20, %v6309_v20 }
 0x181   : > { %v6314_v24 = vsub.f32 %v6302_v15, %v893_v22  ;;  %v898_v25 = vsel %vm884_vm1, %v896_v23, 0.0  ;;  %v781_v23 = vld [vmem:[%s7647_s19 + $0x8] sm:$0xff] }
 0x182   : > { %899 = vadd.xlane.f32.xlu1 %v898_v25  ;;  %v780_v25 = vld [vmem:[%s7647_s19] sm:$0xff] }
 0x183   : > { %v897_v26 = vmul.f32 %v6314_v24, %v6314_v24 }
 0x185   : > { %v901_v27 = vsel %vm884_vm1, %v897_v26, 0.0 }
 0x186   : > { %902 = vadd.xlane.f32.xlu1 %v901_v27 }
 0x20b   : > { %v900_v52 = vpop.xlane.xlu1 %899 }
 0x20c   : > { %v904_v53 = vmul.f32 0.010416667, %v900_v52 }
 0x20e   : > { %v906_v54 = vadd.f32 1e-05, %v904_v53 }
 0x20f   : > { %v903_v55 = vpop.xlane.xlu1 %902 }
 0x210   : > { %6024 = vrsqrt.f32 %v906_v54  ;;  %v905_v56 = vmul.f32 0.010416667, %v903_v55  ;;  %v4609_v55 = vld [vmem:[%s7676_s7 + $0x170] sm:$0xff] }
 0x212   : > { %v907_v57 = vadd.f32 1e-05, %v905_v56  ;;  %v4608_v56 = vld [vmem:[%s7676_s7 + $0x168] sm:$0xff] }
 0x214   : > { %6026 = vrsqrt.f32 %v907_v57  ;;  %v4607_v57 = vld [vmem:[%s7676_s7 + $0x160] sm:$0xff] }
 0x21d   : > { %v6025_v58 = vpop.eup %6024 }
 0x21e   : > { %v910_v60 = vmul.f32 %v6025_v58, %v6309_v20  ;;  %v4592_v20 = vld [vmem:[%s7676_s7 + $0x118] sm:$0xff] }
 0x21f   : > { %v4606_v58 = vld [vmem:[%s7676_s7 + $0x158] sm:$0xff] }
 0x220   : > { %v916_v62 = vmul.f32 %v4553_v59, %v910_v60  ;;  %v4604_v60 = vld [vmem:[%s7676_s7 + $0x148] sm:$0xff] }
 0x221   : > { %v6027_v63 = vpop.eup %6026 }
 0x222   : > { %v6399_v0 = vadd.f32 %v4554_v61, %v916_v62  ;;  %v911_v1 = vmul.f32 %v6027_v63, %v6314_v24  ;;  %v4602_v62 = vld [vmem:[%s7676_s7 + $0x138] sm:$0xff]  ;;  %v4601_v63 = vld [vmem:[%s7676_s7 + $0x130] sm:$0xff] }
 0x224   : > { %v917_v2 = vmul.f32 %v4553_v59, %v911_v1  ;;  %5310 = vmatprep.mubr.msk.f32.mxu1 %vm884_vm1, %v6399_v0  ;;  %5337 = vmatprep.mubr.msk.f32.mxu0 %vm884_vm1, %v6399_v0  ;;  %v4605_v59 = vld [vmem:[%s7676_s7 + $0x150] sm:$0xff]  ;;  %v4599_v1 = vld [vmem:[%s7676_s7 + $0x120] sm:$0xff] }
 0x226   : > { %v6406_v3 = vadd.f32 %v4554_v61, %v917_v2  ;;  %v4603_v61 = vld [vmem:[%s7676_s7 + $0x140] sm:$0xff]  ;;  %v785_v2 = vld [vmem:[%s7647_s19 + $0x28] sm:$0xff] }
 0x228   : > { %5311 = vmatmul.mubr.msk.f32.vlgmr.msra.gmra.mxu1 %vm884_vm1, %v6406_v3  ;;  %5338 = vmatmul.mubr.msk.f32.vlgmr.msra.gmra.mxu0 %vm884_vm1, %v6406_v3 }
 0x229   : > { %5340 = vmatprep.subr.msk.mxu1 %vm884_vm1, %v6406_v3  ;;  %5374 = vmatprep.subr.msk.mxu0 %vm884_vm1, %v6406_v3 }
 0x22a   : > { %5341 = vmatpush3.xpose.msk.msra.mxu1 %vm884_vm1, %v6406_v3  ;;  %5375 = vmatpush3.xpose.msk.msra.mxu0 %vm884_vm1, %v6406_v3 }
 0x22b   : > { %5342 = vmatprep.subr.msk.mxu1 %vm884_vm1, %v6399_v0  ;;  %5376 = vmatprep.subr.msk.mxu0 %vm884_vm1, %v6399_v0 }
 0x22e   : > { %5343 = vmatpush3.xpose.msk.msra.mxu1 %vm884_vm1, %v6399_v0  ;;  %5377 = vmatpush3.xpose.msk.msra.mxu0 %vm884_vm1, %v6399_v0 }
 0x22f   : > { %5347 = vmatprep.subr.mxu1 %v4574_v4  ;;  %5381 = vmatprep.subr.mxu0 %v4592_v20 }
 0x2e8   : > { %v5339_v5 = vpop.f32.mrf.mxu0  ;;  %v6481_v21 = vpop.f32.mrf.mxu1 }
 0x2ea   : > { %v1095_v6 = vpop.f32.mrf.mxu0  ;;  %v6483_v22 = vpop.f32.mrf.mxu1 }
 0x2eb   : > { %5344 = vmatprep.mubr.msk.f32.mxu1 %vm884_vm1, %v1095_v6 }
 0x2ec   : > { %5345 = vmatmul.mubr.msk.f32.vlgmr.msra.gmra.mxu1 %vm884_vm1, %v5339_v5  ;;  %v784_v5 = vld [vmem:[%s7647_s19 + $0x20] sm:$0xff] }
 0x2ed   : > { %5348 = vmatpush3.msra.mxu1 %v4574_v4  ;;  %5371 = vmatprep.mubr.msk.f32.mxu1 %vm884_vm1, %v6399_v0 }
 0x2ee   : > { %5349 = vmatprep.subr.mxu1 %v4573_v7 }
 0x2ef   : > { %5350 = vmatpush3.msra.mxu1 %v4573_v7 }
 0x2f0   : > { %5351 = vmatprep.subr.mxu1 %v4572_v8 }
 0x2f1   : > { %5352 = vmatpush3.msra.mxu1 %v4572_v8 }
 0x2f2   : > { %5353 = vmatprep.subr.mxu1 %v4571_v9 }
 0x2f3   : > { %5354 = vmatpush3.msra.mxu1 %v4571_v9 }
 0x2f4   : > { %5355 = vmatprep.subr.mxu1 %v4570_v10 }
 0x2f5   : > { %5356 = vmatpush3.msra.mxu1 %v4570_v10 }
 0x2f6   : > { %5357 = vmatprep.subr.mxu1 %v4569_v11 }
 0x2f7   : > { %5358 = vmatpush3.msra.mxu1 %v4569_v11 }
 0x2f8   : > { %5359 = vmatprep.subr.mxu1 %v4568_v12 }
 0x2f9   : > { %5360 = vmatpush3.msra.mxu1 %v4568_v12 }
 0x2fa   : > { %5361 = vmatprep.subr.mxu1 %v4567_v13 }
 0x2fb   : > { %5362 = vmatpush3.msra.mxu1 %v4567_v13 }
 0x2fc   : > { %5363 = vmatprep.subr.mxu1 %v4566_v16 }
 0x2fd   : > { %5364 = vmatpush3.msra.mxu1 %v4566_v16 }
 0x2fe   : > { %5365 = vmatprep.subr.mxu1 %v4565_v17 }
 0x2ff   : > { %5366 = vmatpush3.msra.mxu1 %v4565_v17 }
 0x300   : > { %5367 = vmatprep.subr.mxu1 %v4564_v18 }
 0x301   : > { %5368 = vmatpush3.msra.mxu1 %v4564_v18 }
 0x302   : > { %5369 = vmatprep.subr.mxu1 %v4563_v19 }
 0x303   : > { %5370 = vmatpush3.msra.mxu1 %v4563_v19 }
 0x304   : > { %5372 = vmatmul.mubr.msk.f32.vlgmr.msra.gmra.mxu1 %vm884_vm1, %v6406_v3  ;;  %5408 = vmatprep.subr.msk.mxu1 %vm884_vm1, %v6406_v3 }
 0x305   : > { %5409 = vmatpush3.xpose.msk.msra.mxu1 %vm884_vm1, %v6406_v3 }
 0x306   : > { %5410 = vmatprep.subr.msk.mxu1 %vm884_vm1, %v6399_v0 }
 0x309   : > { %5411 = vmatpush3.xpose.msk.msra.mxu1 %vm884_vm1, %v6399_v0 }
 0x30a   : > { %5415 = vmatprep.subr.mxu1 %v4610_v44 }
 0x3ac   : > { %v5346_v24 = vpop.f32.mrf.mxu1 }
 0x3ad   : > { %v6491_v26 = vadd.f32 %v5346_v24, %v781_v23 }
 0x3ae   : > { %v1176_v27 = vpop.f32.mrf.mxu1 }
 0x3af   : > { %v6493_v28 = vadd.f32 %v1176_v27, %v780_v25  ;;  %v1704_v29 = vsel %vm1700_vm2, %v6491_v26, -inf }
 0x3b0   : > { %1705 = vmax.xlane.f32.xlu1 %v1704_v29 }
 0x3b1   : > { %v1701_v30 = vsel %vm1700_vm2, %v6493_v28, -inf }
 0x3b2   : > { %1702 = vmax.xlane.f32.xlu0 %v1701_v30 }
 0x3c4   : > { %v5373_v31 = vpop.f32.mrf.mxu1 }
 0x3c6   : > { %v1264_v32 = vpop.f32.mrf.mxu1 }
 0x3c7   : > { %5378 = vmatprep.mubr.msk.f32.mxu0 %vm884_vm1, %v1264_v32 }
 0x3c8   : > { %5379 = vmatmul.mubr.msk.f32.vlgmr.msra.gmra.mxu0 %vm884_vm1, %v5373_v31 }
 0x3c9   : > { %5382 = vmatpush3.msra.mxu0 %v4592_v20  ;;  %5405 = vmatprep.mubr.msk.f32.mxu0 %vm884_vm1, %v6399_v0 }
 0x3ca   : > { %5383 = vmatprep.subr.mxu0 %v4591_v33 }
 0x3cb   : > { %5384 = vmatpush3.msra.mxu0 %v4591_v33 }
 0x3cc   : > { %5385 = vmatprep.subr.mxu0 %v4590_v34 }
 0x3cd   : > { %5386 = vmatpush3.msra.mxu0 %v4590_v34  ;;  %v786_v34 = vld [vmem:[%s7647_s19 + $0x30] sm:$0xff] }
 0x3ce   : > { %5387 = vmatprep.subr.mxu0 %v4589_v35 }
 0x3cf   : > { %5388 = vmatpush3.msra.mxu0 %v4589_v35 }
 0x3d0   : > { %5389 = vmatprep.subr.mxu0 %v4588_v36 }
 0x3d1   : > { %5390 = vmatpush3.msra.mxu0 %v4588_v36 }
 0x3d2   : > { %5391 = vmatprep.subr.mxu0 %v4587_v37 }
 0x3d3   : > { %5392 = vmatpush3.msra.mxu0 %v4587_v37 }
 0x3d4   : > { %5393 = vmatprep.subr.mxu0 %v4586_v38 }
 0x3d5   : > { %5394 = vmatpush3.msra.mxu0 %v4586_v38 }
 0x3d6   : > { %5395 = vmatprep.subr.mxu0 %v4585_v39 }
 0x3d7   : > { %5396 = vmatpush3.msra.mxu0 %v4585_v39 }
 0x3d8   : > { %5397 = vmatprep.subr.mxu0 %v4584_v40 }
 0x3d9   : > { %5398 = vmatpush3.msra.mxu0 %v4584_v40 }
 0x3da   : > { %5399 = vmatprep.subr.mxu0 %v4583_v41 }
 0x3db   : > { %5400 = vmatpush3.msra.mxu0 %v4583_v41 }
 0x3dc   : > { %5401 = vmatprep.subr.mxu0 %v4582_v42 }
 0x3dd   : > { %5402 = vmatpush3.msra.mxu0 %v4582_v42 }
 0x3de   : > { %5403 = vmatprep.subr.mxu0 %v4581_v43 }
 0x3df   : > { %5404 = vmatpush3.msra.mxu0 %v4581_v43 }
 0x3e0   : > { %5406 = vmatmul.mubr.msk.f32.vlgmr.msra.gmra.mxu0 %vm884_vm1, %v6406_v3  ;;  %5442 = vmatprep.subr.msk.mxu0 %vm884_vm1, %v6406_v3 }
 0x3e1   : > { %5443 = vmatpush3.xpose.msk.msra.mxu0 %vm884_vm1, %v6406_v3 }
 0x3e2   : > { %5444 = vmatprep.subr.msk.mxu0 %vm884_vm1, %v6399_v0 }
 0x3e5   : > { %5445 = vmatpush3.xpose.msk.msra.mxu0 %vm884_vm1, %v6399_v0 }
 0x3e6   : > { %5449 = vmatprep.subr.mxu0 %v6481_v21 }
 0x439   : > { %v1706_v12 = vpop.xlane.xlu1 %1705 }
 0x43a   : > { %v1726_v16 = vsub.f32 %v6491_v26, %v1706_v12 }
 0x43b   : > { %v1703_v13 = vpop.xlane.xlu0 %1702 }
 0x43c   : > { %v1725_v18 = vsub.f32 %v6493_v28, %v1703_v13  ;;  %v1735_v20 = vmul.f32 1.442695, %v1726_v16  ;;  %v787_v28 = vld [vmem:[%s7647_s19 + $0x38] sm:$0xff] }
 0x43e   : > { %v1733_v25 = vmul.f32 1.442695, %v1725_v18  ;;  %6028 = vpow2.f32 %v1735_v20  ;;  %v1929_v18 = vld [vmem:[%s7679_s5 + $0x58] sm:$0xff] }
 0x43f   : > { %v4636_v20 = vld [vmem:[%s7679_s5 + $0xb8] sm:$0xff] }
 0x440   : > { %6030 = vpow2.f32 %v1733_v25  ;;  %v4634_v25 = vld [vmem:[%s7679_s5 + $0xa8] sm:$0xff] }
 0x44b   : > { %v6029_v39 = vpop.eup %6028 }
 0x44c   : > { %v1752_v42 = vsel %vm1700_vm2, %v6029_v39, 0.0 }
 0x44d   : > { %v6031_v41 = vpop.eup %6030 }
 0x488   : > { %v5380_v46 = vpop.f32.mrf.mxu0 }
 0x489   : > { %v6556_v48 = vadd.f32 %v5380_v46, %v783_v45 }
 0x48a   : > { %v1345_v49 = vpop.f32.mrf.mxu0 }
 0x48b   : > { %v6558_v50 = vadd.f32 %v1345_v49, %v782_v47  ;;  %v1710_v51 = vsel %vm1700_vm2, %v6556_v48, -inf }
 0x48c   : > { %1711 = vmax.xlane.f32.xlu1 %v1710_v51 }
 0x48d   : > { %v1707_v52 = vsel %vm1700_vm2, %v6558_v50, -inf }
 0x48e   : > { %1708 = vmax.xlane.f32.xlu0 %v1707_v52 }
 0x4a0   : > { %v5407_v53 = vpop.f32.mrf.mxu0 }
 0x4a2   : > { %v1433_v54 = vpop.f32.mrf.mxu0 }
 0x4a3   : > { %5412 = vmatprep.mubr.msk.f32.mxu1 %vm884_vm1, %v1433_v54 }
 0x4a4   : > { %5413 = vmatmul.mubr.msk.f32.vlgmr.msra.gmra.mxu1 %vm884_vm1, %v5407_v53 }
 0x4a5   : > { %5416 = vmatpush3.msra.mxu1 %v4610_v44  ;;  %5439 = vmatprep.mubr.msk.f32.mxu1 %vm884_vm1, %v6399_v0  ;;  %v4600_v0 = vld [vmem:[%s7676_s7 + $0x128] sm:$0xff]  ;;  %v1749_v44 = vsel %vm1700_vm2, %v6031_v41, 0.0 }
 0x4a6   : > { %5417 = vmatprep.subr.mxu1 %v4609_v55 }
 0x4a7   : > { %5418 = vmatpush3.msra.mxu1 %v4609_v55 }
 0x4a8   : > { %5419 = vmatprep.subr.mxu1 %v4608_v56 }
 0x4a9   : > { %5420 = vmatpush3.msra.mxu1 %v4608_v56 }
 0x4aa   : > { %5421 = vmatprep.subr.mxu1 %v4607_v57 }
 0x4ab   : > { %5422 = vmatpush3.msra.mxu1 %v4607_v57 }
 0x4ac   : > { %5423 = vmatprep.subr.mxu1 %v4606_v58 }
 0x4ad   : > { %5424 = vmatpush3.msra.mxu1 %v4606_v58 }
 0x4ae   : > { %5425 = vmatprep.subr.mxu1 %v4605_v59 }
 0x4af   : > { %5426 = vmatpush3.msra.mxu1 %v4605_v59 }
 0x4b0   : > { %5427 = vmatprep.subr.mxu1 %v4604_v60 }
 0x4b1   : > { %5428 = vmatpush3.msra.mxu1 %v4604_v60 }
 0x4b2   : > { %5429 = vmatprep.subr.mxu1 %v4603_v61 }
 0x4b3   : > { %5430 = vmatpush3.msra.mxu1 %v4603_v61 }
 0x4b4   : > { %5431 = vmatprep.subr.mxu1 %v4602_v62 }
 0x4b5   : > { %5432 = vmatpush3.msra.mxu1 %v4602_v62 }
 0x4b6   : > { %5433 = vmatprep.subr.mxu1 %v4601_v63 }
 0x4b7   : > { %5434 = vmatpush3.msra.mxu1 %v4601_v63 }
 0x4b8   : > { %5435 = vmatprep.subr.mxu1 %v4600_v0 }
 0x4b9   : > { %5436 = vmatpush3.msra.mxu1 %v4600_v0 }
 0x4ba   : > { %5437 = vmatprep.subr.mxu1 %v4599_v1 }
 0x4bb   : > { %5438 = vmatpush3.msra.mxu1 %v4599_v1 }
 0x4bc   : > { %5440 = vmatmul.mubr.msk.f32.vlgmr.msra.gmra.mxu1 %vm884_vm1, %v6406_v3  ;;  %5492 = vmatprep.subr.mxu1 %v1929_v18 }
 0x4bd   : > { %5493 = vmatpush3.msra.mxu1 %v1929_v18 }
 0x515   : > { %v1712_v17 = vpop.xlane.xlu1 %1711 }
 0x516   : > { %v1728_v23 = vsub.f32 %v6556_v48, %v1712_v17 }
 0x517   : > { %v1709_v19 = vpop.xlane.xlu0 %1708 }
 0x518   : > { %v1727_v27 = vsub.f32 %v6558_v50, %v1709_v19  ;;  %v1739_v29 = vmul.f32 1.442695, %v1728_v23  ;;  %v1928_v19 = vld [vmem:[%s7679_s5 + $0x50] sm:$0xff] }
 0x519   : > { %v4635_v23 = vld [vmem:[%s7679_s5 + $0xb0] sm:$0xff]  ;;  %5494 = vmatprep.subr.mxu1 %v1928_v19 }
 0x51a   : > { %6032 = vpow2.f32 %v1739_v29  ;;  %5495 = vmatpush3.msra.mxu1 %v1928_v19  ;;  %v1925_v29 = vld [vmem:[%s7679_s5 + $0x38] sm:$0xff] }
 0x527   : > { %v6033_v43 = vpop.eup %6032 }
 0x528   : > { %v1758_v46 = vsel %vm1700_vm2, %v6033_v43, 0.0 }
 0x564   : > { %v5414_v4 = vpop.f32.mrf.mxu1 }
 0x565   : > { %v1697_v6 = vadd.f32 %v5414_v4, %v785_v2 }
 0x566   : > { %v1514_v7 = vpop.f32.mrf.mxu1 }
 0x567   : > { %v1696_v8 = vadd.f32 %v1514_v7, %v784_v5  ;;  %v1716_v9 = vsel %vm1700_vm2, %v1697_v6, -inf }
 0x568   : > { %1717 = vmax.xlane.f32.xlu1 %v1716_v9 }
 0x569   : > { %v1713_v10 = vsel %vm1700_vm2, %v1696_v8, -inf }
 0x56a   : > { %1714 = vmax.xlane.f32.xlu0 %v1713_v10 }
 0x57c   : > { %v5441_v11 = vpop.f32.mrf.mxu1 }
 0x57e   : > { %v1602_v3 = vpop.f32.mrf.mxu1 }
 0x57f   : > { %5446 = vmatprep.mubr.msk.f32.mxu0 %vm884_vm1, %v1602_v3 }
 0x580   : > { %5447 = vmatmul.mubr.msk.f32.vlgmr.msra.gmra.mxu0 %vm884_vm1, %v5441_v11 }
 0x581   : > { %5450 = vmatpush3.msra.mxu0 %v6481_v21 }
 0x582   : > { %5451 = vmatprep.subr.mxu0 %v6483_v22 }
 0x583   : > { %5452 = vmatpush3.msra.mxu0 %v6483_v22  ;;  %v1737_v22 = vmul.f32 1.442695, %v1727_v27  ;;  %v1926_v27 = vld [vmem:[%s7679_s5 + $0x40] sm:$0xff] }
 0x584   : > { %5465 = vmatprep.subr.mxu0 %v4636_v20 }
 0x585   : > { %6034 = vpow2.f32 %v1737_v22  ;;  %v1924_v22 = vld [vmem:[%s7679_s5 + $0x30] sm:$0xff] }
 0x592   : > { %v6035_v45 = vpop.eup %6034 }
 0x593   : > { %v1755_v48 = vsel %vm1700_vm2, %v6035_v45, 0.0 }
 0x5f1   : > { %v1718_v24 = vpop.xlane.xlu1 %1717 }
 0x5f2   : > { %v1730_v30 = vsub.f32 %v1697_v6, %v1718_v24  ;;  %v1927_v24 = vld [vmem:[%s7679_s5 + $0x48] sm:$0xff] }
 0x5f3   : > { %v1715_v21 = vpop.xlane.xlu0 %1714  ;;  %5496 = vmatprep.subr.mxu1 %v1927_v24 }
 0x5f4   : > { %v1729_v31 = vsub.f32 %v1696_v8, %v1715_v21  ;;  %v1743_v26 = vmul.f32 1.442695, %v1730_v30  ;;  %v4633_v21 = vld [vmem:[%s7679_s5 + $0xa0] sm:$0xff]  ;;  %5497 = vmatpush3.msra.mxu1 %v1927_v24  ;;  %v4632_v30 = vld [vmem:[%s7679_s5 + $0x98] sm:$0xff] }
 0x5f5   : > { %5498 = vmatprep.subr.mxu1 %v1926_v27 }
 0x5f6   : > { %v1741_v32 = vmul.f32 1.442695, %v1729_v31  ;;  %6036 = vpow2.f32 %v1743_v26  ;;  %5499 = vmatpush3.msra.mxu1 %v1926_v27  ;;  %v4631_v31 = vld [vmem:[%s7679_s5 + $0x90] sm:$0xff]  ;;  %v1923_v26 = vld [vmem:[%s7679_s5 + $0x28] sm:$0xff] }
 0x5f7   : > { %5500 = vmatprep.subr.mxu1 %v1925_v29 }
 0x5f8   : > { %6038 = vpow2.f32 %v1741_v32  ;;  %5501 = vmatpush3.msra.mxu1 %v1925_v29  ;;  %v4630_v32 = vld [vmem:[%s7679_s5 + $0x88] sm:$0xff] }
 0x5f9   : > { %5502 = vmatprep.subr.mxu1 %v1924_v22 }
 0x5fa   : > { %5503 = vmatpush3.msra.mxu1 %v1924_v22 }
 0x5fb   : > { %5504 = vmatprep.subr.mxu1 %v1923_v26 }
 0x5fc   : > { %5505 = vmatpush3.msra.mxu1 %v1923_v26  ;;  %v4669_v26 = vld [vmem:[%s7636_s8] ss:$0 sm:$0xff] }
 0x603   : > { %v6037_v47 = vpop.eup %6036 }
 0x604   : > { %v1764_v50 = vsel %vm1700_vm2, %v6037_v47, 0.0 }
 0x605   : > { %v6039_v49 = vpop.eup %6038 }
 0x606   : > { %v1761_v51 = vsel %vm1700_vm2, %v6039_v49, 0.0 }
 0x640   : > { %v5448_v33 = vpop.f32.mrf.mxu0 }
 0x641   : > { %v1699_v35 = vadd.f32 %v5448_v33, %v787_v28  ;;  %v1922_v28 = vld [vmem:[%s7679_s5 + $0x20] sm:$0xff] }
 0x642   : > { %v1683_v36 = vpop.f32.mrf.mxu0  ;;  %v4629_v33 = vld [vmem:[%s7679_s5 + $0x80] sm:$0xff]  ;;  %5506 = vmatprep.subr.mxu1 %v1922_v28 }
 0x643   : > { %v1698_v37 = vadd.f32 %v1683_v36, %v786_v34  ;;  %v1722_v38 = vsel %vm1700_vm2, %v1699_v35, -inf  ;;  %v1921_v34 = vld [vmem:[%s7679_s5 + $0x18] sm:$0xff]  ;;  %5507 = vmatpush3.msra.mxu1 %v1922_v28  ;;  %v1920_v36 = vld [vmem:[%s7679_s5 + $0x10] sm:$0xff] }
 0x644   : > { %1723 = vmax.xlane.f32.xlu1 %v1722_v38  ;;  %5508 = vmatprep.subr.mxu1 %v1921_v34  ;;  %v4627_v38 = vld [vmem:[%s7679_s5 + $0x70] sm:$0xff] }
 0x645   : > { %v1719_v40 = vsel %vm1700_vm2, %v1698_v37, -inf  ;;  %5509 = vmatpush3.msra.mxu1 %v1921_v34 }
 0x646   : > { %1720 = vmax.xlane.f32.xlu0 %v1719_v40  ;;  %5510 = vmatprep.subr.mxu1 %v1920_v36  ;;  %v4626_v40 = vld [vmem:[%s7679_s5 + $0x68] sm:$0xff] }
 0x647   : > { %5511 = vmatpush3.msra.mxu1 %v1920_v36 }
 0x648   : > { %1753 = vadd.xlane.f32.xlu1 %v1752_v42  ;;  %v4652_v42 = vld [vmem:[%s7679_s5 + $0x118] sm:$0xff] }
 0x64a   : > { %1750 = vadd.xlane.f32.xlu0 %v1749_v44 }
 0x64c   : > { %1759 = vadd.xlane.f32.xlu1 %v1758_v46 }
 0x64e   : > { %1756 = vadd.xlane.f32.xlu0 %v1755_v48 }
 0x650   : > { %1765 = vadd.xlane.f32.xlu1 %v1764_v50 }
 0x652   : > { %1762 = vadd.xlane.f32.xlu0 %v1761_v51 }
 0x6cd   : > { %v1724_v52 = vpop.xlane.xlu1 %1723 }
 0x6ce   : > { %v1732_v53 = vsub.f32 %v1699_v35, %v1724_v52  ;;  %v4628_v35 = vld [vmem:[%s7679_s5 + $0x78] sm:$0xff]  ;;  %v4665_v52 = vld [vmem:[%s7679_s5 + $0x170] sm:$0xff] }
 0x6cf   : > { %v1721_v54 = vpop.xlane.xlu0 %1720 }
 0x6d0   : > { %v1747_v55 = vmul.f32 1.442695, %v1732_v53  ;;  %v1731_v56 = vsub.f32 %v1698_v37, %v1721_v54  ;;  %v1919_v37 = vld [vmem:[%s7679_s5 + $0x8] sm:$0xff] }
 0x6d1   : > { %v1754_v57 = vpop.xlane.xlu1 %1753  ;;  %5512 = vmatprep.subr.mxu1 %v1919_v37  ;;  %v4664_v54 = vld [vmem:[%s7679_s5 + $0x168] sm:$0xff] }
 0x6d2   : > { %6040 = vpow2.f32 %v1747_v55  ;;  %v1745_v58 = vmul.f32 1.442695, %v1731_v56  ;;  %5513 = vmatpush3.msra.mxu1 %v1919_v37  ;;  %v4651_v56 = vld [vmem:[%s7679_s5 + $0x110] sm:$0xff] }
 0x6d3   : > { %6042 = vrcp.f32 %v1754_v57  ;;  %v1751_v59 = vpop.xlane.xlu0 %1750  ;;  %v4663_v57 = vld [vmem:[%s7679_s5 + $0x160] sm:$0xff] }
 0x6d4   : > { %6044 = vpow2.f32 %v1745_v58 }
 0x6d5   : > { %6046 = vrcp.f32 %v1751_v59  ;;  %v1760_v60 = vpop.xlane.xlu1 %1759  ;;  %v4650_v59 = vld [vmem:[%s7679_s5 + $0x108] sm:$0xff] }
 0x6d6   : > { %6048 = vrcp.f32 %v1760_v60 }
 0x6d7   : > { %v1757_v61 = vpop.xlane.xlu0 %1756 }
 0x6d8   : > { %6050 = vrcp.f32 %v1757_v61  ;;  %v4662_v61 = vld [vmem:[%s7679_s5 + $0x158] sm:$0xff] }
 0x6d9   : > { %v1766_v62 = vpop.xlane.xlu1 %1765 }
 0x6da   : > { %6052 = vrcp.f32 %v1766_v62  ;;  %v4649_v62 = vld [vmem:[%s7679_s5 + $0x100] sm:$0xff] }
 0x6db   : > { %v1763_v63 = vpop.xlane.xlu0 %1762 }
 0x6dc   : > { %6054 = vrcp.f32 %v1763_v63  ;;  %v4661_v63 = vld [vmem:[%s7679_s5 + $0x150] sm:$0xff] }
 0x6df   : > { %v6634_v0 = vpop.eup %6040 }
 0x6e0   : > { %v6043_v1 = vpop.eup %6042  ;;  %v1770_v2 = vsel %vm1700_vm2, %v6634_v0, 0.0 }
 0x6e1   : > { %v6638_v4 = vpop.eup %6044  ;;  %1771 = vadd.xlane.f32.xlu1 %v1770_v2  ;;  %v1782_v9 = vmul.f32 %v6043_v1, %v6029_v39  ;;  %v1918_v39 = vld [vmem:[%s7679_s5] sm:$0xff]  ;;  %v4660_v1 = vld [vmem:[%s7679_s5 + $0x148] sm:$0xff]  ;;  %v4647_v2 = vld [vmem:[%s7679_s5 + $0xf0] sm:$0xff] }
 0x6e2   : > { %v6047_v5 = vpop.eup %6046  ;;  %v1767_v6 = vsel %vm1700_vm2, %v6638_v4, 0.0  ;;  %5514 = vmatprep.subr.mxu1 %v1918_v39 }
 0x6e3   : > { %1768 = vadd.xlane.f32.xlu0 %v1767_v6  ;;  %v1781_v7 = vmul.f32 %v6047_v5, %v6031_v41  ;;  %v6049_v8 = vpop.eup %6048  ;;  %5515 = vmatpush3.msra.mxu1 %v1918_v39  ;;  %v4625_v41 = vld [vmem:[%s7679_s5 + $0x60] sm:$0xff]  ;;  %v4646_v5 = vld [vmem:[%s7679_s5 + $0xe8] sm:$0xff]  ;;  %v4658_v6 = vld [vmem:[%s7679_s5 + $0x138] sm:$0xff] }
 0x6e4   : > { %v1784_v12 = vmul.f32 %v6049_v8, %v6033_v43  ;;  %v4666_v43 = vld [vmem:[%s7679_s5 + $0x178] sm:$0xff]  ;;  %v4657_v8 = vld [vmem:[%s7679_s5 + $0x130] sm:$0xff] }
 0x6e5   : > { %v6051_v10 = vpop.eup %6050  ;;  %5453 = vmatprep.mubr.msk.f32.mxu0 %vm1700_vm2, %v1781_v7  ;;  %5546 = vmatprep.subr.mxu1 %v4666_v43  ;;  %v4645_v7 = vld [vmem:[%s7679_s5 + $0xe0] sm:$0xff] }
 0x6e6   : > { %5454 = vmatmul.mubr.msk.f32.vlgmr.msra.gmra.mxu0 %vm1700_vm2, %v1782_v9  ;;  %v1783_v11 = vmul.f32 %v6051_v10, %v6035_v45  ;;  %v4644_v9 = vld [vmem:[%s7679_s5 + $0xd8] sm:$0xff]  ;;  %v4643_v10 = vld [vmem:[%s7679_s5 + $0xd0] sm:$0xff] }
 0x6e7   : > { %v6053_v3 = vpop.eup %6052  ;;  %5466 = vmatpush3.msra.mxu0 %v4636_v20 }
 0x6e8   : > { %5456 = vmatprep.mubr.msk.f32.mxu0 %vm1700_vm2, %v1783_v11  ;;  %v1786_v17 = vmul.f32 %v6053_v3, %v6037_v47  ;;  %5467 = vmatprep.subr.mxu0 %v4635_v23  ;;  %v4656_v11 = vld [vmem:[%s7679_s5 + $0x128] sm:$0xff] }
 0x6e9   : > { %v6055_v13 = vpop.eup %6054  ;;  %5468 = vmatpush3.msra.mxu0 %v4635_v23  ;;  %v4642_v3 = vld [vmem:[%s7679_s5 + $0xc8] sm:$0xff] }
 0x6ea   : > { %5457 = vmatmul.mubr.msk.f32.gmra.mxu0 %vm1700_vm2, %v1784_v12  ;;  %v1785_v16 = vmul.f32 %v6055_v13, %v6039_v49  ;;  %5469 = vmatprep.subr.mxu0 %v4634_v25  ;;  %v4655_v12 = vld [vmem:[%s7679_s5 + $0x120] sm:$0xff] }
 0x6eb   : > { %5470 = vmatpush3.msra.mxu0 %v4634_v25  ;;  %v4641_v13 = vld [vmem:[%s7679_s5 + $0xc0] sm:$0xff] }
 0x6ec   : > { %5459 = vmatprep.mubr.msk.f32.mxu0 %vm1700_vm2, %v1785_v16  ;;  %5471 = vmatprep.subr.mxu0 %v4633_v21 }
 0x6ed   : > { %5472 = vmatpush3.msra.mxu0 %v4633_v21 }
 0x6ee   : > { %5460 = vmatmul.mubr.msk.f32.gmra.mxu0 %vm1700_vm2, %v1786_v17  ;;  %5473 = vmatprep.subr.mxu0 %v4632_v30 }
 0x6ef   : > { %5474 = vmatpush3.msra.mxu0 %v4632_v30 }
 0x6f0   : > { %5475 = vmatprep.subr.mxu0 %v4631_v31 }
 0x6f1   : > { %5476 = vmatpush3.msra.mxu0 %v4631_v31 }
 0x6f2   : > { %5477 = vmatprep.subr.mxu0 %v4630_v32 }
 0x6f3   : > { %5478 = vmatpush3.msra.mxu0 %v4630_v32 }
 0x6f4   : > { %5479 = vmatprep.subr.mxu0 %v4629_v33 }
 0x6f5   : > { %5480 = vmatpush3.msra.mxu0 %v4629_v33 }
 0x6f6   : > { %5481 = vmatprep.subr.mxu0 %v4628_v35 }
 0x6f7   : > { %5482 = vmatpush3.msra.mxu0 %v4628_v35 }
 0x6f8   : > { %5483 = vmatprep.subr.mxu0 %v4627_v38 }
 0x6f9   : > { %5484 = vmatpush3.msra.mxu0 %v4627_v38 }
 0x6fa   : > { %5485 = vmatprep.subr.mxu0 %v4626_v40 }
 0x6fb   : > { %5486 = vmatpush3.msra.mxu0 %v4626_v40 }
 0x6fc   : > { %5487 = vmatprep.subr.mxu0 %v4625_v41 }
 0x6fd   : > { %5488 = vmatpush3.msra.mxu0 %v4625_v41 }
 0x6fe   : > { %5519 = vmatprep.subr.mxu0 %v4652_v42 }
 0x76a   : > { %v1772_v44 = vpop.xlane.xlu1 %1771 }
 0x76b   : > { %6056 = vrcp.f32 %v1772_v44 }
 0x76c   : > { %v1769_v45 = vpop.xlane.xlu0 %1768 }
 0x76d   : > { %6058 = vrcp.f32 %v1769_v45 }
 0x778   : > { %v6057_v46 = vpop.eup %6056 }
 0x779   : > { %v1788_v49 = vmul.f32 %v6057_v46, %v6634_v0  ;;  %v4648_v0 = vld [vmem:[%s7679_s5 + $0xf8] sm:$0xff] }
 0x77a   : > { %v6059_v47 = vpop.eup %6058 }
 0x77b   : > { %v1787_v48 = vmul.f32 %v6059_v47, %v6638_v4  ;;  %v4659_v4 = vld [vmem:[%s7679_s5 + $0x140] sm:$0xff]  ;;  %v2357_v47 = vld [vmem:[%s7639_s11 + $0x58] sm:$0xff] }
 0x77d   : > { %5462 = vmatprep.mubr.msk.f32.mxu0 %vm1700_vm2, %v1787_v48  ;;  %v2356_v48 = vld [vmem:[%s7639_s11 + $0x50] sm:$0xff] }
 0x77e   : > { %5463 = vmatmul.mubr.msk.f32.gmra.mxu0 %vm1700_vm2, %v1788_v49  ;;  %v2355_v49 = vld [vmem:[%s7639_s11 + $0x48] sm:$0xff] }
 0x7a6   : > { %v5455_v50 = vpop.f32.mrf.mxu0 }
 0x7a8   : > { %v1879_v51 = vpop.f32.mrf.mxu0 }
 0x7a9   : > { %5516 = vmatprep.mubr.msk.f32.mxu1 %vm884_vm1, %v1879_v51  ;;  %v2353_v51 = vld [vmem:[%s7639_s11 + $0x38] sm:$0xff] }
 0x7aa   : > { %v5458_v53 = vpop.f32.mrf.mxu0  ;;  %5517 = vmatmul.mubr.msk.f32.vlgmr.msra.gmra.mxu1 %vm884_vm1, %v5455_v50  ;;  %v2354_v50 = vld [vmem:[%s7639_s11 + $0x40] sm:$0xff] }
 0x7ab   : > { %5547 = vmatpush3.msra.mxu1 %v4666_v43 }
 0x7ac   : > { %v1889_v55 = vpop.f32.mrf.mxu0  ;;  %5548 = vmatprep.subr.mxu1 %v4665_v52 }
 0x7ad   : > { %5489 = vmatprep.mubr.msk.f32.mxu0 %vm884_vm1, %v1889_v55  ;;  %5549 = vmatpush3.msra.mxu1 %v4665_v52  ;;  %v2352_v52 = vld [vmem:[%s7639_s11 + $0x30] sm:$0xff]  ;;  %v2349_v55 = vld [vmem:[%s7639_s11 + $0x18] sm:$0xff] }
 0x7ae   : > { %v6745_v58 = vpop.f32.mrf.mxu0  ;;  %5490 = vmatmul.mubr.msk.f32.vlgmr.msra.gmra.mxu0 %vm884_vm1, %v5458_v53  ;;  %5550 = vmatprep.subr.mxu1 %v4664_v54  ;;  %v2351_v53 = vld [vmem:[%s7639_s11 + $0x28] sm:$0xff] }
 0x7af   : > { %5520 = vmatpush3.msra.mxu0 %v4652_v42  ;;  %5551 = vmatpush3.msra.mxu1 %v4664_v54  ;;  %v2350_v54 = vld [vmem:[%s7639_s11 + $0x20] sm:$0xff] }
 0x7b0   : > { %5521 = vmatprep.subr.mxu0 %v4651_v56  ;;  %v1899_v60 = vpop.f32.mrf.mxu0  ;;  %5552 = vmatprep.subr.mxu1 %v4663_v57 }
 0x7b1   : > { %5522 = vmatpush3.msra.mxu0 %v4651_v56  ;;  %5543 = vmatprep.mubr.msk.f32.mxu0 %vm884_vm1, %v1899_v60  ;;  %v2348_v56 = vld [vmem:[%s7639_s11 + $0x10] sm:$0xff] }
 0x7b2   : > { %5523 = vmatprep.subr.mxu0 %v4650_v59  ;;  %5553 = vmatpush3.msra.mxu1 %v4663_v57  ;;  %v2347_v57 = vld [vmem:[%s7639_s11 + $0x8] sm:$0xff] }
 0x7b3   : > { %5524 = vmatpush3.msra.mxu0 %v4650_v59  ;;  %5554 = vmatprep.subr.mxu1 %v4662_v61 }
 0x7b4   : > { %5525 = vmatprep.subr.mxu0 %v4649_v62  ;;  %5555 = vmatpush3.msra.mxu1 %v4662_v61 }
 0x7b5   : > { %5526 = vmatpush3.msra.mxu0 %v4649_v62  ;;  %5556 = vmatprep.subr.mxu1 %v4661_v63 }
 0x7b6   : > { %5527 = vmatprep.subr.mxu0 %v4648_v0  ;;  %5557 = vmatpush3.msra.mxu1 %v4661_v63 }
 0x7b7   : > { %5528 = vmatpush3.msra.mxu0 %v4648_v0  ;;  %5558 = vmatprep.subr.mxu1 %v4660_v1 }
 0x7b8   : > { %5529 = vmatprep.subr.mxu0 %v4647_v2  ;;  %5559 = vmatpush3.msra.mxu1 %v4660_v1 }
 0x7b9   : > { %5530 = vmatpush3.msra.mxu0 %v4647_v2  ;;  %5560 = vmatprep.subr.mxu1 %v4659_v4  ;;  %v4670_v2 = vld [vmem:[%s7637_s9] ss:$0 sm:$0xff] }
 0x7ba   : > { %5531 = vmatprep.subr.mxu0 %v4646_v5  ;;  %5561 = vmatpush3.msra.mxu1 %v4659_v4 }
 0x7bb   : > { %5532 = vmatpush3.msra.mxu0 %v4646_v5  ;;  %5562 = vmatprep.subr.mxu1 %v4658_v6 }
 0x7bc   : > { %5533 = vmatprep.subr.mxu0 %v4645_v7  ;;  %5563 = vmatpush3.msra.mxu1 %v4658_v6 }
 0x7bd   : > { %5534 = vmatpush3.msra.mxu0 %v4645_v7  ;;  %5564 = vmatprep.subr.mxu1 %v4657_v8 }
 0x7be   : > { %5535 = vmatprep.subr.mxu0 %v4644_v9  ;;  %5565 = vmatpush3.msra.mxu1 %v4657_v8  ;;  %v4671_v8 = vld [vmem:[%s7638_s10] ss:$0 sm:$0xff] }
 0x7bf   : > { %5536 = vmatpush3.msra.mxu0 %v4644_v9  ;;  %5566 = vmatprep.subr.mxu1 %v4656_v11 }
 0x7c0   : > { %5537 = vmatprep.subr.mxu0 %v4643_v10  ;;  %5567 = vmatpush3.msra.mxu1 %v4656_v11 }
 0x7c1   : > { %5538 = vmatpush3.msra.mxu0 %v4643_v10  ;;  %5568 = vmatprep.subr.mxu1 %v4655_v12 }
 0x7c2   : > { %5539 = vmatprep.subr.mxu0 %v4642_v3  ;;  %5569 = vmatpush3.msra.mxu1 %v4655_v12  ;;  %v2476_v12 = vld [vmem:[%s7641_s13 + $0x70] sm:$0xff] }
 0x7c3   : > { %5540 = vmatpush3.msra.mxu0 %v4642_v3  ;;  %v2477_v3 = vld [vmem:[%s7641_s13 + $0x78] sm:$0xff] }
 0x7c4   : > { %5541 = vmatprep.subr.mxu0 %v4641_v13  ;;  %5600 = vmatprep.subr.mxu1 %v2477_v3 }
 0x7c5   : > { %5542 = vmatpush3.msra.mxu0 %v4641_v13  ;;  %v2475_v13 = vld [vmem:[%s7641_s13 + $0x68] sm:$0xff] }
 0x7c6   : > { %5544 = vmatmul.mubr.msk.f32.vlgmr.msra.gmra.mxu0 %vm884_vm1, %v6745_v58  ;;  %5573 = vmatprep.subr.mxu0 %v2357_v47  ;;  %v2346_v58 = vld [vmem:[%s7639_s11] sm:$0xff] }
 0x7c7   : > { %5574 = vmatpush3.msra.mxu0 %v2357_v47 }
 0x7c8   : > { %5575 = vmatprep.subr.mxu0 %v2356_v48 }
 0x7c9   : > { %5576 = vmatpush3.msra.mxu0 %v2356_v48 }
 0x7ca   : > { %5577 = vmatprep.subr.mxu0 %v2355_v49 }
 0x7cb   : > { %5578 = vmatpush3.msra.mxu0 %v2355_v49 }
 0x7cc   : > { %5579 = vmatprep.subr.mxu0 %v2354_v50 }
 0x7cd   : > { %5580 = vmatpush3.msra.mxu0 %v2354_v50 }
 0x7ce   : > { %5581 = vmatprep.subr.mxu0 %v2353_v51 }
 0x7cf   : > { %5582 = vmatpush3.msra.mxu0 %v2353_v51 }
 0x7d0   : > { %5583 = vmatprep.subr.mxu0 %v2352_v52 }
 0x7d1   : > { %5584 = vmatpush3.msra.mxu0 %v2352_v52  ;;  %v4675_v52 = vld [vmem:[%s7642_s14] ss:$0 sm:$0xff] }
 0x7d2   : > { %5585 = vmatprep.subr.mxu0 %v2351_v53 }
 0x7d3   : > { %5586 = vmatpush3.msra.mxu0 %v2351_v53 }
 0x7d4   : > { %5587 = vmatprep.subr.mxu0 %v2350_v54 }
 0x7d5   : > { %5588 = vmatpush3.msra.mxu0 %v2350_v54 }
 0x7d6   : > { %5589 = vmatprep.subr.mxu0 %v2349_v55 }
 0x7d7   : > { %5590 = vmatpush3.msra.mxu0 %v2349_v55 }
 0x7d8   : > { %5591 = vmatprep.subr.mxu0 %v2348_v56 }
 0x7d9   : > { %5592 = vmatpush3.msra.mxu0 %v2348_v56 }
 0x7da   : > { %5593 = vmatprep.subr.mxu0 %v2347_v57 }
 0x7db   : > { %5594 = vmatpush3.msra.mxu0 %v2347_v57 }
 0x7dc   : > { %5595 = vmatprep.subr.mxu0 %v2346_v58 }
 0x7dd   : > { %5596 = vmatpush3.msra.mxu0 %v2346_v58 }
 0x83e   : > { %v5464_v16 = vpop.f32.mrf.mxu0 }
 0x840   : > { %v1909_v17 = vpop.f32.mrf.mxu0 }
 0x841   : > { %5570 = vmatprep.mubr.msk.f32.mxu1 %vm884_vm1, %v1909_v17  ;;  %v2473_v17 = vld [vmem:[%s7641_s13 + $0x58] sm:$0xff] }
 0x842   : > { %5571 = vmatmul.mubr.msk.f32.vlgmr.msra.gmra.mxu1 %vm884_vm1, %v5464_v16  ;;  %v2474_v16 = vld [vmem:[%s7641_s13 + $0x60] sm:$0xff] }
 0x843   : > { %5601 = vmatpush3.msra.mxu1 %v2477_v3  ;;  %v4686_v3 = vld [vmem:[%s7675_s2 + $0xa0] sm:$0xff] }
 0x844   : > { %5602 = vmatprep.subr.mxu1 %v2476_v12 }
 0x845   : > { %5603 = vmatpush3.msra.mxu1 %v2476_v12  ;;  %v4700_v12 = vld [vmem:[%s7676_s7 + $0x1c0] sm:$0xff] }
 0x846   : > { %5604 = vmatprep.subr.mxu1 %v2475_v13 }
 0x847   : > { %5605 = vmatpush3.msra.mxu1 %v2475_v13  ;;  %v4685_v13 = vld [vmem:[%s7675_s2 + $0x98] sm:$0xff] }
 0x848   : > { %5606 = vmatprep.subr.mxu1 %v2474_v16 }
 0x849   : > { %5607 = vmatpush3.msra.mxu1 %v2474_v16  ;;  %v4699_v16 = vld [vmem:[%s7676_s7 + $0x1b8] sm:$0xff] }
 0x84a   : > { %5608 = vmatprep.subr.mxu1 %v2473_v17 }
 0x84b   : > { %5609 = vmatpush3.msra.mxu1 %v2473_v17  ;;  %v4684_v17 = vld [vmem:[%s7675_s2 + $0x90] sm:$0xff] }
 0x86a   : > { %v5518_v20 = vpop.f32.mrf.mxu1 }
 0x86c   : > { %v2096_v25 = vpop.f32.mrf.mxu1 }
 0x86e   : > { %v5491_v18 = vpop.f32.mrf.mxu0 }
 0x86f   : > { %v2102_v24 = vadd.f32 %v5518_v20, %v5491_v18  ;;  %v2472_v18 = vld [vmem:[%s7641_s13 + $0x50] sm:$0xff]  ;;  %v2470_v20 = vld [vmem:[%s7641_s13 + $0x40] sm:$0xff] }
 0x870   : > { %v2015_v19 = vpop.f32.mrf.mxu0  ;;  %5610 = vmatprep.subr.mxu1 %v2472_v18 }
 0x871   : > { %v2097_v21 = vadd.f32 %v2096_v25, %v2015_v19  ;;  %v2471_v19 = vld [vmem:[%s7641_s13 + $0x48] sm:$0xff]  ;;  %5611 = vmatpush3.msra.mxu1 %v2472_v18  ;;  %v4698_v18 = vld [vmem:[%s7676_s7 + $0x1b0] sm:$0xff] }
 0x872   : > { %5612 = vmatprep.subr.mxu1 %v2471_v19  ;;  %v2467_v25 = vld [vmem:[%s7641_s13 + $0x28] sm:$0xff] }
 0x873   : > { %5613 = vmatpush3.msra.mxu1 %v2471_v19  ;;  %v4683_v19 = vld [vmem:[%s7675_s2 + $0x88] sm:$0xff] }
 0x874   : > { %5614 = vmatprep.subr.mxu1 %v2470_v20 }
 0x875   : > { %5615 = vmatpush3.msra.mxu1 %v2470_v20  ;;  %v4697_v20 = vld [vmem:[%s7676_s7 + $0x1a8] sm:$0xff] }
 0x886   : > { %v5545_v23 = vpop.f32.mrf.mxu0 }
 0x887   : > { %v2200_v29 = vadd.f32 %v5545_v23, %v2102_v24  ;;  %v2469_v23 = vld [vmem:[%s7641_s13 + $0x38] sm:$0xff]  ;;  %v2468_v24 = vld [vmem:[%s7641_s13 + $0x30] sm:$0xff] }
 0x888   : > { %v2190_v27 = vpop.f32.mrf.mxu0  ;;  %5616 = vmatprep.subr.mxu1 %v2469_v23 }
 0x889   : > { %v2199_v22 = vadd.f32 %v2190_v27, %v2097_v21  ;;  %5617 = vmatpush3.msra.mxu1 %v2469_v23  ;;  %v2466_v27 = vld [vmem:[%s7641_s13 + $0x20] sm:$0xff]  ;;  %v2465_v21 = vld [vmem:[%s7641_s13 + $0x18] sm:$0xff] }
 0x88a   : > { %5618 = vmatprep.subr.mxu1 %v2468_v24  ;;  %v4682_v23 = vld [vmem:[%s7675_s2 + $0x80] sm:$0xff] }
 0x88b   : > { %5619 = vmatpush3.msra.mxu1 %v2468_v24  ;;  %v4696_v24 = vld [vmem:[%s7676_s7 + $0x1a0] sm:$0xff] }
 0x88c   : > { %5620 = vmatprep.subr.mxu1 %v2467_v25 }
 0x88d   : > { %5621 = vmatpush3.msra.mxu1 %v2467_v25  ;;  %v4681_v25 = vld [vmem:[%s7675_s2 + $0x78] sm:$0xff] }
 0x88e   : > { %5622 = vmatprep.subr.mxu1 %v2466_v27 }
 0x88f   : > { %5623 = vmatpush3.msra.mxu1 %v2466_v27  ;;  %v4695_v27 = vld [vmem:[%s7676_s7 + $0x198] sm:$0xff] }
 0x890   : > { %5624 = vmatprep.subr.mxu1 %v2465_v21 }
 0x891   : > { %5625 = vmatpush3.msra.mxu1 %v2465_v21  ;;  %v4680_v21 = vld [vmem:[%s7675_s2 + $0x70] sm:$0xff] }
 0x902   : > { %v5572_v30 = vpop.f32.mrf.mxu1 }
 0x903   : > { %v2296_v31 = vadd.f32 %v5572_v30, %v2200_v29  ;;  %v2464_v29 = vld [vmem:[%s7641_s13 + $0x10] sm:$0xff]  ;;  %v2463_v30 = vld [vmem:[%s7641_s13 + $0x8] sm:$0xff] }
 0x904   : > { %v2286_v32 = vpop.f32.mrf.mxu1  ;;  %5626 = vmatprep.subr.mxu1 %v2464_v29 }
 0x905   : > { %v2298_v28 = vadd.f32 %v2296_v31, %v6302_v15  ;;  %v2295_v33 = vadd.f32 %v2286_v32, %v2199_v22  ;;  %5627 = vmatpush3.msra.mxu1 %v2464_v29  ;;  %v2462_v22 = vld [vmem:[%s7641_s13] sm:$0xff]  ;;  %v4694_v29 = vld [vmem:[%s7676_s7 + $0x190] sm:$0xff] }
 0x906   : > { %5628 = vmatprep.subr.mxu1 %v2463_v30  ;;  %v4672_v31 = vld [vmem:[%s7640_s12] ss:$0 sm:$0xff] }
 0x907   : > { %v6811_v34 = vadd.f32 %v4669_v26, %v2298_v28  ;;  %v2297_v35 = vadd.f32 %v2295_v33, %v6300_v14  ;;  %5629 = vmatpush3.msra.mxu1 %v2463_v30  ;;  %v4679_v30 = vld [vmem:[%s7675_s2 + $0x68] sm:$0xff] }
 0x908   : > { %5630 = vmatprep.subr.mxu1 %v2462_v22 }
 0x909   : > { %v6814_v36 = vadd.f32 %v4669_v26, %v2297_v35  ;;  %v2311_v37 = vsel %vm884_vm1, %v6811_v34, 0.0  ;;  %5631 = vmatpush3.msra.mxu1 %v2462_v22  ;;  %v4693_v22 = vld [vmem:[%s7676_s7 + $0x188] sm:$0xff] }
 0x90a   : > { %2312 = vadd.xlane.f32.xlu1 %v2311_v37 }
 0x90b   : > { %v2308_v38 = vsel %vm884_vm1, %v6814_v36, 0.0 }
 0x90c   : > { %2309 = vadd.xlane.f32.xlu0 %v2308_v38 }
 0x993   : > { %v2313_v39 = vpop.xlane.xlu1 %2312 }
 0x994   : > { %v2315_v40 = vmul.f32 0.010416667, %v2313_v39 }
 0x995   : > { %v2310_v41 = vpop.xlane.xlu0 %2309 }
 0x996   : > { %v2317_v15 = vsub.f32 %v6811_v34, %v2315_v40  ;;  %v2314_v42 = vmul.f32 0.010416667, %v2310_v41 }
 0x998   : > { %v2316_v43 = vsub.f32 %v6814_v36, %v2314_v42  ;;  %v2319_v44 = vmul.f32 %v2317_v15, %v2317_v15 }
 0x99a   : > { %v2323_v14 = vsel %vm884_vm1, %v2319_v44, 0.0  ;;  %v2318_v45 = vmul.f32 %v2316_v43, %v2316_v43 }
 0x99b   : > { %2324 = vadd.xlane.f32.xlu1 %v2323_v14 }
 0x99c   : > { %v2320_v46 = vsel %vm884_vm1, %v2318_v45, 0.0 }
 0x99d   : > { %2321 = vadd.xlane.f32.xlu0 %v2320_v46 }
 0xa24   : > { %v2325_v59 = vpop.xlane.xlu1 %2324 }
 0xa25   : > { %v2327_v60 = vmul.f32 0.010416667, %v2325_v59 }
 0xa26   : > { %v2322_v61 = vpop.xlane.xlu0 %2321 }
 0xa27   : > { %v2329_v62 = vadd.f32 1e-05, %v2327_v60  ;;  %v2326_v63 = vmul.f32 0.010416667, %v2322_v61 }
 0xa29   : > { %6060 = vrsqrt.f32 %v2329_v62  ;;  %v2328_v0 = vadd.f32 1e-05, %v2326_v63 }
 0xa2b   : > { %6062 = vrsqrt.f32 %v2328_v0 }
 0xa36   : > { %v6061_v1 = vpop.eup %6060 }
 0xa37   : > { %v2333_v4 = vmul.f32 %v6061_v1, %v2317_v15 }
 0xa38   : > { %v6063_v5 = vpop.eup %6062 }
 0xa39   : > { %v2332_v6 = vmul.f32 %v6063_v5, %v2316_v43  ;;  %v2339_v7 = vmul.f32 %v4670_v2, %v2333_v4 }
 0xa3b   : > { %v2338_v9 = vmul.f32 %v4670_v2, %v2332_v6  ;;  %v2345_v11 = vadd.f32 %v4671_v8, %v2339_v7  ;;  %v4689_v6 = vld [vmem:[%s7675_s2 + $0xb8] sm:$0xff] }
 0xa3c   : > { %v4703_v7 = vld [vmem:[%s7676_s7 + $0x1d8] sm:$0xff]  ;;  %5635 = vmatprep.subr.mxu0 %v4689_v6 }
 0xa3d   : > { %v2344_v10 = vadd.f32 %v4671_v8, %v2338_v9  ;;  %5662 = vmatprep.subr.mxu1 %v4703_v7  ;;  %v4688_v8 = vld [vmem:[%s7675_s2 + $0xb0] sm:$0xff] }
 0xa3e   : > { %v4702_v9 = vld [vmem:[%s7676_s7 + $0x1d0] sm:$0xff] }
 0xa3f   : > { %5597 = vmatprep.mubr.msk.f32.mxu0 %vm884_vm1, %v2344_v10  ;;  %v4687_v10 = vld [vmem:[%s7675_s2 + $0xa8] sm:$0xff] }
 0xa40   : > { %5598 = vmatmul.mubr.msk.f32.vlgmr.msra.gmra.mxu0 %vm884_vm1, %v2345_v11  ;;  %v4701_v11 = vld [vmem:[%s7676_s7 + $0x1c8] sm:$0xff] }
 0xa41   : > { %5636 = vmatpush3.msra.mxu0 %v4689_v6 }
 0xa42   : > { %5637 = vmatprep.subr.mxu0 %v4688_v8 }
 0xa43   : > { %5638 = vmatpush3.msra.mxu0 %v4688_v8 }
 0xa44   : > { %5639 = vmatprep.subr.mxu0 %v4687_v10 }
 0xa45   : > { %5640 = vmatpush3.msra.mxu0 %v4687_v10 }
 0xa46   : > { %5641 = vmatprep.subr.mxu0 %v4686_v3 }
 0xa47   : > { %5642 = vmatpush3.msra.mxu0 %v4686_v3  ;;  %v4737_v3 = vld [vmem:[%s7676_s7 + $0x288] sm:$0xff] }
 0xa48   : > { %5643 = vmatprep.subr.mxu0 %v4685_v13 }
 0xa49   : > { %5644 = vmatpush3.msra.mxu0 %v4685_v13  ;;  %v4735_v13 = vld [vmem:[%s7676_s7 + $0x278] sm:$0xff] }
 0xa4a   : > { %5645 = vmatprep.subr.mxu0 %v4684_v17 }
 0xa4b   : > { %5646 = vmatpush3.msra.mxu0 %v4684_v17  ;;  %v4733_v17 = vld [vmem:[%s7676_s7 + $0x268] sm:$0xff] }
 0xa4c   : > { %5647 = vmatprep.subr.mxu0 %v4683_v19 }
 0xa4d   : > { %5648 = vmatpush3.msra.mxu0 %v4683_v19  ;;  %v4731_v19 = vld [vmem:[%s7676_s7 + $0x258] sm:$0xff] }
 0xa4e   : > { %5649 = vmatprep.subr.mxu0 %v4682_v23 }
 0xa4f   : > { %5650 = vmatpush3.msra.mxu0 %v4682_v23  ;;  %v4729_v23 = vld [vmem:[%s7676_s7 + $0x248] sm:$0xff] }
 0xa50   : > { %5651 = vmatprep.subr.mxu0 %v4681_v25 }
 0xa51   : > { %5652 = vmatpush3.msra.mxu0 %v4681_v25  ;;  %v4757_v25 = vld [vmem:[%s7676_s7 + $0x2f8] sm:$0xff] }
 0xa52   : > { %5653 = vmatprep.subr.mxu0 %v4680_v21 }
 0xa53   : > { %5654 = vmatpush3.msra.mxu0 %v4680_v21  ;;  %v6118_v21 = vld [vmem:[%s7647_s19 + $0x18] sm:$0xff] }
 0xa54   : > { %5655 = vmatprep.subr.mxu0 %v4679_v30 }
 0xa55   : > { %5656 = vmatpush3.msra.mxu0 %v4679_v30 }
 0xb00   : > { %v5599_v26 = vpop.f32.mrf.mxu0 }
 0xb01   : > { %v2441_v32 = vadd.f32 %v5599_v26, %v4672_v31  ;;  %v4692_v26 = vld [vmem:[%s7676_s7 + $0x180] sm:$0xff] }
 0xb02   : > { %v2435_v28 = vpop.f32.mrf.mxu0 }
 0xb03   : > { %v2445_v33 = vmul.f32 %v2441_v32, %v2441_v32  ;;  %v2436_v35 = vadd.f32 %v4672_v31, %v2435_v28  ;;  %v4678_v31 = vld [vmem:[%s7675_s2 + $0x60] sm:$0xff] }
 0xb04   : > { %5657 = vmatprep.subr.mxu0 %v4678_v31 }
 0xb05   : > { %v2447_v37 = vmul.f32 %v2445_v33, %v2441_v32  ;;  %v2444_v38 = vmul.f32 %v2436_v35, %v2436_v35  ;;  %5658 = vmatpush3.msra.mxu0 %v4678_v31 }
 0xb07   : > { %v2449_v39 = vmul.f32 0.044715, %v2447_v37  ;;  %v2446_v40 = vmul.f32 %v2444_v38, %v2436_v35 }
 0xb09   : > { %v2451_v41 = vadd.f32 %v2449_v39, %v2441_v32  ;;  %v2448_v15 = vmul.f32 0.044715, %v2446_v40  ;;  %v4676_v40 = vld [vmem:[%s7677_s3 + $0x1] ss:$0 sm:$0xff] }
 0xb0b   : > { %v2453_v42 = vmul.f32 0.7978846, %v2451_v41  ;;  %v2450_v43 = vadd.f32 %v2448_v15, %v2436_v35 }
 0xb0d   : > { %6064 = vtanh.f32 %v2453_v42  ;;  %v2452_v44 = vmul.f32 0.7978846, %v2450_v43  ;;  %v4677_v42 = vld [vmem:[%s7678_s1 + $0x1] ss:$0 sm:$0xff] }
 0xb0f   : > { %6066 = vtanh.f32 %v2452_v44 }
 0xb1a   : > { %v6065_v14 = vpop.eup %6064 }
 0xb1b   : > { %v2457_v45 = vadd.f32 1.0, %v6065_v14 }
 0xb1c   : > { %v6067_v46 = vpop.eup %6066 }
 0xb1d   : > { %v2456_v47 = vadd.f32 1.0, %v6067_v46  ;;  %v2459_v48 = vmul.f32 0.5, %v2457_v45 }
 0xb1f   : > { %v2458_v49 = vmul.f32 0.5, %v2456_v47  ;;  %v2461_v51 = vmul.f32 %v2459_v48, %v2441_v32  ;;  %v4721_v47 = vld [vmem:[%s7676_s7 + $0x238] sm:$0xff] }
 0xb21   : > { %v2460_v50 = vmul.f32 %v2458_v49, %v2436_v35 }
 0xb23   : > { %5632 = vmatprep.mubr.f32.mxu1 %v2460_v50  ;;  %v4720_v50 = vld [vmem:[%s7676_s7 + $0x230] sm:$0xff] }
 0xb24   : > { %5633 = vmatmul.mubr.f32.vlgmr.msra.gmra.mxu1 %v2461_v51  ;;  %v4719_v51 = vld [vmem:[%s7676_s7 + $0x228] sm:$0xff] }
 0xb25   : > { %5663 = vmatpush3.msra.mxu1 %v4703_v7 }
 0xb26   : > { %5664 = vmatprep.subr.mxu1 %v4702_v9 }
 0xb27   : > { %5665 = vmatpush3.msra.mxu1 %v4702_v9 }
 0xb28   : > { %5666 = vmatprep.subr.mxu1 %v4701_v11 }
 0xb29   : > { %5667 = vmatpush3.msra.mxu1 %v4701_v11  ;;  %v4738_v11 = vld [vmem:[%s7676_s7 + $0x290] sm:$0xff] }
 0xb2a   : > { %5668 = vmatprep.subr.mxu1 %v4700_v12 }
 0xb2b   : > { %5669 = vmatpush3.msra.mxu1 %v4700_v12  ;;  %v4736_v12 = vld [vmem:[%s7676_s7 + $0x280] sm:$0xff] }
 0xb2c   : > { %5670 = vmatprep.subr.mxu1 %v4699_v16 }
 0xb2d   : > { %5671 = vmatpush3.msra.mxu1 %v4699_v16  ;;  %v4734_v16 = vld [vmem:[%s7676_s7 + $0x270] sm:$0xff] }
 0xb2e   : > { %5672 = vmatprep.subr.mxu1 %v4698_v18 }
 0xb2f   : > { %5673 = vmatpush3.msra.mxu1 %v4698_v18  ;;  %v4732_v18 = vld [vmem:[%s7676_s7 + $0x260] sm:$0xff] }
 0xb30   : > { %5674 = vmatprep.subr.mxu1 %v4697_v20 }
 0xb31   : > { %5675 = vmatpush3.msra.mxu1 %v4697_v20  ;;  %v4730_v20 = vld [vmem:[%s7676_s7 + $0x250] sm:$0xff] }
 0xb32   : > { %5676 = vmatprep.subr.mxu1 %v4696_v24 }
 0xb33   : > { %5677 = vmatpush3.msra.mxu1 %v4696_v24  ;;  %v4728_v24 = vld [vmem:[%s7676_s7 + $0x240] sm:$0xff] }
 0xb34   : > { %5678 = vmatprep.subr.mxu1 %v4695_v27 }
 0xb35   : > { %5679 = vmatpush3.msra.mxu1 %v4695_v27 }
 0xb36   : > { %5680 = vmatprep.subr.mxu1 %v4694_v29 }
 0xb37   : > { %5681 = vmatpush3.msra.mxu1 %v4694_v29 }
 0xb38   : > { %5682 = vmatprep.subr.mxu1 %v4693_v22 }
 0xb39   : > { %5683 = vmatpush3.msra.mxu1 %v4693_v22  ;;  %v6119_v22 = vld [vmem:[%s7647_s19 + $0x10] sm:$0xff] }
 0xb3a   : > { %5684 = vmatprep.subr.mxu1 %v4692_v26 }
 0xb3b   : > { %5685 = vmatpush3.msra.mxu1 %v4692_v26 }
 0xbe4   : > { %v5634_v53 = vpop.f32.mrf.mxu1 }
 0xbe5   : > { %v2555_v54 = vadd.f32 %v5634_v53, %v4675_v52  ;;  %v4717_v53 = vld [vmem:[%s7676_s7 + $0x218] sm:$0xff] }
 0xbe6   : > { %v2549_v55 = vpop.f32.mrf.mxu1 }
 0xbe7   : > { %v6923_v56 = vadd.f32 %v2555_v54, %v6811_v34  ;;  %v2550_v57 = vadd.f32 %v4675_v52, %v2549_v55  ;;  %v4718_v52 = vld [vmem:[%s7676_s7 + $0x220] sm:$0xff]  ;;  %v4716_v54 = vld [vmem:[%s7676_s7 + $0x210] sm:$0xff]  ;;  %v4715_v55 = vld [vmem:[%s7676_s7 + $0x208] sm:$0xff] }
 0xbe9   : > { %v6926_v58 = vadd.f32 %v2550_v57, %v6814_v36  ;;  %v2565_v59 = vsel %vm884_vm1, %v6923_v56, 0.0  ;;  %v4714_v57 = vld [vmem:[%s7676_s7 + $0x200] sm:$0xff] }
 0xbea   : > { %2566 = vadd.xlane.f32.xlu1 %v2565_v59  ;;  %v4713_v59 = vld [vmem:[%s7676_s7 + $0x1f8] sm:$0xff] }
 0xbeb   : > { %v2562_v60 = vsel %vm884_vm1, %v6926_v58, 0.0 }
 0xbec   : > { %2563 = vadd.xlane.f32.xlu0 %v2562_v60  ;;  %v4712_v60 = vld [vmem:[%s7676_s7 + $0x1f0] sm:$0xff] }
 0xc73   : > { %v2567_v61 = vpop.xlane.xlu1 %2566 }
 0xc74   : > { %v2569_v62 = vmul.f32 0.010416667, %v2567_v61  ;;  %v4711_v61 = vld [vmem:[%s7676_s7 + $0x1e8] sm:$0xff] }
 0xc75   : > { %v2564_v63 = vpop.xlane.xlu0 %2563 }
 0xc76   : > { %v6933_v0 = vsub.f32 %v6923_v56, %v2569_v62  ;;  %v2568_v34 = vmul.f32 0.010416667, %v2564_v63  ;;  %v4710_v62 = vld [vmem:[%s7676_s7 + $0x1e0] sm:$0xff]  ;;  %v4739_v63 = vld [vmem:[%s7676_s7 + $0x298] sm:$0xff] }
 0xc78   : > { %v6936_v1 = vsub.f32 %v6926_v58, %v2568_v34  ;;  %v2573_v36 = vmul.f32 %v6933_v0, %v6933_v0 }
 0xc7a   : > { %v2577_v2 = vsel %vm884_vm1, %v2573_v36, 0.0  ;;  %v2572_v4 = vmul.f32 %v6936_v1, %v6936_v1  ;;  %v6116_v36 = vld [vmem:[%s7647_s19 + $0x8] sm:$0xff] }
 0xc7b   : > { %2578 = vadd.xlane.f32.xlu1 %v2577_v2 }
 0xc7c   : > { %v2574_v5 = vsel %vm884_vm1, %v2572_v4, 0.0 }
 0xc7d   : > { %2575 = vadd.xlane.f32.xlu0 %v2574_v5  ;;  %v6117_v5 = vld [vmem:[%s7647_s19] sm:$0xff] }
 0xd04   : > { %v2579_v32 = vpop.xlane.xlu1 %2578 }
 0xd05   : > { %v2581_v28 = vmul.f32 0.010416667, %v2579_v32 }
 0xd06   : > { %v2576_v33 = vpop.xlane.xlu0 %2575 }
 0xd07   : > { %v2583_v35 = vadd.f32 1e-05, %v2581_v28  ;;  %v2580_v37 = vmul.f32 0.010416667, %v2576_v33 }
 0xd09   : > { %6068 = vrsqrt.f32 %v2583_v35  ;;  %v2582_v38 = vadd.f32 1e-05, %v2580_v37  ;;  %v4756_v35 = vld [vmem:[%s7676_s7 + $0x2f0] sm:$0xff]  ;;  %v4755_v37 = vld [vmem:[%s7676_s7 + $0x2e8] sm:$0xff] }
 0xd0b   : > { %6070 = vrsqrt.f32 %v2582_v38  ;;  %v4754_v38 = vld [vmem:[%s7676_s7 + $0x2e0] sm:$0xff] }
 0xd16   : > { %v6069_v39 = vpop.eup %6068 }
 0xd17   : > { %v2587_v41 = vmul.f32 %v6069_v39, %v6933_v0  ;;  %v4753_v39 = vld [vmem:[%s7676_s7 + $0x2d8] sm:$0xff] }
 0xd18   : > { %v6071_v15 = vpop.eup %6070 }
 0xd19   : > { %v2593_v43 = vmul.f32 %v4676_v40, %v2587_v41  ;;  %v2586_v44 = vmul.f32 %v6071_v15, %v6936_v1  ;;  %v4751_v41 = vld [vmem:[%s7676_s7 + $0x2c8] sm:$0xff]  ;;  %v4750_v15 = vld [vmem:[%s7676_s7 + $0x2c0] sm:$0xff] }
 0xd1b   : > { %v7024_v14 = vadd.f32 %v4677_v42, %v2593_v43  ;;  %v2592_v45 = vmul.f32 %v4676_v40, %v2586_v44  ;;  %v4752_v40 = vld [vmem:[%s7676_s7 + $0x2d0] sm:$0xff]  ;;  %v4747_v44 = vld [vmem:[%s7676_s7 + $0x2a8] sm:$0xff] }
 0xd1c   : > { %v4748_v43 = vld [vmem:[%s7676_s7 + $0x2b0] sm:$0xff] }
 0xd1d   : > { %v7026_v46 = vadd.f32 %v4677_v42, %v2592_v45  ;;  %5689 = vmatprep.subr.msk.mxu0 %vm884_vm1, %v7024_v14  ;;  %5723 = vmatprep.subr.msk.mxu1 %vm884_vm1, %v7024_v14  ;;  %v4749_v42 = vld [vmem:[%s7676_s7 + $0x2b8] sm:$0xff]  ;;  %v4746_v45 = vld [vmem:[%s7676_s7 + $0x2a0] sm:$0xff] }
 0xd1f   : > { %5659 = vmatprep.mubr.msk.f32.mxu0 %vm884_vm1, %v7026_v46  ;;  %5686 = vmatprep.mubr.msk.f32.mxu1 %vm884_vm1, %v7026_v46 }
 0xd20   : > { %5660 = vmatmul.mubr.msk.f32.vlgmr.msra.gmra.mxu0 %vm884_vm1, %v7024_v14  ;;  %5687 = vmatmul.mubr.msk.f32.vlgmr.msra.gmra.mxu1 %vm884_vm1, %v7024_v14 }
 0xd21   : > { %5690 = vmatpush3.xpose.msk.msra.mxu0 %vm884_vm1, %v7024_v14  ;;  %5724 = vmatpush3.xpose.msk.msra.mxu1 %vm884_vm1, %v7024_v14 }
 0xd22   : > { %5691 = vmatprep.subr.msk.mxu0 %vm884_vm1, %v7026_v46  ;;  %5725 = vmatprep.subr.msk.mxu1 %vm884_vm1, %v7026_v46 }
 0xd25   : > { %5692 = vmatpush3.xpose.msk.msra.mxu0 %vm884_vm1, %v7026_v46  ;;  %5726 = vmatpush3.xpose.msk.msra.mxu1 %vm884_vm1, %v7026_v46 }
 0xd26   : > { %5696 = vmatprep.subr.mxu0 %v4721_v47  ;;  %5730 = vmatprep.subr.mxu1 %v4739_v63 }
 0xde0   : > { %v5688_v48 = vpop.f32.mrf.mxu1  ;;  %v7105_v0 = vpop.f32.mrf.mxu0 }
 0xde2   : > { %v2773_v49 = vpop.f32.mrf.mxu1  ;;  %v7107_v34 = vpop.f32.mrf.mxu0 }
 0xde3   : > { %5693 = vmatprep.mubr.msk.f32.mxu0 %vm884_vm1, %v2773_v49 }
 0xde4   : > { %5694 = vmatmul.mubr.msk.f32.vlgmr.msra.gmra.mxu0 %vm884_vm1, %v5688_v48 }
 0xde5   : > { %5697 = vmatpush3.msra.mxu0 %v4721_v47  ;;  %5720 = vmatprep.mubr.msk.f32.mxu0 %vm884_vm1, %v7026_v46  ;;  %v6120_v47 = vld [vmem:[%s7647_s19 + $0x28] sm:$0xff] }
 0xde6   : > { %5698 = vmatprep.subr.mxu0 %v4720_v50 }
 0xde7   : > { %5699 = vmatpush3.msra.mxu0 %v4720_v50  ;;  %v6121_v50 = vld [vmem:[%s7647_s19 + $0x20] sm:$0xff] }
 0xde8   : > { %5700 = vmatprep.subr.mxu0 %v4719_v51 }
 0xde9   : > { %5701 = vmatpush3.msra.mxu0 %v4719_v51 }
 0xdea   : > { %5702 = vmatprep.subr.mxu0 %v4718_v52 }
 0xdeb   : > { %5703 = vmatpush3.msra.mxu0 %v4718_v52 }
 0xdec   : > { %5704 = vmatprep.subr.mxu0 %v4717_v53 }
 0xded   : > { %5705 = vmatpush3.msra.mxu0 %v4717_v53 }
 0xdee   : > { %5706 = vmatprep.subr.mxu0 %v4716_v54 }
 0xdef   : > { %5707 = vmatpush3.msra.mxu0 %v4716_v54 }
 0xdf0   : > { %5708 = vmatprep.subr.mxu0 %v4715_v55 }
 0xdf1   : > { %5709 = vmatpush3.msra.mxu0 %v4715_v55 }
 0xdf2   : > { %5710 = vmatprep.subr.mxu0 %v4714_v57 }
 0xdf3   : > { %5711 = vmatpush3.msra.mxu0 %v4714_v57 }
 0xdf4   : > { %5712 = vmatprep.subr.mxu0 %v4713_v59 }
 0xdf5   : > { %5713 = vmatpush3.msra.mxu0 %v4713_v59 }
 0xdf6   : > { %5714 = vmatprep.subr.mxu0 %v4712_v60 }
 0xdf7   : > { %5715 = vmatpush3.msra.mxu0 %v4712_v60 }
 0xdf8   : > { %5716 = vmatprep.subr.mxu0 %v4711_v61 }
 0xdf9   : > { %5717 = vmatpush3.msra.mxu0 %v4711_v61 }
 0xdfa   : > { %5718 = vmatprep.subr.mxu0 %v4710_v62 }
 0xdfb   : > { %5719 = vmatpush3.msra.mxu0 %v4710_v62 }
 0xdfc   : > { %5721 = vmatmul.mubr.msk.f32.vlgmr.msra.gmra.mxu0 %vm884_vm1, %v7024_v14  ;;  %5757 = vmatprep.subr.msk.mxu0 %vm884_vm1, %v7024_v14 }
 0xdfd   : > { %5758 = vmatpush3.xpose.msk.msra.mxu0 %vm884_vm1, %v7024_v14 }
 0xdfe   : > { %5759 = vmatprep.subr.msk.mxu0 %vm884_vm1, %v7026_v46 }
 0xe01   : > { %5760 = vmatpush3.xpose.msk.msra.mxu0 %vm884_vm1, %v7026_v46 }
 0xe02   : > { %5764 = vmatprep.subr.mxu0 %v4757_v25 }
 0xea4   : > { %v5695_v1 = vpop.f32.mrf.mxu0 }
 0xea5   : > { %v7112_v2 = vadd.f32 %v6116_v36, %v5695_v1 }
 0xea6   : > { %v2854_v4 = vpop.f32.mrf.mxu0 }
 0xea7   : > { %v7117_v6 = vadd.f32 %v6117_v5, %v2854_v4  ;;  %v3381_v7 = vsel %vm1700_vm2, %v7112_v2, -inf }
 0xea8   : > { %3382 = vmax.xlane.f32.xlu1 %v3381_v7 }
 0xea9   : > { %v3378_v8 = vsel %vm1700_vm2, %v7117_v6, -inf }
 0xeaa   : > { %3379 = vmax.xlane.f32.xlu0 %v3378_v8 }
 0xebc   : > { %v5722_v9 = vpop.f32.mrf.mxu0 }
 0xebe   : > { %v2942_v10 = vpop.f32.mrf.mxu0 }
 0xebf   : > { %5727 = vmatprep.mubr.msk.f32.mxu1 %vm884_vm1, %v2942_v10 }
 0xec0   : > { %5728 = vmatmul.mubr.msk.f32.vlgmr.msra.gmra.mxu1 %vm884_vm1, %v5722_v9 }
 0xec1   : > { %5731 = vmatpush3.msra.mxu1 %v4739_v63  ;;  %5754 = vmatprep.mubr.msk.f32.mxu1 %vm884_vm1, %v7026_v46 }
 0xec2   : > { %5732 = vmatprep.subr.mxu1 %v4738_v11 }
 0xec3   : > { %5733 = vmatpush3.msra.mxu1 %v4738_v11  ;;  %v6122_v11 = vld [vmem:[%s7647_s19 + $0x38] sm:$0xff] }
 0xec4   : > { %5734 = vmatprep.subr.mxu1 %v4737_v3 }
 0xec5   : > { %5735 = vmatpush3.msra.mxu1 %v4737_v3 }
 0xec6   : > { %5736 = vmatprep.subr.mxu1 %v4736_v12 }
 0xec7   : > { %5737 = vmatpush3.msra.mxu1 %v4736_v12 }
 0xec8   : > { %5738 = vmatprep.subr.mxu1 %v4735_v13 }
 0xec9   : > { %5739 = vmatpush3.msra.mxu1 %v4735_v13  ;;  %v6123_v13 = vld [vmem:[%s7647_s19 + $0x30] sm:$0xff] }
 0xeca   : > { %5740 = vmatprep.subr.mxu1 %v4734_v16 }
 0xecb   : > { %5741 = vmatpush3.msra.mxu1 %v4734_v16 }
 0xecc   : > { %5742 = vmatprep.subr.mxu1 %v4733_v17 }
 0xecd   : > { %5743 = vmatpush3.msra.mxu1 %v4733_v17 }
 0xece   : > { %5744 = vmatprep.subr.mxu1 %v4732_v18 }
 0xecf   : > { %5745 = vmatpush3.msra.mxu1 %v4732_v18 }
 0xed0   : > { %5746 = vmatprep.subr.mxu1 %v4731_v19 }
 0xed1   : > { %5747 = vmatpush3.msra.mxu1 %v4731_v19 }
 0xed2   : > { %5748 = vmatprep.subr.mxu1 %v4730_v20 }
 0xed3   : > { %5749 = vmatpush3.msra.mxu1 %v4730_v20 }
 0xed4   : > { %5750 = vmatprep.subr.mxu1 %v4729_v23 }
 0xed5   : > { %5751 = vmatpush3.msra.mxu1 %v4729_v23 }
 0xed6   : > { %5752 = vmatprep.subr.mxu1 %v4728_v24 }
 0xed7   : > { %5753 = vmatpush3.msra.mxu1 %v4728_v24 }
 0xed8   : > { %5755 = vmatmul.mubr.msk.f32.vlgmr.msra.gmra.mxu1 %vm884_vm1, %v7024_v14  ;;  %5791 = vmatprep.subr.msk.mxu1 %vm884_vm1, %v7024_v14 }
 0xed9   : > { %5792 = vmatpush3.xpose.msk.msra.mxu1 %vm884_vm1, %v7024_v14 }
 0xeda   : > { %5793 = vmatprep.subr.msk.mxu1 %vm884_vm1, %v7026_v46 }
 0xedd   : > { %5794 = vmatpush3.xpose.msk.msra.mxu1 %vm884_vm1, %v7026_v46 }
 0xf31   : > { %v3383_v55 = vpop.xlane.xlu1 %3382 }
 0xf32   : > { %v3403_v59 = vsub.f32 %v7112_v2, %v3383_v55 }
 0xf33   : > { %v3380_v57 = vpop.xlane.xlu0 %3379 }
 0xf34   : > { %v3402_v61 = vsub.f32 %v7117_v6, %v3380_v57  ;;  %v3412_v63 = vmul.f32 1.442695, %v3403_v59 }
 0xf36   : > { %v3410_v1 = vmul.f32 1.442695, %v3402_v61  ;;  %6072 = vpow2.f32 %v3412_v63  ;;  %v4783_v61 = vld [vmem:[%s7679_s5 + $0x1d8] sm:$0xff] }
 0xf37   : > { %v4795_v63 = vld [vmem:[%s7679_s5 + $0x238] sm:$0xff] }
 0xf38   : > { %6074 = vpow2.f32 %v3410_v1  ;;  %5814 = vmatprep.subr.mxu1 %v4795_v63  ;;  %v4793_v1 = vld [vmem:[%s7679_s5 + $0x228] sm:$0xff] }
 0xf43   : > { %v6073_v18 = vpop.eup %6072 }
 0xf44   : > { %v3429_v23 = vsel %vm1700_vm2, %v6073_v18, 0.0 }
 0xf45   : > { %v6075_v20 = vpop.eup %6074 }
 0xf80   : > { %v5729_v27 = vpop.f32.mrf.mxu1 }
 0xf81   : > { %v7176_v29 = vadd.f32 %v6118_v21, %v5729_v27 }
 0xf82   : > { %v3023_v30 = vpop.f32.mrf.mxu1 }
 0xf83   : > { %v7181_v31 = vadd.f32 %v6119_v22, %v3023_v30  ;;  %v3387_v26 = vsel %vm1700_vm2, %v7176_v29, -inf }
 0xf84   : > { %3388 = vmax.xlane.f32.xlu1 %v3387_v26 }
 0xf85   : > { %v3384_v32 = vsel %vm1700_vm2, %v7181_v31, -inf }
 0xf86   : > { %3385 = vmax.xlane.f32.xlu0 %v3384_v32 }
 0xf98   : > { %v5756_v28 = vpop.f32.mrf.mxu1 }
 0xf9a   : > { %v3111_v33 = vpop.f32.mrf.mxu1 }
 0xf9b   : > { %5761 = vmatprep.mubr.msk.f32.mxu0 %vm884_vm1, %v3111_v33 }
 0xf9c   : > { %5762 = vmatmul.mubr.msk.f32.vlgmr.msra.gmra.mxu0 %vm884_vm1, %v5756_v28 }
 0xf9d   : > { %5765 = vmatpush3.msra.mxu0 %v4757_v25  ;;  %5788 = vmatprep.mubr.msk.f32.mxu0 %vm884_vm1, %v7026_v46  ;;  %v3426_v25 = vsel %vm1700_vm2, %v6075_v20, 0.0 }
 0xf9e   : > { %5766 = vmatprep.subr.mxu0 %v4756_v35 }
 0xf9f   : > { %5767 = vmatpush3.msra.mxu0 %v4756_v35 }
 0xfa0   : > { %5768 = vmatprep.subr.mxu0 %v4755_v37 }
 0xfa1   : > { %5769 = vmatpush3.msra.mxu0 %v4755_v37 }
 0xfa2   : > { %5770 = vmatprep.subr.mxu0 %v4754_v38 }
 0xfa3   : > { %5771 = vmatpush3.msra.mxu0 %v4754_v38 }
 0xfa4   : > { %5772 = vmatprep.subr.mxu0 %v4753_v39 }
 0xfa5   : > { %5773 = vmatpush3.msra.mxu0 %v4753_v39 }
 0xfa6   : > { %5774 = vmatprep.subr.mxu0 %v4752_v40 }
 0xfa7   : > { %5775 = vmatpush3.msra.mxu0 %v4752_v40 }
 0xfa8   : > { %5776 = vmatprep.subr.mxu0 %v4751_v41 }
 0xfa9   : > { %5777 = vmatpush3.msra.mxu0 %v4751_v41 }
 0xfaa   : > { %5778 = vmatprep.subr.mxu0 %v4750_v15 }
 0xfab   : > { %5779 = vmatpush3.msra.mxu0 %v4750_v15 }
 0xfac   : > { %5780 = vmatprep.subr.mxu0 %v4749_v42 }
 0xfad   : > { %5781 = vmatpush3.msra.mxu0 %v4749_v42 }
 0xfae   : > { %5782 = vmatprep.subr.mxu0 %v4748_v43 }
 0xfaf   : > { %5783 = vmatpush3.msra.mxu0 %v4748_v43 }
 0xfb0   : > { %5784 = vmatprep.subr.mxu0 %v4747_v44 }
 0xfb1   : > { %5785 = vmatpush3.msra.mxu0 %v4747_v44 }
 0xfb2   : > { %5786 = vmatprep.subr.mxu0 %v4746_v45 }
 0xfb3   : > { %5787 = vmatpush3.msra.mxu0 %v4746_v45 }
 0xfb4   : > { %5789 = vmatmul.mubr.msk.f32.vlgmr.msra.gmra.mxu0 %vm884_vm1, %v7024_v14  ;;  %5798 = vmatprep.subr.mxu0 %v7105_v0 }
 0xfb5   : > { %5799 = vmatpush3.msra.mxu0 %v7105_v0 }
 0xfb6   : > { %5800 = vmatprep.subr.mxu0 %v7107_v34 }
 0xfb7   : > { %5801 = vmatpush3.msra.mxu0 %v7107_v34 }
 0xfb8   : > { %5841 = vmatprep.subr.mxu0 %v4783_v61 }
0x100d   : > { %v3389_v60 = vpop.xlane.xlu1 %3388 }
0x100e   : > { %v3405_v0 = vsub.f32 %v7176_v29, %v3389_v60 }
0x100f   : > { %v3386_v62 = vpop.xlane.xlu0 %3385 }
0x1010   : > { %v3404_v36 = vsub.f32 %v7181_v31, %v3386_v62  ;;  %v3416_v5 = vmul.f32 1.442695, %v3405_v0  ;;  %v4782_v62 = vld [vmem:[%s7679_s5 + $0x1d0] sm:$0xff] }
0x1011   : > { %v4794_v0 = vld [vmem:[%s7679_s5 + $0x230] sm:$0xff] }
0x1012   : > { %v3414_v8 = vmul.f32 1.442695, %v3404_v36  ;;  %6076 = vpow2.f32 %v3416_v5  ;;  %v4780_v36 = vld [vmem:[%s7679_s5 + $0x1c0] sm:$0xff]  ;;  %v4779_v5 = vld [vmem:[%s7679_s5 + $0x1b8] sm:$0xff] }
0x1014   : > { %6078 = vpow2.f32 %v3414_v8  ;;  %v4778_v8 = vld [vmem:[%s7679_s5 + $0x1b0] sm:$0xff] }
0x101f   : > { %v6077_v24 = vpop.eup %6076 }
0x1020   : > { %v3435_v21 = vsel %vm1700_vm2, %v6077_v24, 0.0 }
0x1021   : > { %v6079_v27 = vpop.eup %6078 }
0x1022   : > { %v3432_v30 = vsel %vm1700_vm2, %v6079_v27, 0.0 }
0x105c   : > { %v5763_v46 = vpop.f32.mrf.mxu0 }
0x105d   : > { %v3375_v48 = vadd.f32 %v6120_v47, %v5763_v46 }
0x105e   : > { %v3192_v49 = vpop.f32.mrf.mxu0 }
0x105f   : > { %v3374_v14 = vadd.f32 %v6121_v50, %v3192_v49  ;;  %v3393_v51 = vsel %vm1700_vm2, %v3375_v48, -inf }
0x1060   : > { %3394 = vmax.xlane.f32.xlu1 %v3393_v51 }
0x1061   : > { %v3390_v52 = vsel %vm1700_vm2, %v3374_v14, -inf }
0x1062   : > { %3391 = vmax.xlane.f32.xlu0 %v3390_v52 }
0x1074   : > { %v5790_v53 = vpop.f32.mrf.mxu0 }
0x1076   : > { %v3280_v54 = vpop.f32.mrf.mxu0 }
0x1077   : > { %5795 = vmatprep.mubr.msk.f32.mxu1 %vm884_vm1, %v3280_v54 }
0x1078   : > { %5796 = vmatmul.mubr.msk.f32.vlgmr.msra.gmra.mxu1 %vm884_vm1, %v5790_v53 }
0x1079   : > { %5815 = vmatpush3.msra.mxu1 %v4795_v63 }
0x107a   : > { %5816 = vmatprep.subr.mxu1 %v4794_v0 }
0x107b   : > { %5817 = vmatpush3.msra.mxu1 %v4794_v0 }
0x107c   : > { %5818 = vmatprep.subr.mxu1 %v4793_v1 }
0x107d   : > { %5819 = vmatpush3.msra.mxu1 %v4793_v1 }
0x10e9   : > { %v3395_v34 = vpop.xlane.xlu1 %3394 }
0x10ea   : > { %v3407_v7 = vsub.f32 %v3375_v48, %v3395_v34  ;;  %v4781_v34 = vld [vmem:[%s7679_s5 + $0x1c8] sm:$0xff] }
0x10eb   : > { %v3392_v4 = vpop.xlane.xlu0 %3391 }
0x10ec   : > { %v3406_v9 = vsub.f32 %v3374_v14, %v3392_v4  ;;  %v3420_v2 = vmul.f32 1.442695, %v3407_v7  ;;  %v4792_v4 = vld [vmem:[%s7679_s5 + $0x220] sm:$0xff]  ;;  %v4791_v7 = vld [vmem:[%s7679_s5 + $0x218] sm:$0xff] }
0x10ed   : > { %5820 = vmatprep.subr.mxu1 %v4792_v4 }
0x10ee   : > { %v3418_v10 = vmul.f32 1.442695, %v3406_v9  ;;  %6080 = vpow2.f32 %v3420_v2  ;;  %5821 = vmatpush3.msra.mxu1 %v4792_v4  ;;  %v4790_v9 = vld [vmem:[%s7679_s5 + $0x210] sm:$0xff]  ;;  %v4777_v2 = vld [vmem:[%s7679_s5 + $0x1a8] sm:$0xff] }
0x10ef   : > { %5822 = vmatprep.subr.mxu1 %v4791_v7 }
0x10f0   : > { %6082 = vpow2.f32 %v3418_v10  ;;  %5823 = vmatpush3.msra.mxu1 %v4791_v7  ;;  %v4789_v10 = vld [vmem:[%s7679_s5 + $0x208] sm:$0xff] }
0x10f1   : > { %5824 = vmatprep.subr.mxu1 %v4790_v9 }
0x10f2   : > { %5825 = vmatpush3.msra.mxu1 %v4790_v9 }
0x10f3   : > { %5826 = vmatprep.subr.mxu1 %v4789_v10 }
0x10f4   : > { %5827 = vmatpush3.msra.mxu1 %v4789_v10 }
0x10fb   : > { %v6081_v29 = vpop.eup %6080 }
0x10fc   : > { %v3441_v31 = vsel %vm1700_vm2, %v6081_v29, 0.0 }
0x10fd   : > { %v6083_v22 = vpop.eup %6082 }
0x10fe   : > { %v3438_v26 = vsel %vm1700_vm2, %v6083_v22, 0.0 }
0x1138   : > { %v5797_v6 = vpop.f32.mrf.mxu1 }
0x1139   : > { %v3377_v3 = vadd.f32 %v6122_v11, %v5797_v6  ;;  %v4776_v6 = vld [vmem:[%s7679_s5 + $0x1a0] sm:$0xff] }
0x113a   : > { %v3361_v12 = vpop.f32.mrf.mxu1  ;;  %v4788_v11 = vld [vmem:[%s7679_s5 + $0x200] sm:$0xff] }
0x113b   : > { %v3376_v16 = vadd.f32 %v6123_v13, %v3361_v12  ;;  %v3399_v17 = vsel %vm1700_vm2, %v3377_v3, -inf  ;;  %v4787_v12 = vld [vmem:[%s7679_s5 + $0x1f8] sm:$0xff]  ;;  %5828 = vmatprep.subr.mxu1 %v4788_v11  ;;  %v4774_v13 = vld [vmem:[%s7679_s5 + $0x190] sm:$0xff] }
0x113c   : > { %3400 = vmax.xlane.f32.xlu1 %v3399_v17  ;;  %5829 = vmatpush3.msra.mxu1 %v4788_v11  ;;  %v4786_v17 = vld [vmem:[%s7679_s5 + $0x1f0] sm:$0xff] }
0x113d   : > { %v3396_v19 = vsel %vm1700_vm2, %v3376_v16, -inf  ;;  %5830 = vmatprep.subr.mxu1 %v4787_v12 }
0x113e   : > { %3397 = vmax.xlane.f32.xlu0 %v3396_v19  ;;  %5831 = vmatpush3.msra.mxu1 %v4787_v12  ;;  %v4785_v19 = vld [vmem:[%s7679_s5 + $0x1e8] sm:$0xff] }
0x113f   : > { %5832 = vmatprep.subr.mxu1 %v4786_v17 }
0x1140   : > { %3430 = vadd.xlane.f32.xlu1 %v3429_v23  ;;  %5833 = vmatpush3.msra.mxu1 %v4786_v17  ;;  %v4811_v23 = vld [vmem:[%s7679_s5 + $0x298] sm:$0xff] }
0x1141   : > { %5834 = vmatprep.subr.mxu1 %v4785_v19 }
0x1142   : > { %3427 = vadd.xlane.f32.xlu0 %v3426_v25  ;;  %5835 = vmatpush3.msra.mxu1 %v4785_v19 }
0x1144   : > { %3436 = vadd.xlane.f32.xlu1 %v3435_v21 }
0x1146   : > { %3433 = vadd.xlane.f32.xlu0 %v3432_v30 }
0x1148   : > { %3442 = vadd.xlane.f32.xlu1 %v3441_v31 }
0x114a   : > { %3439 = vadd.xlane.f32.xlu0 %v3438_v26 }
0x11c5   : > { %v3401_v32 = vpop.xlane.xlu1 %3400 }
0x11c6   : > { %v3409_v28 = vsub.f32 %v3377_v3, %v3401_v32  ;;  %v4775_v3 = vld [vmem:[%s7679_s5 + $0x198] sm:$0xff]  ;;  %v4824_v32 = vld [vmem:[%s7679_s5 + $0x2f0] sm:$0xff] }
0x11c7   : > { %v3398_v33 = vpop.xlane.xlu0 %3397 }
0x11c8   : > { %v3424_v35 = vmul.f32 1.442695, %v3409_v28  ;;  %v3408_v37 = vsub.f32 %v3376_v16, %v3398_v33  ;;  %v4773_v16 = vld [vmem:[%s7679_s5 + $0x188] sm:$0xff] }
0x11c9   : > { %v3431_v38 = vpop.xlane.xlu1 %3430  ;;  %v4823_v33 = vld [vmem:[%s7679_s5 + $0x2e8] sm:$0xff] }
0x11ca   : > { %6084 = vpow2.f32 %v3424_v35  ;;  %v3422_v39 = vmul.f32 1.442695, %v3408_v37  ;;  %v4810_v37 = vld [vmem:[%s7679_s5 + $0x290] sm:$0xff] }
0x11cb   : > { %6086 = vrcp.f32 %v3431_v38  ;;  %v3428_v40 = vpop.xlane.xlu0 %3427  ;;  %v4822_v38 = vld [vmem:[%s7679_s5 + $0x2e0] sm:$0xff] }
0x11cc   : > { %6088 = vpow2.f32 %v3422_v39 }
0x11cd   : > { %6090 = vrcp.f32 %v3428_v40  ;;  %v3437_v41 = vpop.xlane.xlu1 %3436  ;;  %v4809_v40 = vld [vmem:[%s7679_s5 + $0x288] sm:$0xff] }
0x11ce   : > { %6092 = vrcp.f32 %v3437_v41 }
0x11cf   : > { %v3434_v15 = vpop.xlane.xlu0 %3433 }
0x11d0   : > { %6094 = vrcp.f32 %v3434_v15  ;;  %v4821_v15 = vld [vmem:[%s7679_s5 + $0x2d8] sm:$0xff] }
0x11d1   : > { %v3443_v42 = vpop.xlane.xlu1 %3442 }
0x11d2   : > { %6096 = vrcp.f32 %v3443_v42  ;;  %v4808_v42 = vld [vmem:[%s7679_s5 + $0x280] sm:$0xff] }
0x11d3   : > { %v3440_v43 = vpop.xlane.xlu0 %3439 }
0x11d4   : > { %6098 = vrcp.f32 %v3440_v43  ;;  %v4820_v43 = vld [vmem:[%s7679_s5 + $0x2d0] sm:$0xff] }
0x11d7   : > { %v7258_v44 = vpop.eup %6084 }
0x11d8   : > { %v6087_v45 = vpop.eup %6086  ;;  %v3447_v46 = vsel %vm1700_vm2, %v7258_v44, 0.0 }
0x11d9   : > { %v7262_v47 = vpop.eup %6088  ;;  %3448 = vadd.xlane.f32.xlu1 %v3447_v46  ;;  %v3459_v51 = vmul.f32 %v6087_v45, %v6073_v18  ;;  %v4772_v18 = vld [vmem:[%s7679_s5 + $0x180] sm:$0xff]  ;;  %v4819_v45 = vld [vmem:[%s7679_s5 + $0x2c8] sm:$0xff]  ;;  %v4806_v46 = vld [vmem:[%s7679_s5 + $0x270] sm:$0xff] }
0x11da   : > { %v6091_v48 = vpop.eup %6090  ;;  %v3444_v49 = vsel %vm1700_vm2, %v7262_v47, 0.0 }
0x11db   : > { %3445 = vadd.xlane.f32.xlu0 %v3444_v49  ;;  %v3458_v50 = vmul.f32 %v6091_v48, %v6075_v20  ;;  %v6093_v14 = vpop.eup %6092  ;;  %v4784_v20 = vld [vmem:[%s7679_s5 + $0x1e0] sm:$0xff]  ;;  %v4805_v48 = vld [vmem:[%s7679_s5 + $0x268] sm:$0xff]  ;;  %v4817_v49 = vld [vmem:[%s7679_s5 + $0x2b8] sm:$0xff] }
0x11dc   : > { %v3461_v55 = vmul.f32 %v6093_v14, %v6077_v24  ;;  %5836 = vmatprep.subr.mxu1 %v4784_v20  ;;  %v4825_v24 = vld [vmem:[%s7679_s5 + $0x2f8] sm:$0xff]  ;;  %v4816_v14 = vld [vmem:[%s7679_s5 + $0x2b0] sm:$0xff] }
0x11dd   : > { %v6095_v52 = vpop.eup %6094  ;;  %5802 = vmatprep.mubr.msk.f32.mxu0 %vm1700_vm2, %v3458_v50  ;;  %5837 = vmatpush3.msra.mxu1 %v4784_v20  ;;  %v4804_v50 = vld [vmem:[%s7679_s5 + $0x260] sm:$0xff] }
0x11de   : > { %5803 = vmatmul.mubr.msk.f32.vlgmr.msra.gmra.mxu0 %vm1700_vm2, %v3459_v51  ;;  %v3460_v53 = vmul.f32 %v6095_v52, %v6079_v27  ;;  %5868 = vmatprep.subr.mxu1 %v4811_v23  ;;  %v4803_v51 = vld [vmem:[%s7679_s5 + $0x258] sm:$0xff]  ;;  %v4802_v52 = vld [vmem:[%s7679_s5 + $0x250] sm:$0xff] }
0x11df   : > { %v6097_v54 = vpop.eup %6096  ;;  %5842 = vmatpush3.msra.mxu0 %v4783_v61 }
0x11e0   : > { %5805 = vmatprep.mubr.msk.f32.mxu0 %vm1700_vm2, %v3460_v53  ;;  %v3463_v60 = vmul.f32 %v6097_v54, %v6081_v29  ;;  %5843 = vmatprep.subr.mxu0 %v4782_v62  ;;  %v4815_v53 = vld [vmem:[%s7679_s5 + $0x2a8] sm:$0xff] }
0x11e1   : > { %v6099_v57 = vpop.eup %6098  ;;  %5844 = vmatpush3.msra.mxu0 %v4782_v62  ;;  %v4801_v54 = vld [vmem:[%s7679_s5 + $0x248] sm:$0xff] }
0x11e2   : > { %5806 = vmatmul.mubr.msk.f32.gmra.mxu0 %vm1700_vm2, %v3461_v55  ;;  %v3462_v59 = vmul.f32 %v6099_v57, %v6083_v22  ;;  %5845 = vmatprep.subr.mxu0 %v4781_v34  ;;  %v4814_v55 = vld [vmem:[%s7679_s5 + $0x2a0] sm:$0xff] }
0x11e3   : > { %5846 = vmatpush3.msra.mxu0 %v4781_v34  ;;  %v4800_v57 = vld [vmem:[%s7679_s5 + $0x240] sm:$0xff] }
0x11e4   : > { %5808 = vmatprep.mubr.msk.f32.mxu0 %vm1700_vm2, %v3462_v59  ;;  %5847 = vmatprep.subr.mxu0 %v4780_v36 }
0x11e5   : > { %5848 = vmatpush3.msra.mxu0 %v4780_v36 }
0x11e6   : > { %5809 = vmatmul.mubr.msk.f32.gmra.mxu0 %vm1700_vm2, %v3463_v60  ;;  %5849 = vmatprep.subr.mxu0 %v4779_v5 }
0x11e7   : > { %5850 = vmatpush3.msra.mxu0 %v4779_v5 }
0x11e8   : > { %5851 = vmatprep.subr.mxu0 %v4778_v8 }
0x11e9   : > { %5852 = vmatpush3.msra.mxu0 %v4778_v8 }
0x11ea   : > { %5853 = vmatprep.subr.mxu0 %v4777_v2 }
0x11eb   : > { %5854 = vmatpush3.msra.mxu0 %v4777_v2  ;;  %v4828_v2 = vld [vmem:[%s7636_s8 + $0x1] ss:$0 sm:$0xff] }
0x11ec   : > { %5855 = vmatprep.subr.mxu0 %v4776_v6 }
0x11ed   : > { %5856 = vmatpush3.msra.mxu0 %v4776_v6 }
0x11ee   : > { %5857 = vmatprep.subr.mxu0 %v4775_v3 }
0x11ef   : > { %5858 = vmatpush3.msra.mxu0 %v4775_v3 }
0x11f0   : > { %5859 = vmatprep.subr.mxu0 %v4774_v13 }
0x11f1   : > { %5860 = vmatpush3.msra.mxu0 %v4774_v13 }
0x11f2   : > { %5861 = vmatprep.subr.mxu0 %v4773_v16 }
0x11f3   : > { %5862 = vmatpush3.msra.mxu0 %v4773_v16 }
0x11f4   : > { %5863 = vmatprep.subr.mxu0 %v4772_v18 }
0x11f5   : > { %5864 = vmatpush3.msra.mxu0 %v4772_v18 }
0x11f6   : > { %5895 = vmatprep.subr.mxu0 %v4825_v24 }
0x1262   : > { %v3449_v25 = vpop.xlane.xlu1 %3448 }
0x1263   : > { %6100 = vrcp.f32 %v3449_v25 }
0x1264   : > { %v3446_v27 = vpop.xlane.xlu0 %3445 }
0x1265   : > { %6102 = vrcp.f32 %v3446_v27 }
0x1270   : > { %v6101_v21 = vpop.eup %6100 }
0x1271   : > { %v3465_v22 = vmul.f32 %v6101_v21, %v7258_v44  ;;  %v4807_v44 = vld [vmem:[%s7679_s5 + $0x278] sm:$0xff] }
0x1272   : > { %v6103_v29 = vpop.eup %6102 }
0x1273   : > { %v3464_v30 = vmul.f32 %v6103_v29, %v7262_v47  ;;  %v4818_v47 = vld [vmem:[%s7679_s5 + $0x2c0] sm:$0xff]  ;;  %v4842_v29 = vld [vmem:[%s7639_s11 + $0xb8] sm:$0xff] }
0x1275   : > { %5811 = vmatprep.mubr.msk.f32.mxu0 %vm1700_vm2, %v3464_v30  ;;  %v4841_v30 = vld [vmem:[%s7639_s11 + $0xb0] sm:$0xff] }
0x1276   : > { %5812 = vmatmul.mubr.msk.f32.gmra.mxu0 %vm1700_vm2, %v3465_v22  ;;  %v4840_v22 = vld [vmem:[%s7639_s11 + $0xa8] sm:$0xff] }
0x129e   : > { %v5804_v31 = vpop.f32.mrf.mxu0 }
0x12a0   : > { %v3556_v26 = vpop.f32.mrf.mxu0 }
0x12a1   : > { %5865 = vmatprep.mubr.msk.f32.mxu0 %vm884_vm1, %v3556_v26  ;;  %v4838_v26 = vld [vmem:[%s7639_s11 + $0x98] sm:$0xff] }
0x12a2   : > { %v5807_v28 = vpop.f32.mrf.mxu0  ;;  %5866 = vmatmul.mubr.msk.f32.vlgmr.msra.gmra.mxu0 %vm884_vm1, %v5804_v31  ;;  %v4839_v31 = vld [vmem:[%s7639_s11 + $0xa0] sm:$0xff] }
0x12a3   : > { %5896 = vmatpush3.msra.mxu0 %v4825_v24 }
0x12a4   : > { %v3566_v35 = vpop.f32.mrf.mxu0  ;;  %5897 = vmatprep.subr.mxu0 %v4824_v32 }
0x12a5   : > { %5838 = vmatprep.mubr.msk.f32.mxu1 %vm884_vm1, %v3566_v35  ;;  %5898 = vmatpush3.msra.mxu0 %v4824_v32  ;;  %v4837_v32 = vld [vmem:[%s7639_s11 + $0x90] sm:$0xff]  ;;  %v4834_v35 = vld [vmem:[%s7639_s11 + $0x78] sm:$0xff] }
0x12a6   : > { %v7369_v39 = vpop.f32.mrf.mxu0  ;;  %5839 = vmatmul.mubr.msk.f32.vlgmr.msra.gmra.mxu1 %vm884_vm1, %v5807_v28  ;;  %5899 = vmatprep.subr.mxu0 %v4823_v33  ;;  %v4836_v28 = vld [vmem:[%s7639_s11 + $0x88] sm:$0xff] }
0x12a7   : > { %5869 = vmatpush3.msra.mxu1 %v4811_v23  ;;  %5900 = vmatpush3.msra.mxu0 %v4823_v33  ;;  %v4835_v33 = vld [vmem:[%s7639_s11 + $0x80] sm:$0xff] }
0x12a8   : > { %5870 = vmatprep.subr.mxu1 %v4810_v37  ;;  %v3576_v41 = vpop.f32.mrf.mxu0  ;;  %5901 = vmatprep.subr.mxu0 %v4822_v38 }
0x12a9   : > { %5871 = vmatpush3.msra.mxu1 %v4810_v37  ;;  %5892 = vmatprep.mubr.msk.f32.mxu1 %vm884_vm1, %v3576_v41  ;;  %v4833_v37 = vld [vmem:[%s7639_s11 + $0x70] sm:$0xff] }
0x12aa   : > { %5872 = vmatprep.subr.mxu1 %v4809_v40  ;;  %5902 = vmatpush3.msra.mxu0 %v4822_v38  ;;  %v4832_v38 = vld [vmem:[%s7639_s11 + $0x68] sm:$0xff] }
0x12ab   : > { %5873 = vmatpush3.msra.mxu1 %v4809_v40  ;;  %5903 = vmatprep.subr.mxu0 %v4821_v15 }
0x12ac   : > { %5874 = vmatprep.subr.mxu1 %v4808_v42  ;;  %5904 = vmatpush3.msra.mxu0 %v4821_v15 }
0x12ad   : > { %5875 = vmatpush3.msra.mxu1 %v4808_v42  ;;  %5905 = vmatprep.subr.mxu0 %v4820_v43 }
0x12ae   : > { %5876 = vmatprep.subr.mxu1 %v4807_v44  ;;  %5906 = vmatpush3.msra.mxu0 %v4820_v43 }
0x12af   : > { %5877 = vmatpush3.msra.mxu1 %v4807_v44  ;;  %5907 = vmatprep.subr.mxu0 %v4819_v45 }
0x12b0   : > { %5878 = vmatprep.subr.mxu1 %v4806_v46  ;;  %5908 = vmatpush3.msra.mxu0 %v4819_v45 }
0x12b1   : > { %5879 = vmatpush3.msra.mxu1 %v4806_v46  ;;  %5909 = vmatprep.subr.mxu0 %v4818_v47  ;;  %v4829_v46 = vld [vmem:[%s7637_s9 + $0x1] ss:$0 sm:$0xff] }
0x12b2   : > { %5880 = vmatprep.subr.mxu1 %v4805_v48  ;;  %5910 = vmatpush3.msra.mxu0 %v4818_v47 }
0x12b3   : > { %5881 = vmatpush3.msra.mxu1 %v4805_v48  ;;  %5911 = vmatprep.subr.mxu0 %v4817_v49 }
0x12b4   : > { %5882 = vmatprep.subr.mxu1 %v4804_v50  ;;  %5912 = vmatpush3.msra.mxu0 %v4817_v49 }
0x12b5   : > { %5883 = vmatpush3.msra.mxu1 %v4804_v50  ;;  %5913 = vmatprep.subr.mxu0 %v4816_v14 }
0x12b6   : > { %5884 = vmatprep.subr.mxu1 %v4803_v51  ;;  %5914 = vmatpush3.msra.mxu0 %v4816_v14  ;;  %v4830_v14 = vld [vmem:[%s7638_s10 + $0x1] ss:$0 sm:$0xff] }
0x12b7   : > { %5885 = vmatpush3.msra.mxu1 %v4803_v51  ;;  %5915 = vmatprep.subr.mxu0 %v4815_v53 }
0x12b8   : > { %5886 = vmatprep.subr.mxu1 %v4802_v52  ;;  %5916 = vmatpush3.msra.mxu0 %v4815_v53 }
0x12b9   : > { %5887 = vmatpush3.msra.mxu1 %v4802_v52  ;;  %5917 = vmatprep.subr.mxu0 %v4814_v55 }
0x12ba   : > { %5888 = vmatprep.subr.mxu1 %v4801_v54  ;;  %5918 = vmatpush3.msra.mxu0 %v4814_v55  ;;  %v4860_v55 = vld [vmem:[%s7641_s13 + $0xf0] sm:$0xff] }
0x12bb   : > { %5889 = vmatpush3.msra.mxu1 %v4801_v54  ;;  %v4861_v54 = vld [vmem:[%s7641_s13 + $0xf8] sm:$0xff] }
0x12bc   : > { %5890 = vmatprep.subr.mxu1 %v4800_v57  ;;  %5949 = vmatprep.subr.mxu0 %v4861_v54 }
0x12bd   : > { %5891 = vmatpush3.msra.mxu1 %v4800_v57  ;;  %v4859_v57 = vld [vmem:[%s7641_s13 + $0xe8] sm:$0xff] }
0x12be   : > { %5893 = vmatmul.mubr.msk.f32.vlgmr.msra.gmra.mxu1 %vm884_vm1, %v7369_v39  ;;  %5922 = vmatprep.subr.mxu1 %v4842_v29  ;;  %v4831_v39 = vld [vmem:[%s7639_s11 + $0x60] sm:$0xff] }
0x12bf   : > { %5923 = vmatpush3.msra.mxu1 %v4842_v29 }
0x12c0   : > { %5924 = vmatprep.subr.mxu1 %v4841_v30 }
0x12c1   : > { %5925 = vmatpush3.msra.mxu1 %v4841_v30 }
0x12c2   : > { %5926 = vmatprep.subr.mxu1 %v4840_v22 }
0x12c3   : > { %5927 = vmatpush3.msra.mxu1 %v4840_v22 }
0x12c4   : > { %5928 = vmatprep.subr.mxu1 %v4839_v31 }
0x12c5   : > { %5929 = vmatpush3.msra.mxu1 %v4839_v31 }
0x12c6   : > { %5930 = vmatprep.subr.mxu1 %v4838_v26 }
0x12c7   : > { %5931 = vmatpush3.msra.mxu1 %v4838_v26 }
0x12c8   : > { %5932 = vmatprep.subr.mxu1 %v4837_v32 }
0x12c9   : > { %5933 = vmatpush3.msra.mxu1 %v4837_v32  ;;  %v4862_v32 = vld [vmem:[%s7642_s14 + $0x1] ss:$0 sm:$0xff] }
0x12ca   : > { %5934 = vmatprep.subr.mxu1 %v4836_v28 }
0x12cb   : > { %5935 = vmatpush3.msra.mxu1 %v4836_v28 }
0x12cc   : > { %5936 = vmatprep.subr.mxu1 %v4835_v33 }
0x12cd   : > { %5937 = vmatpush3.msra.mxu1 %v4835_v33 }
0x12ce   : > { %5938 = vmatprep.subr.mxu1 %v4834_v35 }
0x12cf   : > { %5939 = vmatpush3.msra.mxu1 %v4834_v35 }
0x12d0   : > { %5940 = vmatprep.subr.mxu1 %v4833_v37 }
0x12d1   : > { %5941 = vmatpush3.msra.mxu1 %v4833_v37 }
0x12d2   : > { %5942 = vmatprep.subr.mxu1 %v4832_v38 }
0x12d3   : > { %5943 = vmatpush3.msra.mxu1 %v4832_v38 }
0x12d4   : > { %5944 = vmatprep.subr.mxu1 %v4831_v39 }
0x12d5   : > { %5945 = vmatpush3.msra.mxu1 %v4831_v39 }
0x1336   : > { %v5813_v59 = vpop.f32.mrf.mxu0 }
0x1338   : > { %v3586_v60 = vpop.f32.mrf.mxu0 }
0x1339   : > { %5919 = vmatprep.mubr.msk.f32.mxu0 %vm884_vm1, %v3586_v60  ;;  %v4857_v60 = vld [vmem:[%s7641_s13 + $0xd8] sm:$0xff] }
0x133a   : > { %5920 = vmatmul.mubr.msk.f32.vlgmr.msra.gmra.mxu0 %vm884_vm1, %v5813_v59  ;;  %v4858_v59 = vld [vmem:[%s7641_s13 + $0xe0] sm:$0xff] }
0x133b   : > { %5950 = vmatpush3.msra.mxu0 %v4861_v54  ;;  %v4289_v54 = vld [vmem:[%s7645_s17 + $0x28] sm:$0xff] }
0x133c   : > { %5951 = vmatprep.subr.mxu0 %v4860_v55 }
0x133d   : > { %5952 = vmatpush3.msra.mxu0 %v4860_v55  ;;  %v4288_v55 = vld [vmem:[%s7645_s17 + $0x20] sm:$0xff] }
0x133e   : > { %5953 = vmatprep.subr.mxu0 %v4859_v57 }
0x133f   : > { %5954 = vmatpush3.msra.mxu0 %v4859_v57  ;;  %v4287_v57 = vld [vmem:[%s7645_s17 + $0x18] sm:$0xff] }
0x1340   : > { %5955 = vmatprep.subr.mxu0 %v4858_v59 }
0x1341   : > { %5956 = vmatpush3.msra.mxu0 %v4858_v59  ;;  %v4286_v59 = vld [vmem:[%s7645_s17 + $0x10] sm:$0xff] }
0x1342   : > { %5957 = vmatprep.subr.mxu0 %v4857_v60 }
0x1343   : > { %5958 = vmatpush3.msra.mxu0 %v4857_v60  ;;  %v4285_v60 = vld [vmem:[%s7645_s17 + $0x8] sm:$0xff] }
0x1362   : > { %v5867_v63 = vpop.f32.mrf.mxu0 }
0x1364   : > { %v3774_v1 = vpop.f32.mrf.mxu0 }
0x1366   : > { %v5840_v61 = vpop.f32.mrf.mxu1 }
0x1367   : > { %v3780_v34 = vadd.f32 %v5867_v63, %v5840_v61  ;;  %v4856_v61 = vld [vmem:[%s7641_s13 + $0xd0] sm:$0xff]  ;;  %v4854_v63 = vld [vmem:[%s7641_s13 + $0xc0] sm:$0xff] }
0x1368   : > { %v3693_v62 = vpop.f32.mrf.mxu1  ;;  %5959 = vmatprep.subr.mxu0 %v4856_v61 }
0x1369   : > { %v3775_v4 = vadd.f32 %v3774_v1, %v3693_v62  ;;  %v4855_v62 = vld [vmem:[%s7641_s13 + $0xc8] sm:$0xff]  ;;  %5960 = vmatpush3.msra.mxu0 %v4856_v61  ;;  %v4284_v61 = vld [vmem:[%s7645_s17] sm:$0xff] }
0x136a   : > { %5961 = vmatprep.subr.mxu0 %v4855_v62  ;;  %v4851_v1 = vld [vmem:[%s7641_s13 + $0xa8] sm:$0xff] }
0x136b   : > { %5962 = vmatpush3.msra.mxu0 %v4855_v62  ;;  %v6132_v62 = vmov 0  }
0x136c   : > { %5963 = vmatprep.subr.mxu0 %v4854_v63  ;;  %6023 = vset.pattern.permute.xlu1 %v6132_v62 }
0x136d   : > { %5964 = vmatpush3.msra.mxu0 %v4854_v63  ;;  %v4391_v63 = vld [vmem:[%s771_s26 + $0x8] sm:$0xff]  ;;  %6022 = vset.pattern.permute.xlu0 %v6132_v62 }
0x137e   : > { %v5894_v0 = vpop.f32.mrf.mxu1 }
0x137f   : > { %v3878_v5 = vadd.f32 %v5894_v0, %v3780_v34  ;;  %v4853_v0 = vld [vmem:[%s7641_s13 + $0xb8] sm:$0xff]  ;;  %v4852_v34 = vld [vmem:[%s7641_s13 + $0xb0] sm:$0xff] }
0x1380   : > { %v3868_v36 = vpop.f32.mrf.mxu1  ;;  %5965 = vmatprep.subr.mxu0 %v4853_v0 }
0x1381   : > { %v3877_v8 = vadd.f32 %v3868_v36, %v3775_v4  ;;  %5966 = vmatpush3.msra.mxu0 %v4853_v0  ;;  %v4850_v36 = vld [vmem:[%s7641_s13 + $0xa0] sm:$0xff]  ;;  %v4849_v4 = vld [vmem:[%s7641_s13 + $0x98] sm:$0xff] }
0x1382   : > { %5967 = vmatprep.subr.mxu0 %v4852_v34  ;;  %v4390_v0 = vld [vmem:[%s771_s26] sm:$0xff] }
0x1383   : > { %5968 = vmatpush3.msra.mxu0 %v4852_v34 }
0x1384   : > { %5969 = vmatprep.subr.mxu0 %v4851_v1 }
0x1385   : > { %5970 = vmatpush3.msra.mxu0 %v4851_v1 }
0x1386   : > { %5971 = vmatprep.subr.mxu0 %v4850_v36 }
0x1387   : > { %5972 = vmatpush3.msra.mxu0 %v4850_v36 }
0x1388   : > { %5973 = vmatprep.subr.mxu0 %v4849_v4 }
0x1389   : > { %5974 = vmatpush3.msra.mxu0 %v4849_v4 }
0x13fa   : > { %v5921_v7 = vpop.f32.mrf.mxu0 }
0x13fb   : > { %v3974_v9 = vadd.f32 %v5921_v7, %v3878_v5  ;;  %v4848_v5 = vld [vmem:[%s7641_s13 + $0x90] sm:$0xff]  ;;  %v4847_v7 = vld [vmem:[%s7641_s13 + $0x88] sm:$0xff] }
0x13fc   : > { %v3964_v10 = vpop.f32.mrf.mxu0  ;;  %5975 = vmatprep.subr.mxu0 %v4848_v5 }
0x13fd   : > { %v3976_v6 = vadd.f32 %v3974_v9, %v6923_v56  ;;  %v3973_v11 = vadd.f32 %v3964_v10, %v3877_v8  ;;  %5976 = vmatpush3.msra.mxu0 %v4848_v5  ;;  %v4846_v8 = vld [vmem:[%s7641_s13 + $0x80] sm:$0xff] }
0x13fe   : > { %5977 = vmatprep.subr.mxu0 %v4847_v7  ;;  %v4843_v9 = vld [vmem:[%s7640_s12 + $0x1] ss:$0 sm:$0xff] }
0x13ff   : > { %v7435_v3 = vadd.f32 %v4828_v2, %v3976_v6  ;;  %v3975_v12 = vadd.f32 %v3973_v11, %v6926_v58  ;;  %5978 = vmatpush3.msra.mxu0 %v4847_v7 }
0x1400   : > { %5979 = vmatprep.subr.mxu0 %v4846_v8 }
0x1401   : > { %v7438_v13 = vadd.f32 %v4828_v2, %v3975_v12  ;;  %v3989_v16 = vsel %vm884_vm1, %v7435_v3, 0.0  ;;  %5980 = vmatpush3.msra.mxu0 %v4846_v8 }
0x1402   : > { %3990 = vadd.xlane.f32.xlu1 %v3989_v16 }
0x1403   : > { %v3986_v17 = vsel %vm884_vm1, %v7438_v13, 0.0 }
0x1404   : > { %3987 = vadd.xlane.f32.xlu0 %v3986_v17 }
0x148b   : > { %v3991_v18 = vpop.xlane.xlu1 %3990 }
0x148c   : > { %v3993_v19 = vmul.f32 0.010416667, %v3991_v18 }
0x148d   : > { %v3988_v20 = vpop.xlane.xlu0 %3987 }
0x148e   : > { %v3995_v56 = vsub.f32 %v7435_v3, %v3993_v19  ;;  %v3992_v23 = vmul.f32 0.010416667, %v3988_v20 }
0x1490   : > { %v3994_v24 = vsub.f32 %v7438_v13, %v3992_v23  ;;  %v3997_v25 = vmul.f32 %v3995_v56, %v3995_v56 }
0x1492   : > { %v4001_v58 = vsel %vm884_vm1, %v3997_v25, 0.0  ;;  %v3996_v27 = vmul.f32 %v3994_v24, %v3994_v24 }
0x1493   : > { %4002 = vadd.xlane.f32.xlu1 %v4001_v58 }
0x1494   : > { %v3998_v21 = vsel %vm884_vm1, %v3996_v27, 0.0 }
0x1495   : > { %3999 = vadd.xlane.f32.xlu0 %v3998_v21 }
0x151c   : > { %v4003_v40 = vpop.xlane.xlu1 %4002 }
0x151d   : > { %v4005_v41 = vmul.f32 0.010416667, %v4003_v40 }
0x151e   : > { %v4000_v15 = vpop.xlane.xlu0 %3999 }
0x151f   : > { %v4007_v42 = vadd.f32 1e-05, %v4005_v41  ;;  %v4004_v43 = vmul.f32 0.010416667, %v4000_v15 }
0x1521   : > { %6104 = vrsqrt.f32 %v4007_v42  ;;  %v4006_v44 = vadd.f32 1e-05, %v4004_v43 }
0x1523   : > { %6106 = vrsqrt.f32 %v4006_v44 }
0x152e   : > { %v6105_v45 = vpop.eup %6104 }
0x152f   : > { %v4011_v47 = vmul.f32 %v6105_v45, %v3995_v56 }
0x1530   : > { %v6107_v48 = vpop.eup %6106 }
0x1531   : > { %v4010_v49 = vmul.f32 %v6107_v48, %v3994_v24  ;;  %v4017_v50 = vmul.f32 %v4829_v46, %v4011_v47 }
0x1533   : > { %v4016_v51 = vmul.f32 %v4829_v46, %v4010_v49  ;;  %v4023_v53 = vadd.f32 %v4830_v14, %v4017_v50  ;;  %v4295_v49 = vld [vmem:[%s7645_s17 + $0x58] sm:$0xff]  ;;  %v4294_v50 = vld [vmem:[%s7645_s17 + $0x50] sm:$0xff] }
0x1534   : > { %5984 = vmatprep.subr.mxu1 %v4295_v49 }
0x1535   : > { %v4022_v52 = vadd.f32 %v4830_v14, %v4016_v51  ;;  %v4293_v14 = vld [vmem:[%s7645_s17 + $0x48] sm:$0xff]  ;;  %v4292_v51 = vld [vmem:[%s7645_s17 + $0x40] sm:$0xff] }
0x1537   : > { %5946 = vmatprep.mubr.msk.f32.mxu1 %vm884_vm1, %v4022_v52  ;;  %v4291_v52 = vld [vmem:[%s7645_s17 + $0x38] sm:$0xff] }
0x1538   : > { %5947 = vmatmul.mubr.msk.f32.vlgmr.msra.gmra.mxu1 %vm884_vm1, %v4023_v53  ;;  %v4290_v53 = vld [vmem:[%s7645_s17 + $0x30] sm:$0xff] }
0x1539   : > { %5985 = vmatpush3.msra.mxu1 %v4295_v49 }
0x153a   : > { %5986 = vmatprep.subr.mxu1 %v4294_v50 }
0x153b   : > { %5987 = vmatpush3.msra.mxu1 %v4294_v50 }
0x153c   : > { %5988 = vmatprep.subr.mxu1 %v4293_v14 }
0x153d   : > { %5989 = vmatpush3.msra.mxu1 %v4293_v14 }
0x153e   : > { %5990 = vmatprep.subr.mxu1 %v4292_v51 }
0x153f   : > { %5991 = vmatpush3.msra.mxu1 %v4292_v51 }
0x1540   : > { %5992 = vmatprep.subr.mxu1 %v4291_v52 }
0x1541   : > { %5993 = vmatpush3.msra.mxu1 %v4291_v52 }
0x1542   : > { %5994 = vmatprep.subr.mxu1 %v4290_v53 }
0x1543   : > { %5995 = vmatpush3.msra.mxu1 %v4290_v53 }
0x1544   : > { %5996 = vmatprep.subr.mxu1 %v4289_v54 }
0x1545   : > { %5997 = vmatpush3.msra.mxu1 %v4289_v54 }
0x1546   : > { %5998 = vmatprep.subr.mxu1 %v4288_v55 }
0x1547   : > { %5999 = vmatpush3.msra.mxu1 %v4288_v55 }
0x1548   : > { %6000 = vmatprep.subr.mxu1 %v4287_v57 }
0x1549   : > { %6001 = vmatpush3.msra.mxu1 %v4287_v57 }
0x154a   : > { %6002 = vmatprep.subr.mxu1 %v4286_v59 }
0x154b   : > { %6003 = vmatpush3.msra.mxu1 %v4286_v59 }
0x154c   : > { %6004 = vmatprep.subr.mxu1 %v4285_v60 }
0x154d   : > { %6005 = vmatpush3.msra.mxu1 %v4285_v60 }
0x154e   : > { %6006 = vmatprep.subr.mxu1 %v4284_v61 }
0x154f   : > { %6007 = vmatpush3.msra.mxu1 %v4284_v61 }
0x15f8   : > { %v5948_v2 = vpop.f32.mrf.mxu1 }
0x15f9   : > { %v4120_v10 = vadd.f32 %v5948_v2, %v4843_v9 }
0x15fa   : > { %v4114_v6 = vpop.f32.mrf.mxu1 }
0x15fb   : > { %v4124_v11 = vmul.f32 %v4120_v10, %v4120_v10  ;;  %v4115_v12 = vadd.f32 %v4843_v9, %v4114_v6  ;;  %v4863_v9 = vld [vmem:[%s7643_s15] ss:$0 sm:$0xff] }
0x15fd   : > { %v4126_v16 = vmul.f32 %v4124_v11, %v4120_v10  ;;  %v4123_v17 = vmul.f32 %v4115_v12, %v4115_v12 }
0x15ff   : > { %v4128_v18 = vmul.f32 0.044715, %v4126_v16  ;;  %v4125_v19 = vmul.f32 %v4123_v17, %v4115_v12 }
0x1601   : > { %v4130_v20 = vadd.f32 %v4128_v18, %v4120_v10  ;;  %v4127_v56 = vmul.f32 0.044715, %v4125_v19  ;;  %v4865_v19 = vld [vmem:[%s7646_s18] ss:$0 sm:$0xff] }
0x1603   : > { %v4132_v23 = vmul.f32 0.7978846, %v4130_v20  ;;  %v4129_v24 = vadd.f32 %v4127_v56, %v4115_v12  ;;  %v4387_v56 = vld [vmem:[%s766_s30 + $0x8] sm:$0xff] }
0x1605   : > { %6108 = vtanh.f32 %v4132_v23  ;;  %v4131_v25 = vmul.f32 0.7978846, %v4129_v24 }
0x1607   : > { %6110 = vtanh.f32 %v4131_v25 }
0x1612   : > { %v6109_v58 = vpop.eup %6108 }
0x1613   : > { %v4136_v27 = vadd.f32 1.0, %v6109_v58  ;;  %v4386_v58 = vld [vmem:[%s766_s30] sm:$0xff] }
0x1614   : > { %v6111_v21 = vpop.eup %6110 }
0x1615   : > { %v4135_v29 = vadd.f32 1.0, %v6111_v21  ;;  %v4138_v30 = vmul.f32 0.5, %v4136_v27 }
0x1617   : > { %v4137_v22 = vmul.f32 0.5, %v4135_v29  ;;  %v4140_v26 = vmul.f32 %v4138_v30, %v4120_v10 }
0x1619   : > { %v4139_v31 = vmul.f32 %v4137_v22, %v4115_v12  ;;  %v4864_v12 = vld [vmem:[%s7644_s16] ss:$0 sm:$0xff] }
0x161b   : > { %5981 = vmatprep.mubr.f32.mxu0 %v4139_v31 }
0x161c   : > { %5982 = vmatmul.mubr.f32.vlgmr.msra.gmra.mxu0 %v4140_v26 }
0x16dc   : > { %v5983_v28 = vpop.f32.mrf.mxu0 }
0x16dd   : > { %v4235_v33 = vadd.f32 %v5983_v28, %v4862_v32 }
0x16de   : > { %v4229_v35 = vpop.f32.mrf.mxu0 }
0x16df   : > { %v4230_v37 = vadd.f32 %v4862_v32, %v4229_v35  ;;  %v4239_v38 = vadd.f32 %v4235_v33, %v7435_v3 }
0x16e1   : > { %v4245_v39 = vsel %vm884_vm1, %v4239_v38, 0.0  ;;  %v4238_v40 = vadd.f32 %v4230_v37, %v7438_v13 }
0x16e2   : > { %4246 = vadd.xlane.f32.xlu1 %v4245_v39 }
0x16e3   : > { %v4242_v41 = vsel %vm884_vm1, %v4238_v40, 0.0 }
0x16e4   : > { %4243 = vadd.xlane.f32.xlu0 %v4242_v41 }
0x176b   : > { %v4247_v15 = vpop.xlane.xlu1 %4246 }
0x176c   : > { %v4249_v42 = vmul.f32 0.010416667, %v4247_v15 }
0x176d   : > { %v4244_v43 = vpop.xlane.xlu0 %4243 }
0x176e   : > { %v7550_v44 = vsub.f32 %v4239_v38, %v4249_v42  ;;  %v4248_v45 = vmul.f32 0.010416667, %v4244_v43 }
0x1770   : > { %v7552_v46 = vsub.f32 %v4238_v40, %v4248_v45  ;;  %v4253_v47 = vmul.f32 %v7550_v44, %v7550_v44 }
0x1772   : > { %v4257_v3 = vsel %vm884_vm1, %v4253_v47, 0.0  ;;  %v4252_v13 = vmul.f32 %v7552_v46, %v7552_v46 }
0x1773   : > { %4258 = vadd.xlane.f32.xlu1 %v4257_v3 }
0x1774   : > { %v4254_v48 = vsel %vm884_vm1, %v4252_v13, 0.0 }
0x1775   : > { %4255 = vadd.xlane.f32.xlu0 %v4254_v48 }
0x1784   : > { %4399 = vperm.xlu1 %6023, %v4391_v63  }
0x178b   : > { %4394 = vperm.xlu0 %6022, %v4390_v0  }
0x17fc   : > { %v4259_v34 = vpop.xlane.xlu1 %4258 }
0x17fd   : > { %v4261_v1 = vmul.f32 0.010416667, %v4259_v34 }
0x17fe   : > { %v4256_v36 = vpop.xlane.xlu0 %4255 }
0x17ff   : > { %v4263_v4 = vadd.f32 1e-05, %v4261_v1  ;;  %v4260_v5 = vmul.f32 0.010416667, %v4256_v36 }
0x1800   : > { %v4400_v25 = vpop.permute.xlu1 %4399 }
0x1801   : > { %6112 = vrsqrt.f32 %v4263_v4  ;;  %v4262_v7 = vadd.f32 1e-05, %v4260_v5 }
0x1803   : > { %6114 = vrsqrt.f32 %v4262_v7 }
0x1806   : > { %v4395_v29 = vpop.permute.xlu0 %4394 }
0x180e   : > { %v6113_v8 = vpop.eup %6112 }
0x180f   : > { %v4267_v2 = vmul.f32 %v6113_v8, %v7550_v44 }
0x1810   : > { %v6115_v10 = vpop.eup %6114 }
0x1811   : > { %v4266_v6 = vmul.f32 %v6115_v10, %v7552_v46  ;;  %v4275_v11 = vmul.f32 %v4863_v9, %v4267_v2 }
0x1813   : > { %v4274_v16 = vmul.f32 %v4863_v9, %v4266_v6  ;;  %v4283_v18 = vadd.f32 %v4864_v12, %v4275_v11 }
0x1815   : > { %v4282_v17 = vadd.f32 %v4864_v12, %v4274_v16 }
0x1817   : > { %6008 = vmatprep.mubr.msk.f32.mxu1 %vm884_vm1, %v4282_v17 }
0x1818   : > { %6009 = vmatmul.mubr.msk.f32.vlgmr.msra.gmra.mxu1 %vm884_vm1, %v4283_v18 }
0x18d8   : > { %v6010_v20 = vpop.f32.mrf.mxu1 }
0x18d9   : > { %v4381_v23 = vadd.f32 %v6010_v20, %v4865_v19 }
0x18da   : > { %v4375_v24 = vpop.f32.mrf.mxu1 }
0x18db   : > { %4385 = vst [vmem:[%s779_s27 + $0x8] sm:$0xff] %v4381_v23  ;;  %v4376_v27 = vadd.f32 %v4865_v19, %v4375_v24  ;;  %v4389_v21 = vsub.f32 %v4381_v23, %v4387_v56 }
0x18dd   : > { %4384 = vst [vmem:[%s779_s27] sm:$0xff] %v4376_v27  ;;  %v4403_v30 = vmul.f32 %v4400_v25, %v4389_v21  ;;  %v4388_v22 = vsub.f32 %v4376_v27, %v4386_v58 }
0x18df   : > { %v4402_v31 = vmul.f32 %v4395_v29, %v4388_v22  ;;  %v4405_v26 = vmul.f32 %v4403_v30, %v4403_v30 }
0x18e1   : > { %v4404_v32 = vmul.f32 %v4402_v31, %v4402_v31 }
0x18e3   : > { %v4406_v28 = vadd.f32 %v4405_v26, %v4404_v32 }
0x18e5   : > { %4407 = vadd.xlane.f32.xlu1 %v4406_v28 }
0x196e   : > { %v4408_v33 = vpop.xlane.xlu1 %4407 }
0x196f   : > { %v4409_v35 = vrot.slane %v4408_v33, 4 }
0x1971   : > { %v4410_v37 = vadd.f32 %v4409_v35, %v4408_v33 }
0x1973   : > { %v4411_v38 = vrot.slane %v4410_v37, 2 }
0x1975   : > { %v4412_v39 = vadd.f32 %v4411_v38, %v4410_v37 }
0x1977   : > { %v4413_v40 = vrot.slane %v4412_v39, 1 }
0x1979   : > { %v4414_v41 = vadd.f32 %v4413_v40, %v4412_v39 }
0x197b   : > { %6011 = vpush %v4414_v41 }
0x19ac   : > { %s6012_s30 = spop %6011 }
0x19ad   : > { %v4416_v15 = vstv %s6012_s30 }
0x19ae   : > { %4419 = vst.msk [vmem:[%s774_s22] sm:$0x1] %vm4418_vm3, %v4416_v15 }
0x19af PF: > { %s7682_s25 = sld [smem:[#allocation2_spill]] }
0x19b5   : > { %s34_s4 = sadd.s32 1, %s7682_s25  }
0x19b6   : > { %p31_p4 = scmp.ge.s32.totalorder %s34_s4, 4  }
0x19b8   :  { %33 = sbr.rel (!%p31_p4) target bundleno = 10 (0xa), region = 176 }

</bundles_post_ra>
